<compile_context>
chip_gen: v5e
topology: v5e:2x2
jax: 0.10.0
libtpu: 0.0.40
codegen_flags: <defaults>
</compile_context>

<pallas_src>
import functools

import jax
import jax.numpy as jnp
from jax import lax
from jax.experimental import pallas as pl
from jax.experimental.pallas import tpu as pltpu

_EPS = 1e-5
_MAXPAD = 12  # largest front-end padding (branch 3: pad=12, dil=6)
_PARALLEL = pltpu.CompilerParams(dimension_semantics=("parallel",))


def _bcast(shape):
    """BlockSpec for a broadcast (non-batched) operand: full block at (0,...,0)."""
    zeros = (0,) * len(shape)
    return pl.BlockSpec(tuple(shape), lambda i: zeros)


# ----------------------------------------------------------------------------
# Front-end: the three dilated Conv1d(1->8,k=5) + GroupNorm(1,8) branches and
# the following tanh, fused into ONE kernel writing the concatenated (24, L).
# ----------------------------------------------------------------------------
def _frontend_kernel(x_ref, w_ref, b_ref, g_ref, be_ref, o_ref, *, L, eps):
    # x_ref: (1, 1, L + 2*_MAXPAD); w_ref: (3, 8, 5); b/g/be: (3, 8, 1)
    # o_ref: (1, 24, L)
    x = x_ref[0].astype(jnp.float32)                       # (1, Lpad)
    for idx, (pad, dil) in enumerate(((2, 1), (6, 3), (12, 6))):
        w = w_ref[idx]                                     # (8, 5)
        base = _MAXPAD - pad
        acc = jnp.zeros((8, L), jnp.float32)
        for k in range(5):                                 # Cin=1: rank-1 taps on the VPU
            xs = x[:, base + k * dil: base + k * dil + L]  # (1, L) static slice
            acc = acc + w[:, k:k + 1] * xs                 # (8,1)*(1,L) broadcast MAC
        acc = acc + b_ref[idx]
        mean = jnp.mean(acc, keepdims=True)
        var = jnp.mean(jnp.square(acc - mean), keepdims=True)
        y = (acc - mean) * lax.rsqrt(var + eps)
        y = jnp.tanh(y * g_ref[idx] + be_ref[idx])         # GN affine + tanh
        o_ref[0, idx * 8:(idx + 1) * 8, :] = y.astype(o_ref.dtype)


def frontend(x, p):
    B, _, L = x.shape
    x_p = jnp.pad(x, ((0, 0), (0, 0), (_MAXPAD, _MAXPAD)))
    kern = functools.partial(_frontend_kernel, L=L, eps=_EPS)
    return pl.pallas_call(
        kern,
        out_shape=jax.ShapeDtypeStruct((B, 24, L), x.dtype),
        grid=(B,),
        in_specs=[pl.BlockSpec((1, 1, L + 2 * _MAXPAD), lambda i: (i, 0, 0)),
                  _bcast((3, 8, 5)), _bcast((3, 8, 1)),
                  _bcast((3, 8, 1)), _bcast((3, 8, 1))],
        out_specs=pl.BlockSpec((1, 24, L), lambda i: (i, 0, 0)),
        compiler_params=_PARALLEL,
    )(x_p, p["w_fe"], p["b_fe"], p["g_fe"], p["be_fe"])


# ----------------------------------------------------------------------------
# Fused Conv1d + GroupNorm(1) + tanh (+ optional residual add) kernel.
# Also serves ConvTranspose1d after a zero-insert upsample in the wrapper.
# ----------------------------------------------------------------------------
def _conv_gn_tanh_kernel(x_ref, w_ref, b_ref, g_ref, be_ref, *rest,
                         K, Lout, eps, add_res):
    if add_res:
        r_ref, o_ref = rest
    else:
        (o_ref,) = rest
    # x_ref: (1, Cin, Lpad); w_ref: (K, Cout, Cin); b/g/be: (Cout, 1)
    x = x_ref[0].astype(jnp.float32)                       # (Cin, Lpad)
    Cout = o_ref.shape[1]
    acc = jnp.zeros((Cout, Lout), jnp.float32)
    for k in range(K):                                     # K <= 4 small MXU dots
        acc = acc + jnp.dot(w_ref[k], x[:, k:k + Lout],
                            preferred_element_type=jnp.float32)
    acc = acc + b_ref[...]
    mean = jnp.mean(acc, keepdims=True)
    var = jnp.mean(jnp.square(acc - mean), keepdims=True)
    y = (acc - mean) * lax.rsqrt(var + eps)
    y = jnp.tanh(y * g_ref[...] + be_ref[...])
    if add_res:
        y = y + r_ref[0].astype(jnp.float32)               # fused rnn_out + cnn_out
    o_ref[0] = y.astype(o_ref.dtype)


def conv_gn_tanh(x, w_k, b, gamma, beta, *, pad, res=None):
    # x: (B, Cin, L); w_k: (K, Cout, Cin); b/gamma/beta: (Cout, 1)
    B, Cin, L = x.shape
    K, Cout, _ = w_k.shape
    Lout = L + 2 * pad - (K - 1)
    x_p = jnp.pad(x, ((0, 0), (0, 0), (pad, pad))) if pad else x
    in_arrays = [x_p, w_k, b, gamma, beta]
    in_specs = [pl.BlockSpec((1, Cin, L + 2 * pad), lambda i: (i, 0, 0)),
                _bcast((K, Cout, Cin)), _bcast((Cout, 1)),
                _bcast((Cout, 1)), _bcast((Cout, 1))]
    if res is not None:
        in_arrays.append(res)
        in_specs.append(pl.BlockSpec((1, Cout, Lout), lambda i: (i, 0, 0)))
    kern = functools.partial(_conv_gn_tanh_kernel, K=K, Lout=Lout, eps=_EPS,
                             add_res=res is not None)
    return pl.pallas_call(
        kern,
        out_shape=jax.ShapeDtypeStruct((B, Cout, Lout), x.dtype),
        grid=(B,),
        in_specs=in_specs,
        out_specs=pl.BlockSpec((1, Cout, Lout), lambda i: (i, 0, 0)),
        compiler_params=_PARALLEL,
    )(*in_arrays)


def deconv_gn_tanh(x, w_k, b, gamma, beta, *, stride, pad_t):
    # PyTorch ConvTranspose1d == zero-insert upsample + ordinary conv with the
    # (already flipped/transposed) weight w_k, conv pad = K-1-pad_t.
    # TODO(synk): polyphase decomposition would drop the zero-insert glue and
    # halve the MACs; kept as XLA glue to avoid in-kernel interleave relayouts.
    B, Cin, L = x.shape
    K = w_k.shape[0]
    Lup = (L - 1) * stride + 1
    x_up = jnp.zeros((B, Cin, Lup), x.dtype).at[:, :, ::stride].set(x)
    return conv_gn_tanh(x_up, w_k, b, gamma, beta, pad=K - 1 - pad_t)


# ----------------------------------------------------------------------------
# Bidirectional GRU layer kernel (PyTorch gate order r, z, n; h0 = 0).
# Gates stacked along 3H; input projections hoisted out of the recurrence;
# outputs buffered in VMEM scratch; optional fused Linear epilogue.
# ----------------------------------------------------------------------------
def _gru_bidir_kernel(x_ref, wif_ref, whf_ref, bif_ref, bhf_ref,
                      wib_ref, whb_ref, bib_ref, bhb_ref,
                      *rest, H, fuse_linear):
    if fuse_linear:
        wo_ref, bo_ref, o_ref, xf_buf, xb_buf, out_buf = rest
    else:
        o_ref, xf_buf, xb_buf, out_buf = rest

    T = x_ref.shape[1]
    x = x_ref[0].astype(jnp.float32)                       # (T, I)

    # Hoisted input projections: one MXU matmul per direction, bias folded in.
    xf_buf[...] = jnp.dot(x, wif_ref[...],
                          preferred_element_type=jnp.float32) + bif_ref[...]
    xb_buf[...] = jnp.dot(x, wib_ref[...],
                          preferred_element_type=jnp.float32) + bib_ref[...]

    whf = whf_ref[...]
    bhf = bhf_ref[...]
    whb = whb_ref[...]
    bhb = bhb_ref[...]

    def cell(xi, h, wh, bh):
        # xi: (1, 3H) precomputed input projection (+ bi); h: (1, H)
        hh = jnp.dot(h, wh, preferred_element_type=jnp.float32) + bh   # (1, 3H)
        r = jax.nn.sigmoid(xi[:, 0:H] + hh[:, 0:H])
        z = jax.nn.sigmoid(xi[:, H:2 * H] + hh[:, H:2 * H])
        n = jnp.tanh(xi[:, 2 * H:3 * H] + r * hh[:, 2 * H:3 * H])
        return (1.0 - z) * n + z * h

    def body(t, carry):
        hf, hb = carry
        tb = T - 1 - t
        hf = cell(xf_buf[pl.ds(t, 1), :], hf, whf, bhf)
        hb = cell(xb_buf[pl.ds(tb, 1), :], hb, whb, bhb)
        out_buf[pl.ds(t, 1), 0:H] = hf
        out_buf[pl.ds(tb, 1), H:2 * H] = hb
        return (hf, hb)

    h0 = jnp.zeros((1, H), jnp.float32)
    lax.fori_loop(0, T, body, (h0, h0))

    if fuse_linear:
        y = jnp.dot(out_buf[...], wo_ref[...],
                    preferred_element_type=jnp.float32) + bo_ref[...]
        o_ref[0] = y.astype(o_ref.dtype)                   # (T, 1)
    else:
        o_ref[0] = out_buf[...].astype(o_ref.dtype)        # one bulk (T, 2H) store


def gru_bidir(x, pf, pb, wo=None, bo=None):
    # x: (B, T, I); pf/pb: wi (I,3H), wh (H,3H), bi/bh (1,3H); optional Linear.
    B, T, I = x.shape
    H = pf["wh"].shape[0]
    fuse_linear = wo is not None
    out_f = 1 if fuse_linear else 2 * H

    in_arrays = [x,
                 pf["wi"], pf["wh"], pf["bi"], pf["bh"],
                 pb["wi"], pb["wh"], pb["bi"], pb["bh"]]
    in_specs = [pl.BlockSpec((1, T, I), lambda i: (i, 0, 0)),
                _bcast((I, 3 * H)), _bcast((H, 3 * H)),
                _bcast((1, 3 * H)), _bcast((1, 3 * H)),
                _bcast((I, 3 * H)), _bcast((H, 3 * H)),
                _bcast((1, 3 * H)), _bcast((1, 3 * H))]
    if fuse_linear:
        in_arrays += [wo, bo]
        in_specs += [_bcast(wo.shape), _bcast(bo.shape)]

    kern = functools.partial(_gru_bidir_kernel, H=H, fuse_linear=fuse_linear)
    return pl.pallas_call(
        kern,
        out_shape=jax.ShapeDtypeStruct((B, T, out_f), x.dtype),
        grid=(B,),
        in_specs=in_specs,
        out_specs=pl.BlockSpec((1, T, out_f), lambda i: (i, 0, 0)),
        scratch_shapes=[pltpu.VMEM((T, 3 * H), jnp.float32),
                        pltpu.VMEM((T, 3 * H), jnp.float32),
                        pltpu.VMEM((T, 2 * H), jnp.float32)],
        compiler_params=_PARALLEL,
    )(*in_arrays)


# ----------------------------------------------------------------------------
# Parameters (deterministic synthetic init; layouts pre-converted for kernels)
# ----------------------------------------------------------------------------
def build_params(key):
    keys = iter(jax.random.split(key, 64))
    H = 8

    def uni(shape, bound):
        return jax.random.uniform(next(keys), shape, jnp.float32, -bound, bound)

    def xavier(shape):                       # conv-style weight (dim0, dim1, K)
        k = shape[-1]
        fan_in, fan_out = shape[1] * k, shape[0] * k
        return uni(shape, (6.0 / (fan_in + fan_out)) ** 0.5)

    def conv_prep(w):                        # (Cout, Cin, K) -> (K, Cout, Cin)
        return jnp.transpose(w, (2, 0, 1))

    def deconv_prep(w):                      # (Cin, Cout, K) -> flipped fwd-conv (K, Cout, Cin)
        return jnp.transpose(jnp.flip(w, axis=2), (2, 1, 0))

    def gn(c):
        return jnp.ones((c, 1), jnp.float32), jnp.zeros((c, 1), jnp.float32)

    def gru_dir(I):                          # PyTorch init scale 1/sqrt(H), gates [r|z|n]
        b = 1.0 / (H ** 0.5)
        return {"wi": uni((I, 3 * H), b), "wh": uni((H, 3 * H), b),
                "bi": uni((1, 3 * H), b), "bh": uni((1, 3 * H), b)}

    p = {}
    # Front end: 3x (Conv1d(1->8, k=5) + GroupNorm(1,8)), stacked for the fused kernel.
    p["w_fe"] = jnp.stack([xavier((8, 1, 5)).reshape(8, 5) for _ in range(3)])  # (3,8,5)
    p["b_fe"] = jnp.zeros((3, 8, 1), jnp.float32)
    p["g_fe"] = jnp.ones((3, 8, 1), jnp.float32)
    p["be_fe"] = jnp.zeros((3, 8, 1), jnp.float32)
    # self.cnn convs (24->16 k3, 16->16 k3, 16->16 k1) + GroupNorm(1,16)
    p["wc1"] = conv_prep(xavier((16, 24, 3))); p["bc1"] = jnp.zeros((16, 1), jnp.float32)
    p["gc1"], p["bec1"] = gn(16)
    p["wc2"] = conv_prep(xavier((16, 16, 3))); p["bc2"] = jnp.zeros((16, 1), jnp.float32)
    p["gc2"], p["bec2"] = gn(16)
    p["wc3"] = conv_prep(xavier((16, 16, 1))); p["bc3"] = jnp.zeros((16, 1), jnp.float32)
    p["gc3"], p["bec3"] = gn(16)
    # 3-layer bidirectional GRU (input sizes 1, 16, 16; hidden 8)
    p["gru"] = [{"f": gru_dir(I), "b": gru_dir(I)} for I in (1, 2 * H, 2 * H)]
    # self.up: ConvTranspose1d(16->8, k4, s2, p1) and (8->8, k4, s2, p1) + GN(1,8)
    p["wu1"] = deconv_prep(xavier((16, 8, 4))); p["bu1"] = jnp.zeros((8, 1), jnp.float32)
    p["gu1"], p["beu1"] = gn(8)
    p["wu2"] = deconv_prep(xavier((8, 8, 4)));  p["bu2"] = jnp.zeros((8, 1), jnp.float32)
    p["gu2"], p["beu2"] = gn(8)
    # gru_out: 1 layer bidirectional, input 8, hidden 8; out: Linear(16 -> 1)
    p["gru_out"] = {"f": gru_dir(H), "b": gru_dir(H)}
    p["wout"] = uni((2 * H, 1), 1.0 / (2 * H) ** 0.5)
    p["bout"] = jnp.zeros((1, 1), jnp.float32)
    return p


# ----------------------------------------------------------------------------
# Forward pass (matches inverse_model.forward, nonlinearity='tanh')
# ----------------------------------------------------------------------------
def forward(p, x):
    # x: (B, 1, L)
    # cnn1/2/3 + GN; the leading Tanh of self.cnn commutes with the concat and
    # is fused into the same kernel.
    h24 = frontend(x, p)                                    # (B, 24, L)

    # 3-layer bidirectional GRU on (B, L, 1)
    r = jnp.transpose(x, (0, 2, 1))
    for layer in p["gru"]:
        r = gru_bidir(r, layer["f"], layer["b"])            # (B, L, 16)
    rnn_t = jnp.transpose(r, (0, 2, 1))                     # (B, 16, L)

    # self.cnn: conv + GN + tanh (x3); the residual add with rnn_out is fused
    # into the last kernel.
    h = conv_gn_tanh(h24, p["wc1"], p["bc1"], p["gc1"], p["bec1"], pad=1)
    h = conv_gn_tanh(h, p["wc2"], p["bc2"], p["gc2"], p["bec2"], pad=1)
    h = conv_gn_tanh(h, p["wc3"], p["bc3"], p["gc3"], p["bec3"], pad=0, res=rnn_t)

    # self.up: two ConvTranspose1d(stride=2, k=4, pad=1) + GN + tanh -> length 4L
    h = deconv_gn_tanh(h, p["wu1"], p["bu1"], p["gu1"], p["beu1"], stride=2, pad_t=1)
    h = deconv_gn_tanh(h, p["wu2"], p["bu2"], p["gu2"], p["beu2"], stride=2, pad_t=1)

    # gru_out with the final Linear(16->1) fused into its epilogue
    s = jnp.transpose(h, (0, 2, 1))                         # (B, 4L, 8)
    y = gru_bidir(s, p["gru_out"]["f"], p["gru_out"]["b"],
                  wo=p["wout"], bo=p["bout"])               # (B, 4L, 1)
    return jnp.transpose(y, (0, 2, 1))                      # (B, 1, 4L)


if __name__ == "__main__":
    B, L = 2, 16
    x = jax.random.normal(jax.random.PRNGKey(0), (B, 1, L), jnp.float32)
    params = build_params(jax.random.PRNGKey(42))

    y = jax.jit(forward)(params, x)
    y = jax.block_until_ready(y)

    assert y.shape == (B, 1, 4 * L), y.shape
    assert bool(jnp.all(jnp.isfinite(y)))
    print("KERNEL_OK")
</pallas_src>

<mosaic_0001>
module attributes {stable_mosaic.version = 11 : i64} {
  func.func @_frontend_kernel(%arg0: i32, %arg1: memref<1x1x40xf32, #tpu.memory_space<vmem>>, %arg2: memref<3x8x5xf32, #tpu.memory_space<vmem>>, %arg3: memref<3x8x1xf32, #tpu.memory_space<vmem>>, %arg4: memref<3x8x1xf32, #tpu.memory_space<vmem>>, %arg5: memref<3x8x1xf32, #tpu.memory_space<vmem>>, %arg6: memref<1x24x16xf32, #tpu.memory_space<vmem>>) attributes {dimension_semantics = [#tpu.dimension_semantics<parallel>], iteration_bounds = array<i64: 2>, scalar_prefetch = 0 : i64, scratch_operands = 0 : i64, tpu.core_type = #tpu.core_type<tc>, window_params = [{transform_indices = @transform_0, window_bounds = array<i64: 1, 1, 40>}, {pipeline_mode = #tpu.pipeline_mode<synchronous>, transform_indices = @transform_1, window_bounds = array<i64: 3, 8, 5>}, {pipeline_mode = #tpu.pipeline_mode<synchronous>, transform_indices = @transform_2, window_bounds = array<i64: 3, 8, 1>}, {pipeline_mode = #tpu.pipeline_mode<synchronous>, transform_indices = @transform_3, window_bounds = array<i64: 3, 8, 1>}, {pipeline_mode = #tpu.pipeline_mode<synchronous>, transform_indices = @transform_4, window_bounds = array<i64: 3, 8, 1>}, {transform_indices = @transform_5, window_bounds = array<i64: 1, 24, 16>}]} {
    %c0 = arith.constant 0 : index
    %c0_0 = arith.constant 0 : index
    %c0_1 = arith.constant 0 : index
    %0 = vector.load %arg1[%c0, %c0_0, %c0_1] : memref<1x1x40xf32, #tpu.memory_space<vmem>>, vector<1x1x40xf32>
    %1 = vector.shape_cast %0 : vector<1x1x40xf32> to vector<1x40xf32>
    %c0_2 = arith.constant 0 : index
    %c0_3 = arith.constant 0 : index
    %c0_4 = arith.constant 0 : index
    %2 = vector.load %arg2[%c0_2, %c0_3, %c0_4] : memref<3x8x5xf32, #tpu.memory_space<vmem>>, vector<1x8x5xf32>
    %3 = vector.shape_cast %2 : vector<1x8x5xf32> to vector<8x5xf32>
    %cst = arith.constant 0.000000e+00 : f32
    %4 = vector.broadcast %cst : f32 to vector<8x16xf32>
    %5 = vector.extract_strided_slice %1 {offsets = [0, 10], sizes = [1, 16], strides = [1, 1]} : vector<1x40xf32> to vector<1x16xf32>
    %6 = vector.extract_strided_slice %3 {offsets = [0, 0], sizes = [8, 1], strides = [1, 1]} : vector<8x5xf32> to vector<8x1xf32>
    %7 = vector.broadcast %6 : vector<8x1xf32> to vector<8x16xf32>
    %8 = vector.broadcast %5 : vector<1x16xf32> to vector<8x16xf32>
    %9 = arith.mulf %7, %8 : vector<8x16xf32>
    %10 = arith.addf %4, %9 : vector<8x16xf32>
    %11 = vector.extract_strided_slice %1 {offsets = [0, 11], sizes = [1, 16], strides = [1, 1]} : vector<1x40xf32> to vector<1x16xf32>
    %12 = vector.extract_strided_slice %3 {offsets = [0, 1], sizes = [8, 1], strides = [1, 1]} : vector<8x5xf32> to vector<8x1xf32>
    %13 = vector.broadcast %12 : vector<8x1xf32> to vector<8x16xf32>
    %14 = vector.broadcast %11 : vector<1x16xf32> to vector<8x16xf32>
    %15 = arith.mulf %13, %14 : vector<8x16xf32>
    %16 = arith.addf %10, %15 : vector<8x16xf32>
    %17 = vector.extract_strided_slice %1 {offsets = [0, 12], sizes = [1, 16], strides = [1, 1]} : vector<1x40xf32> to vector<1x16xf32>
    %18 = vector.extract_strided_slice %3 {offsets = [0, 2], sizes = [8, 1], strides = [1, 1]} : vector<8x5xf32> to vector<8x1xf32>
    %19 = vector.broadcast %18 : vector<8x1xf32> to vector<8x16xf32>
    %20 = vector.broadcast %17 : vector<1x16xf32> to vector<8x16xf32>
    %21 = arith.mulf %19, %20 : vector<8x16xf32>
    %22 = arith.addf %16, %21 : vector<8x16xf32>
    %23 = vector.extract_strided_slice %1 {offsets = [0, 13], sizes = [1, 16], strides = [1, 1]} : vector<1x40xf32> to vector<1x16xf32>
    %24 = vector.extract_strided_slice %3 {offsets = [0, 3], sizes = [8, 1], strides = [1, 1]} : vector<8x5xf32> to vector<8x1xf32>
    %25 = vector.broadcast %24 : vector<8x1xf32> to vector<8x16xf32>
    %26 = vector.broadcast %23 : vector<1x16xf32> to vector<8x16xf32>
    %27 = arith.mulf %25, %26 : vector<8x16xf32>
    %28 = arith.addf %22, %27 : vector<8x16xf32>
    %29 = vector.extract_strided_slice %1 {offsets = [0, 14], sizes = [1, 16], strides = [1, 1]} : vector<1x40xf32> to vector<1x16xf32>
    %30 = vector.extract_strided_slice %3 {offsets = [0, 4], sizes = [8, 1], strides = [1, 1]} : vector<8x5xf32> to vector<8x1xf32>
    %31 = vector.broadcast %30 : vector<8x1xf32> to vector<8x16xf32>
    %32 = vector.broadcast %29 : vector<1x16xf32> to vector<8x16xf32>
    %33 = arith.mulf %31, %32 : vector<8x16xf32>
    %34 = arith.addf %28, %33 : vector<8x16xf32>
    %c0_5 = arith.constant 0 : index
    %c0_6 = arith.constant 0 : index
    %c0_7 = arith.constant 0 : index
    %35 = vector.load %arg3[%c0_5, %c0_6, %c0_7] : memref<3x8x1xf32, #tpu.memory_space<vmem>>, vector<1x8x1xf32>
    %36 = vector.shape_cast %35 : vector<1x8x1xf32> to vector<8x1xf32>
    %37 = vector.broadcast %36 : vector<8x1xf32> to vector<8x16xf32>
    %38 = arith.addf %34, %37 : vector<8x16xf32>
    %39 = vector.shape_cast %38 : vector<8x16xf32> to vector<1x8x16xf32>
    %cst_8 = arith.constant dense<0.000000e+00> : vector<1xf32>
    %40 = vector.multi_reduction <add>, %39, %cst_8 [1, 2] : vector<1x8x16xf32> to vector<1xf32>
    %41 = vector.shape_cast %40 : vector<1xf32> to vector<1x1x1xf32>
    %42 = vector.extract %41[0, 0, 0] : f32 from vector<1x1x1xf32>
    %43 = vector.broadcast %42 : f32 to vector<1x1xf32>
    %cst_9 = arith.constant 1.280000e+02 : f32
    %44 = vector.broadcast %cst_9 : f32 to vector<1x1xf32>
    %45 = arith.divf %43, %44 : vector<1x1xf32>
    %46 = vector.broadcast %45 : vector<1x1xf32> to vector<8x16xf32>
    %47 = arith.subf %38, %46 : vector<8x16xf32>
    %48 = arith.mulf %47, %47 : vector<8x16xf32>
    %49 = vector.shape_cast %48 : vector<8x16xf32> to vector<1x8x16xf32>
    %cst_10 = arith.constant dense<0.000000e+00> : vector<1xf32>
    %50 = vector.multi_reduction <add>, %49, %cst_10 [1, 2] : vector<1x8x16xf32> to vector<1xf32>
    %51 = vector.shape_cast %50 : vector<1xf32> to vector<1x1x1xf32>
    %52 = vector.extract %51[0, 0, 0] : f32 from vector<1x1x1xf32>
    %53 = vector.broadcast %52 : f32 to vector<1x1xf32>
    %cst_11 = arith.constant 1.280000e+02 : f32
    %54 = vector.broadcast %cst_11 : f32 to vector<1x1xf32>
    %55 = arith.divf %53, %54 : vector<1x1xf32>
    %56 = vector.broadcast %45 : vector<1x1xf32> to vector<8x16xf32>
    %57 = arith.subf %38, %56 : vector<8x16xf32>
    %cst_12 = arith.constant 9.99999974E-6 : f32
    %58 = vector.broadcast %cst_12 : f32 to vector<1x1xf32>
    %59 = arith.addf %55, %58 : vector<1x1xf32>
    %60 = math.rsqrt %59 : vector<1x1xf32>
    %61 = vector.broadcast %60 : vector<1x1xf32> to vector<8x16xf32>
    %62 = arith.mulf %57, %61 : vector<8x16xf32>
    %c0_13 = arith.constant 0 : index
    %c0_14 = arith.constant 0 : index
    %c0_15 = arith.constant 0 : index
    %63 = vector.load %arg4[%c0_13, %c0_14, %c0_15] : memref<3x8x1xf32, #tpu.memory_space<vmem>>, vector<1x8x1xf32>
    %64 = vector.shape_cast %63 : vector<1x8x1xf32> to vector<8x1xf32>
    %65 = vector.broadcast %64 : vector<8x1xf32> to vector<8x16xf32>
    %66 = arith.mulf %62, %65 : vector<8x16xf32>
    %c0_16 = arith.constant 0 : index
    %c0_17 = arith.constant 0 : index
    %c0_18 = arith.constant 0 : index
    %67 = vector.load %arg5[%c0_16, %c0_17, %c0_18] : memref<3x8x1xf32, #tpu.memory_space<vmem>>, vector<1x8x1xf32>
    %68 = vector.shape_cast %67 : vector<1x8x1xf32> to vector<8x1xf32>
    %69 = vector.broadcast %68 : vector<8x1xf32> to vector<8x16xf32>
    %70 = arith.addf %66, %69 : vector<8x16xf32>
    %71 = math.tanh %70 : vector<8x16xf32>
    %c0_19 = arith.constant 0 : index
    %c0_20 = arith.constant 0 : index
    %c0_21 = arith.constant 0 : index
    %72 = vector.load %arg6[%c0_19, %c0_20, %c0_21] : memref<1x24x16xf32, #tpu.memory_space<vmem>>, vector<1x8x16xf32>
    %73 = vector.shape_cast %72 : vector<1x8x16xf32> to vector<8x16xf32>
    %74 = vector.shape_cast %71 : vector<8x16xf32> to vector<1x8x16xf32>
    tpu.vector_store %arg6[%c0_19, %c0_20, %c0_21], %74 {strides = array<i32>} : memref<1x24x16xf32, #tpu.memory_space<vmem>>, vector<1x8x16xf32>,
    %c1 = arith.constant 1 : index
    %c0_22 = arith.constant 0 : index
    %c0_23 = arith.constant 0 : index
    %75 = vector.load %arg2[%c1, %c0_22, %c0_23] : memref<3x8x5xf32, #tpu.memory_space<vmem>>, vector<1x8x5xf32>
    %76 = vector.shape_cast %75 : vector<1x8x5xf32> to vector<8x5xf32>
    %cst_24 = arith.constant 0.000000e+00 : f32
    %77 = vector.broadcast %cst_24 : f32 to vector<8x16xf32>
    %78 = vector.extract_strided_slice %1 {offsets = [0, 6], sizes = [1, 16], strides = [1, 1]} : vector<1x40xf32> to vector<1x16xf32>
    %79 = vector.extract_strided_slice %76 {offsets = [0, 0], sizes = [8, 1], strides = [1, 1]} : vector<8x5xf32> to vector<8x1xf32>
    %80 = vector.broadcast %79 : vector<8x1xf32> to vector<8x16xf32>
    %81 = vector.broadcast %78 : vector<1x16xf32> to vector<8x16xf32>
    %82 = arith.mulf %80, %81 : vector<8x16xf32>
    %83 = arith.addf %77, %82 : vector<8x16xf32>
    %84 = vector.extract_strided_slice %1 {offsets = [0, 9], sizes = [1, 16], strides = [1, 1]} : vector<1x40xf32> to vector<1x16xf32>
    %85 = vector.extract_strided_slice %76 {offsets = [0, 1], sizes = [8, 1], strides = [1, 1]} : vector<8x5xf32> to vector<8x1xf32>
    %86 = vector.broadcast %85 : vector<8x1xf32> to vector<8x16xf32>
    %87 = vector.broadcast %84 : vector<1x16xf32> to vector<8x16xf32>
    %88 = arith.mulf %86, %87 : vector<8x16xf32>
    %89 = arith.addf %83, %88 : vector<8x16xf32>
    %90 = vector.extract_strided_slice %1 {offsets = [0, 12], sizes = [1, 16], strides = [1, 1]} : vector<1x40xf32> to vector<1x16xf32>
    %91 = vector.extract_strided_slice %76 {offsets = [0, 2], sizes = [8, 1], strides = [1, 1]} : vector<8x5xf32> to vector<8x1xf32>
    %92 = vector.broadcast %91 : vector<8x1xf32> to vector<8x16xf32>
    %93 = vector.broadcast %90 : vector<1x16xf32> to vector<8x16xf32>
    %94 = arith.mulf %92, %93 : vector<8x16xf32>
    %95 = arith.addf %89, %94 : vector<8x16xf32>
    %96 = vector.extract_strided_slice %1 {offsets = [0, 15], sizes = [1, 16], strides = [1, 1]} : vector<1x40xf32> to vector<1x16xf32>
    %97 = vector.extract_strided_slice %76 {offsets = [0, 3], sizes = [8, 1], strides = [1, 1]} : vector<8x5xf32> to vector<8x1xf32>
    %98 = vector.broadcast %97 : vector<8x1xf32> to vector<8x16xf32>
    %99 = vector.broadcast %96 : vector<1x16xf32> to vector<8x16xf32>
    %100 = arith.mulf %98, %99 : vector<8x16xf32>
    %101 = arith.addf %95, %100 : vector<8x16xf32>
    %102 = vector.extract_strided_slice %1 {offsets = [0, 18], sizes = [1, 16], strides = [1, 1]} : vector<1x40xf32> to vector<1x16xf32>
    %103 = vector.extract_strided_slice %76 {offsets = [0, 4], sizes = [8, 1], strides = [1, 1]} : vector<8x5xf32> to vector<8x1xf32>
    %104 = vector.broadcast %103 : vector<8x1xf32> to vector<8x16xf32>
    %105 = vector.broadcast %102 : vector<1x16xf32> to vector<8x16xf32>
    %106 = arith.mulf %104, %105 : vector<8x16xf32>
    %107 = arith.addf %101, %106 : vector<8x16xf32>
    %c1_25 = arith.constant 1 : index
    %c0_26 = arith.constant 0 : index
    %c0_27 = arith.constant 0 : index
    %108 = vector.load %arg3[%c1_25, %c0_26, %c0_27] : memref<3x8x1xf32, #tpu.memory_space<vmem>>, vector<1x8x1xf32>
    %109 = vector.shape_cast %108 : vector<1x8x1xf32> to vector<8x1xf32>
    %110 = vector.broadcast %109 : vector<8x1xf32> to vector<8x16xf32>
    %111 = arith.addf %107, %110 : vector<8x16xf32>
    %112 = vector.shape_cast %111 : vector<8x16xf32> to vector<1x8x16xf32>
    %cst_28 = arith.constant dense<0.000000e+00> : vector<1xf32>
    %113 = vector.multi_reduction <add>, %112, %cst_28 [1, 2] : vector<1x8x16xf32> to vector<1xf32>
    %114 = vector.shape_cast %113 : vector<1xf32> to vector<1x1x1xf32>
    %115 = vector.extract %114[0, 0, 0] : f32 from vector<1x1x1xf32>
    %116 = vector.broadcast %115 : f32 to vector<1x1xf32>
    %cst_29 = arith.constant 1.280000e+02 : f32
    %117 = vector.broadcast %cst_29 : f32 to vector<1x1xf32>
    %118 = arith.divf %116, %117 : vector<1x1xf32>
    %119 = vector.broadcast %118 : vector<1x1xf32> to vector<8x16xf32>
    %120 = arith.subf %111, %119 : vector<8x16xf32>
    %121 = arith.mulf %120, %120 : vector<8x16xf32>
    %122 = vector.shape_cast %121 : vector<8x16xf32> to vector<1x8x16xf32>
    %cst_30 = arith.constant dense<0.000000e+00> : vector<1xf32>
    %123 = vector.multi_reduction <add>, %122, %cst_30 [1, 2] : vector<1x8x16xf32> to vector<1xf32>
    %124 = vector.shape_cast %123 : vector<1xf32> to vector<1x1x1xf32>
    %125 = vector.extract %124[0, 0, 0] : f32 from vector<1x1x1xf32>
    %126 = vector.broadcast %125 : f32 to vector<1x1xf32>
    %cst_31 = arith.constant 1.280000e+02 : f32
    %127 = vector.broadcast %cst_31 : f32 to vector<1x1xf32>
    %128 = arith.divf %126, %127 : vector<1x1xf32>
    %129 = vector.broadcast %118 : vector<1x1xf32> to vector<8x16xf32>
    %130 = arith.subf %111, %129 : vector<8x16xf32>
    %cst_32 = arith.constant 9.99999974E-6 : f32
    %131 = vector.broadcast %cst_32 : f32 to vector<1x1xf32>
    %132 = arith.addf %128, %131 : vector<1x1xf32>
    %133 = math.rsqrt %132 : vector<1x1xf32>
    %134 = vector.broadcast %133 : vector<1x1xf32> to vector<8x16xf32>
    %135 = arith.mulf %130, %134 : vector<8x16xf32>
    %c1_33 = arith.constant 1 : index
    %c0_34 = arith.constant 0 : index
    %c0_35 = arith.constant 0 : index
    %136 = vector.load %arg4[%c1_33, %c0_34, %c0_35] : memref<3x8x1xf32, #tpu.memory_space<vmem>>, vector<1x8x1xf32>
    %137 = vector.shape_cast %136 : vector<1x8x1xf32> to vector<8x1xf32>
    %138 = vector.broadcast %137 : vector<8x1xf32> to vector<8x16xf32>
    %139 = arith.mulf %135, %138 : vector<8x16xf32>
    %c1_36 = arith.constant 1 : index
    %c0_37 = arith.constant 0 : index
    %c0_38 = arith.constant 0 : index
    %140 = vector.load %arg5[%c1_36, %c0_37, %c0_38] : memref<3x8x1xf32, #tpu.memory_space<vmem>>, vector<1x8x1xf32>
    %141 = vector.shape_cast %140 : vector<1x8x1xf32> to vector<8x1xf32>
    %142 = vector.broadcast %141 : vector<8x1xf32> to vector<8x16xf32>
    %143 = arith.addf %139, %142 : vector<8x16xf32>
    %144 = math.tanh %143 : vector<8x16xf32>
    %c0_39 = arith.constant 0 : index
    %c8 = arith.constant 8 : index
    %c0_40 = arith.constant 0 : index
    %145 = vector.load %arg6[%c0_39, %c8, %c0_40] : memref<1x24x16xf32, #tpu.memory_space<vmem>>, vector<1x8x16xf32>
    %146 = vector.shape_cast %145 : vector<1x8x16xf32> to vector<8x16xf32>
    %147 = vector.shape_cast %144 : vector<8x16xf32> to vector<1x8x16xf32>
    tpu.vector_store %arg6[%c0_39, %c8, %c0_40], %147 {strides = array<i32>} : memref<1x24x16xf32, #tpu.memory_space<vmem>>, vector<1x8x16xf32>,
    %c2 = arith.constant 2 : index
    %c0_41 = arith.constant 0 : index
    %c0_42 = arith.constant 0 : index
    %148 = vector.load %arg2[%c2, %c0_41, %c0_42] : memref<3x8x5xf32, #tpu.memory_space<vmem>>, vector<1x8x5xf32>
    %149 = vector.shape_cast %148 : vector<1x8x5xf32> to vector<8x5xf32>
    %cst_43 = arith.constant 0.000000e+00 : f32
    %150 = vector.broadcast %cst_43 : f32 to vector<8x16xf32>
    %151 = vector.extract_strided_slice %1 {offsets = [0, 0], sizes = [1, 16], strides = [1, 1]} : vector<1x40xf32> to vector<1x16xf32>
    %152 = vector.extract_strided_slice %149 {offsets = [0, 0], sizes = [8, 1], strides = [1, 1]} : vector<8x5xf32> to vector<8x1xf32>
    %153 = vector.broadcast %152 : vector<8x1xf32> to vector<8x16xf32>
    %154 = vector.broadcast %151 : vector<1x16xf32> to vector<8x16xf32>
    %155 = arith.mulf %153, %154 : vector<8x16xf32>
    %156 = arith.addf %150, %155 : vector<8x16xf32>
    %157 = vector.extract_strided_slice %1 {offsets = [0, 6], sizes = [1, 16], strides = [1, 1]} : vector<1x40xf32> to vector<1x16xf32>
    %158 = vector.extract_strided_slice %149 {offsets = [0, 1], sizes = [8, 1], strides = [1, 1]} : vector<8x5xf32> to vector<8x1xf32>
    %159 = vector.broadcast %158 : vector<8x1xf32> to vector<8x16xf32>
    %160 = vector.broadcast %157 : vector<1x16xf32> to vector<8x16xf32>
    %161 = arith.mulf %159, %160 : vector<8x16xf32>
    %162 = arith.addf %156, %161 : vector<8x16xf32>
    %163 = vector.extract_strided_slice %1 {offsets = [0, 12], sizes = [1, 16], strides = [1, 1]} : vector<1x40xf32> to vector<1x16xf32>
    %164 = vector.extract_strided_slice %149 {offsets = [0, 2], sizes = [8, 1], strides = [1, 1]} : vector<8x5xf32> to vector<8x1xf32>
    %165 = vector.broadcast %164 : vector<8x1xf32> to vector<8x16xf32>
    %166 = vector.broadcast %163 : vector<1x16xf32> to vector<8x16xf32>
    %167 = arith.mulf %165, %166 : vector<8x16xf32>
    %168 = arith.addf %162, %167 : vector<8x16xf32>
    %169 = vector.extract_strided_slice %1 {offsets = [0, 18], sizes = [1, 16], strides = [1, 1]} : vector<1x40xf32> to vector<1x16xf32>
    %170 = vector.extract_strided_slice %149 {offsets = [0, 3], sizes = [8, 1], strides = [1, 1]} : vector<8x5xf32> to vector<8x1xf32>
    %171 = vector.broadcast %170 : vector<8x1xf32> to vector<8x16xf32>
    %172 = vector.broadcast %169 : vector<1x16xf32> to vector<8x16xf32>
    %173 = arith.mulf %171, %172 : vector<8x16xf32>
    %174 = arith.addf %168, %173 : vector<8x16xf32>
    %175 = vector.extract_strided_slice %1 {offsets = [0, 24], sizes = [1, 16], strides = [1, 1]} : vector<1x40xf32> to vector<1x16xf32>
    %176 = vector.extract_strided_slice %149 {offsets = [0, 4], sizes = [8, 1], strides = [1, 1]} : vector<8x5xf32> to vector<8x1xf32>
    %177 = vector.broadcast %176 : vector<8x1xf32> to vector<8x16xf32>
    %178 = vector.broadcast %175 : vector<1x16xf32> to vector<8x16xf32>
    %179 = arith.mulf %177, %178 : vector<8x16xf32>
    %180 = arith.addf %174, %179 : vector<8x16xf32>
    %c2_44 = arith.constant 2 : index
    %c0_45 = arith.constant 0 : index
    %c0_46 = arith.constant 0 : index
    %181 = vector.load %arg3[%c2_44, %c0_45, %c0_46] : memref<3x8x1xf32, #tpu.memory_space<vmem>>, vector<1x8x1xf32>
    %182 = vector.shape_cast %181 : vector<1x8x1xf32> to vector<8x1xf32>
    %183 = vector.broadcast %182 : vector<8x1xf32> to vector<8x16xf32>
    %184 = arith.addf %180, %183 : vector<8x16xf32>
    %185 = vector.shape_cast %184 : vector<8x16xf32> to vector<1x8x16xf32>
    %cst_47 = arith.constant dense<0.000000e+00> : vector<1xf32>
    %186 = vector.multi_reduction <add>, %185, %cst_47 [1, 2] : vector<1x8x16xf32> to vector<1xf32>
    %187 = vector.shape_cast %186 : vector<1xf32> to vector<1x1x1xf32>
    %188 = vector.extract %187[0, 0, 0] : f32 from vector<1x1x1xf32>
    %189 = vector.broadcast %188 : f32 to vector<1x1xf32>
    %cst_48 = arith.constant 1.280000e+02 : f32
    %190 = vector.broadcast %cst_48 : f32 to vector<1x1xf32>
    %191 = arith.divf %189, %190 : vector<1x1xf32>
    %192 = vector.broadcast %191 : vector<1x1xf32> to vector<8x16xf32>
    %193 = arith.subf %184, %192 : vector<8x16xf32>
    %194 = arith.mulf %193, %193 : vector<8x16xf32>
    %195 = vector.shape_cast %194 : vector<8x16xf32> to vector<1x8x16xf32>
    %cst_49 = arith.constant dense<0.000000e+00> : vector<1xf32>
    %196 = vector.multi_reduction <add>, %195, %cst_49 [1, 2] : vector<1x8x16xf32> to vector<1xf32>
    %197 = vector.shape_cast %196 : vector<1xf32> to vector<1x1x1xf32>
    %198 = vector.extract %197[0, 0, 0] : f32 from vector<1x1x1xf32>
    %199 = vector.broadcast %198 : f32 to vector<1x1xf32>
    %cst_50 = arith.constant 1.280000e+02 : f32
    %200 = vector.broadcast %cst_50 : f32 to vector<1x1xf32>
    %201 = arith.divf %199, %200 : vector<1x1xf32>
    %202 = vector.broadcast %191 : vector<1x1xf32> to vector<8x16xf32>
    %203 = arith.subf %184, %202 : vector<8x16xf32>
    %cst_51 = arith.constant 9.99999974E-6 : f32
    %204 = vector.broadcast %cst_51 : f32 to vector<1x1xf32>
    %205 = arith.addf %201, %204 : vector<1x1xf32>
    %206 = math.rsqrt %205 : vector<1x1xf32>
    %207 = vector.broadcast %206 : vector<1x1xf32> to vector<8x16xf32>
    %208 = arith.mulf %203, %207 : vector<8x16xf32>
    %c2_52 = arith.constant 2 : index
    %c0_53 = arith.constant 0 : index
    %c0_54 = arith.constant 0 : index
    %209 = vector.load %arg4[%c2_52, %c0_53, %c0_54] : memref<3x8x1xf32, #tpu.memory_space<vmem>>, vector<1x8x1xf32>
    %210 = vector.shape_cast %209 : vector<1x8x1xf32> to vector<8x1xf32>
    %211 = vector.broadcast %210 : vector<8x1xf32> to vector<8x16xf32>
    %212 = arith.mulf %208, %211 : vector<8x16xf32>
    %c2_55 = arith.constant 2 : index
    %c0_56 = arith.constant 0 : index
    %c0_57 = arith.constant 0 : index
    %213 = vector.load %arg5[%c2_55, %c0_56, %c0_57] : memref<3x8x1xf32, #tpu.memory_space<vmem>>, vector<1x8x1xf32>
    %214 = vector.shape_cast %213 : vector<1x8x1xf32> to vector<8x1xf32>
    %215 = vector.broadcast %214 : vector<8x1xf32> to vector<8x16xf32>
    %216 = arith.addf %212, %215 : vector<8x16xf32>
    %217 = math.tanh %216 : vector<8x16xf32>
    %c0_58 = arith.constant 0 : index
    %c16 = arith.constant 16 : index
    %c0_59 = arith.constant 0 : index
    %218 = vector.load %arg6[%c0_58, %c16, %c0_59] : memref<1x24x16xf32, #tpu.memory_space<vmem>>, vector<1x8x16xf32>
    %219 = vector.shape_cast %218 : vector<1x8x16xf32> to vector<8x16xf32>
    %220 = vector.shape_cast %217 : vector<8x16xf32> to vector<1x8x16xf32>
    tpu.vector_store %arg6[%c0_58, %c16, %c0_59], %220 {strides = array<i32>} : memref<1x24x16xf32, #tpu.memory_space<vmem>>, vector<1x8x16xf32>,
    return
  }
  func.func @transform_0(%arg0: i32) -> (i32, i32, i32) {
    %c0_i32 = arith.constant 0 : i32
    %c0_i32_0 = arith.constant 0 : i32
    %c0_i32_1 = arith.constant 0 : i32
    return %arg0, %c0_i32, %c0_i32_0 : i32, i32, i32
  }
  func.func @transform_1(%arg0: i32) -> (i32, i32, i32) {
    %c0_i32 = arith.constant 0 : i32
    %c0_i32_0 = arith.constant 0 : i32
    %c0_i32_1 = arith.constant 0 : i32
    %c0_i32_2 = arith.constant 0 : i32
    return %c0_i32, %c0_i32_0, %c0_i32_1 : i32, i32, i32
  }
  func.func @transform_2(%arg0: i32) -> (i32, i32, i32) {
    %c0_i32 = arith.constant 0 : i32
    %c0_i32_0 = arith.constant 0 : i32
    %c0_i32_1 = arith.constant 0 : i32
    %c0_i32_2 = arith.constant 0 : i32
    return %c0_i32, %c0_i32_0, %c0_i32_1 : i32, i32, i32
  }
  func.func @transform_3(%arg0: i32) -> (i32, i32, i32) {
    %c0_i32 = arith.constant 0 : i32
    %c0_i32_0 = arith.constant 0 : i32
    %c0_i32_1 = arith.constant 0 : i32
    %c0_i32_2 = arith.constant 0 : i32
    return %c0_i32, %c0_i32_0, %c0_i32_1 : i32, i32, i32
  }
  func.func @transform_4(%arg0: i32) -> (i32, i32, i32) {
    %c0_i32 = arith.constant 0 : i32
    %c0_i32_0 = arith.constant 0 : i32
    %c0_i32_1 = arith.constant 0 : i32
    %c0_i32_2 = arith.constant 0 : i32
    return %c0_i32, %c0_i32_0, %c0_i32_1 : i32, i32, i32
  }
  func.func @transform_5(%arg0: i32) -> (i32, i32, i32) {
    %c0_i32 = arith.constant 0 : i32
    %c0_i32_0 = arith.constant 0 : i32
    %c0_i32_1 = arith.constant 0 : i32
    return %arg0, %c0_i32, %c0_i32_0 : i32, i32, i32
  }
}

module attributes {stable_mosaic.version = 11 : i64} {
  func.func @_conv_gn_tanh_kernel(%arg0: i32, %arg1: memref<1x24x18xf32, #tpu.memory_space<vmem>>, %arg2: memref<3x16x24xf32, #tpu.memory_space<vmem>>, %arg3: memref<16x1xf32, #tpu.memory_space<vmem>>, %arg4: memref<16x1xf32, #tpu.memory_space<vmem>>, %arg5: memref<16x1xf32, #tpu.memory_space<vmem>>, %arg6: memref<1x16x16xf32, #tpu.memory_space<vmem>>) attributes {dimension_semantics = [#tpu.dimension_semantics<parallel>], iteration_bounds = array<i64: 2>, scalar_prefetch = 0 : i64, scratch_operands = 0 : i64, tpu.core_type = #tpu.core_type<tc>, window_params = [{transform_indices = @transform_0, window_bounds = array<i64: 1, 24, 18>}, {pipeline_mode = #tpu.pipeline_mode<synchronous>, transform_indices = @transform_1, window_bounds = array<i64: 3, 16, 24>}, {pipeline_mode = #tpu.pipeline_mode<synchronous>, transform_indices = @transform_2, window_bounds = array<i64: 16, 1>}, {pipeline_mode = #tpu.pipeline_mode<synchronous>, transform_indices = @transform_3, window_bounds = array<i64: 16, 1>}, {pipeline_mode = #tpu.pipeline_mode<synchronous>, transform_indices = @transform_4, window_bounds = array<i64: 16, 1>}, {transform_indices = @transform_5, window_bounds = array<i64: 1, 16, 16>}]} {
    %c0 = arith.constant 0 : index
    %c0_0 = arith.constant 0 : index
    %c0_1 = arith.constant 0 : index
    %0 = vector.load %arg1[%c0, %c0_0, %c0_1] : memref<1x24x18xf32, #tpu.memory_space<vmem>>, vector<1x24x18xf32>
    %1 = vector.shape_cast %0 : vector<1x24x18xf32> to vector<24x18xf32>
    %cst = arith.constant 0.000000e+00 : f32
    %2 = vector.broadcast %cst : f32 to vector<16x16xf32>
    %c0_2 = arith.constant 0 : index
    %c0_3 = arith.constant 0 : index
    %c0_4 = arith.constant 0 : index
    %3 = vector.load %arg2[%c0_2, %c0_3, %c0_4] : memref<3x16x24xf32, #tpu.memory_space<vmem>>, vector<1x16x24xf32>
    %4 = vector.shape_cast %3 : vector<1x16x24xf32> to vector<16x24xf32>
    %5 = vector.extract_strided_slice %1 {offsets = [0, 0], sizes = [24, 16], strides = [1, 1]} : vector<24x18xf32> to vector<24x16xf32>
    %cst_5 = arith.constant dense<0.000000e+00> : vector<16x16xf32>
    %6 = tpu.matmul %4, %5, %cst_5 {dimension_numbers = #tpu.dot_dimension_numbers<[1], [0], [0], [1], [0, 0, 1, 1], [], []>} : vector<16x24xf32>, vector<24x16xf32>, vector<16x16xf32> -> vector<16x16xf32>
    %7 = arith.addf %2, %6 : vector<16x16xf32>
    %c1 = arith.constant 1 : index
    %c0_6 = arith.constant 0 : index
    %c0_7 = arith.constant 0 : index
    %8 = vector.load %arg2[%c1, %c0_6, %c0_7] : memref<3x16x24xf32, #tpu.memory_space<vmem>>, vector<1x16x24xf32>
    %9 = vector.shape_cast %8 : vector<1x16x24xf32> to vector<16x24xf32>
    %10 = vector.extract_strided_slice %1 {offsets = [0, 1], sizes = [24, 16], strides = [1, 1]} : vector<24x18xf32> to vector<24x16xf32>
    %cst_8 = arith.constant dense<0.000000e+00> : vector<16x16xf32>
    %11 = tpu.matmul %9, %10, %cst_8 {dimension_numbers = #tpu.dot_dimension_numbers<[1], [0], [0], [1], [0, 0, 1, 1], [], []>} : vector<16x24xf32>, vector<24x16xf32>, vector<16x16xf32> -> vector<16x16xf32>
    %12 = arith.addf %7, %11 : vector<16x16xf32>
    %c2 = arith.constant 2 : index
    %c0_9 = arith.constant 0 : index
    %c0_10 = arith.constant 0 : index
    %13 = vector.load %arg2[%c2, %c0_9, %c0_10] : memref<3x16x24xf32, #tpu.memory_space<vmem>>, vector<1x16x24xf32>
    %14 = vector.shape_cast %13 : vector<1x16x24xf32> to vector<16x24xf32>
    %15 = vector.extract_strided_slice %1 {offsets = [0, 2], sizes = [24, 16], strides = [1, 1]} : vector<24x18xf32> to vector<24x16xf32>
    %cst_11 = arith.constant dense<0.000000e+00> : vector<16x16xf32>
    %16 = tpu.matmul %14, %15, %cst_11 {dimension_numbers = #tpu.dot_dimension_numbers<[1], [0], [0], [1], [0, 0, 1, 1], [], []>} : vector<16x24xf32>, vector<24x16xf32>, vector<16x16xf32> -> vector<16x16xf32>
    %17 = arith.addf %12, %16 : vector<16x16xf32>
    %c0_12 = arith.constant 0 : index
    %c0_13 = arith.constant 0 : index
    %18 = vector.load %arg3[%c0_12, %c0_13] : memref<16x1xf32, #tpu.memory_space<vmem>>, vector<16x1xf32>
    %19 = vector.broadcast %18 : vector<16x1xf32> to vector<16x16xf32>
    %20 = arith.addf %17, %19 : vector<16x16xf32>
    %21 = vector.shape_cast %20 : vector<16x16xf32> to vector<1x16x16xf32>
    %cst_14 = arith.constant dense<0.000000e+00> : vector<1xf32>
    %22 = vector.multi_reduction <add>, %21, %cst_14 [1, 2] : vector<1x16x16xf32> to vector<1xf32>
    %23 = vector.shape_cast %22 : vector<1xf32> to vector<1x1x1xf32>
    %24 = vector.extract %23[0, 0, 0] : f32 from vector<1x1x1xf32>
    %25 = vector.broadcast %24 : f32 to vector<1x1xf32>
    %cst_15 = arith.constant 2.560000e+02 : f32
    %26 = vector.broadcast %cst_15 : f32 to vector<1x1xf32>
    %27 = arith.divf %25, %26 : vector<1x1xf32>
    %28 = vector.broadcast %27 : vector<1x1xf32> to vector<16x16xf32>
    %29 = arith.subf %20, %28 : vector<16x16xf32>
    %30 = arith.mulf %29, %29 : vector<16x16xf32>
    %31 = vector.shape_cast %30 : vector<16x16xf32> to vector<1x16x16xf32>
    %cst_16 = arith.constant dense<0.000000e+00> : vector<1xf32>
    %32 = vector.multi_reduction <add>, %31, %cst_16 [1, 2] : vector<1x16x16xf32> to vector<1xf32>
    %33 = vector.shape_cast %32 : vector<1xf32> to vector<1x1x1xf32>
    %34 = vector.extract %33[0, 0, 0] : f32 from vector<1x1x1xf32>
    %35 = vector.broadcast %34 : f32 to vector<1x1xf32>
    %cst_17 = arith.constant 2.560000e+02 : f32
    %36 = vector.broadcast %cst_17 : f32 to vector<1x1xf32>
    %37 = arith.divf %35, %36 : vector<1x1xf32>
    %38 = vector.broadcast %27 : vector<1x1xf32> to vector<16x16xf32>
    %39 = arith.subf %20, %38 : vector<16x16xf32>
    %cst_18 = arith.constant 9.99999974E-6 : f32
    %40 = vector.broadcast %cst_18 : f32 to vector<1x1xf32>
    %41 = arith.addf %37, %40 : vector<1x1xf32>
    %42 = math.rsqrt %41 : vector<1x1xf32>
    %43 = vector.broadcast %42 : vector<1x1xf32> to vector<16x16xf32>
    %44 = arith.mulf %39, %43 : vector<16x16xf32>
    %c0_19 = arith.constant 0 : index
    %c0_20 = arith.constant 0 : index
    %45 = vector.load %arg4[%c0_19, %c0_20] : memref<16x1xf32, #tpu.memory_space<vmem>>, vector<16x1xf32>
    %46 = vector.broadcast %45 : vector<16x1xf32> to vector<16x16xf32>
    %47 = arith.mulf %44, %46 : vector<16x16xf32>
    %c0_21 = arith.constant 0 : index
    %c0_22 = arith.constant 0 : index
    %48 = vector.load %arg5[%c0_21, %c0_22] : memref<16x1xf32, #tpu.memory_space<vmem>>, vector<16x1xf32>
    %49 = vector.broadcast %48 : vector<16x1xf32> to vector<16x16xf32>
    %50 = arith.addf %47, %49 : vector<16x16xf32>
    %51 = math.tanh %50 : vector<16x16xf32>
    %c0_23 = arith.constant 0 : index
    %c0_24 = arith.constant 0 : index
    %c0_25 = arith.constant 0 : index
    %52 = vector.load %arg6[%c0_23, %c0_24, %c0_25] : memref<1x16x16xf32, #tpu.memory_space<vmem>>, vector<1x16x16xf32>
    %53 = vector.shape_cast %52 : vector<1x16x16xf32> to vector<16x16xf32>
    %54 = vector.shape_cast %51 : vector<16x16xf32> to vector<1x16x16xf32>
    tpu.vector_store %arg6[%c0_23, %c0_24, %c0_25], %54 {strides = array<i32>} : memref<1x16x16xf32, #tpu.memory_space<vmem>>, vector<1x16x16xf32>,
    return
  }
  func.func @transform_0(%arg0: i32) -> (i32, i32, i32) {
    %c0_i32 = arith.constant 0 : i32
    %c0_i32_0 = arith.constant 0 : i32
    %c0_i32_1 = arith.constant 0 : i32
    return %arg0, %c0_i32, %c0_i32_0 : i32, i32, i32
  }
  func.func @transform_1(%arg0: i32) -> (i32, i32, i32) {
    %c0_i32 = arith.constant 0 : i32
    %c0_i32_0 = arith.constant 0 : i32
    %c0_i32_1 = arith.constant 0 : i32
    %c0_i32_2 = arith.constant 0 : i32
    return %c0_i32, %c0_i32_0, %c0_i32_1 : i32, i32, i32
  }
  func.func @transform_2(%arg0: i32) -> (i32, i32) {
    %c0_i32 = arith.constant 0 : i32
    %c0_i32_0 = arith.constant 0 : i32
    %c0_i32_1 = arith.constant 0 : i32
    return %c0_i32, %c0_i32_0 : i32, i32
  }
  func.func @transform_3(%arg0: i32) -> (i32, i32) {
    %c0_i32 = arith.constant 0 : i32
    %c0_i32_0 = arith.constant 0 : i32
    %c0_i32_1 = arith.constant 0 : i32
    return %c0_i32, %c0_i32_0 : i32, i32
  }
  func.func @transform_4(%arg0: i32) -> (i32, i32) {
    %c0_i32 = arith.constant 0 : i32
    %c0_i32_0 = arith.constant 0 : i32
    %c0_i32_1 = arith.constant 0 : i32
    return %c0_i32, %c0_i32_0 : i32, i32
  }
  func.func @transform_5(%arg0: i32) -> (i32, i32, i32) {
    %c0_i32 = arith.constant 0 : i32
    %c0_i32_0 = arith.constant 0 : i32
    %c0_i32_1 = arith.constant 0 : i32
    return %arg0, %c0_i32, %c0_i32_0 : i32, i32, i32
  }
}

module attributes {stable_mosaic.version = 11 : i64} {
  func.func @_conv_gn_tanh_kernel(%arg0: i32, %arg1: memref<1x16x18xf32, #tpu.memory_space<vmem>>, %arg2: memref<3x16x16xf32, #tpu.memory_space<vmem>>, %arg3: memref<16x1xf32, #tpu.memory_space<vmem>>, %arg4: memref<16x1xf32, #tpu.memory_space<vmem>>, %arg5: memref<16x1xf32, #tpu.memory_space<vmem>>, %arg6: memref<1x16x16xf32, #tpu.memory_space<vmem>>) attributes {dimension_semantics = [#tpu.dimension_semantics<parallel>], iteration_bounds = array<i64: 2>, scalar_prefetch = 0 : i64, scratch_operands = 0 : i64, tpu.core_type = #tpu.core_type<tc>, window_params = [{transform_indices = @transform_0, window_bounds = array<i64: 1, 16, 18>}, {pipeline_mode = #tpu.pipeline_mode<synchronous>, transform_indices = @transform_1, window_bounds = array<i64: 3, 16, 16>}, {pipeline_mode = #tpu.pipeline_mode<synchronous>, transform_indices = @transform_2, window_bounds = array<i64: 16, 1>}, {pipeline_mode = #tpu.pipeline_mode<synchronous>, transform_indices = @transform_3, window_bounds = array<i64: 16, 1>}, {pipeline_mode = #tpu.pipeline_mode<synchronous>, transform_indices = @transform_4, window_bounds = array<i64: 16, 1>}, {transform_indices = @transform_5, window_bounds = array<i64: 1, 16, 16>}]} {
    %c0 = arith.constant 0 : index
    %c0_0 = arith.constant 0 : index
    %c0_1 = arith.constant 0 : index
    %0 = vector.load %arg1[%c0, %c0_0, %c0_1] : memref<1x16x18xf32, #tpu.memory_space<vmem>>, vector<1x16x18xf32>
    %1 = vector.shape_cast %0 : vector<1x16x18xf32> to vector<16x18xf32>
    %cst = arith.constant 0.000000e+00 : f32
    %2 = vector.broadcast %cst : f32 to vector<16x16xf32>
    %c0_2 = arith.constant 0 : index
    %c0_3 = arith.constant 0 : index
    %c0_4 = arith.constant 0 : index
    %3 = vector.load %arg2[%c0_2, %c0_3, %c0_4] : memref<3x16x16xf32, #tpu.memory_space<vmem>>, vector<1x16x16xf32>
    %4 = vector.shape_cast %3 : vector<1x16x16xf32> to vector<16x16xf32>
    %5 = vector.extract_strided_slice %1 {offsets = [0, 0], sizes = [16, 16], strides = [1, 1]} : vector<16x18xf32> to vector<16x16xf32>
    %cst_5 = arith.constant dense<0.000000e+00> : vector<16x16xf32>
    %6 = tpu.matmul %4, %5, %cst_5 {dimension_numbers = #tpu.dot_dimension_numbers<[1], [0], [0], [1], [0, 0, 1, 1], [], []>} : vector<16x16xf32>, vector<16x16xf32>, vector<16x16xf32> -> vector<16x16xf32>
    %7 = arith.addf %2, %6 : vector<16x16xf32>
    %c1 = arith.constant 1 : index
    %c0_6 = arith.constant 0 : index
    %c0_7 = arith.constant 0 : index
    %8 = vector.load %arg2[%c1, %c0_6, %c0_7] : memref<3x16x16xf32, #tpu.memory_space<vmem>>, vector<1x16x16xf32>
    %9 = vector.shape_cast %8 : vector<1x16x16xf32> to vector<16x16xf32>
    %10 = vector.extract_strided_slice %1 {offsets = [0, 1], sizes = [16, 16], strides = [1, 1]} : vector<16x18xf32> to vector<16x16xf32>
    %cst_8 = arith.constant dense<0.000000e+00> : vector<16x16xf32>
    %11 = tpu.matmul %9, %10, %cst_8 {dimension_numbers = #tpu.dot_dimension_numbers<[1], [0], [0], [1], [0, 0, 1, 1], [], []>} : vector<16x16xf32>, vector<16x16xf32>, vector<16x16xf32> -> vector<16x16xf32>
    %12 = arith.addf %7, %11 : vector<16x16xf32>
    %c2 = arith.constant 2 : index
    %c0_9 = arith.constant 0 : index
    %c0_10 = arith.constant 0 : index
    %13 = vector.load %arg2[%c2, %c0_9, %c0_10] : memref<3x16x16xf32, #tpu.memory_space<vmem>>, vector<1x16x16xf32>
    %14 = vector.shape_cast %13 : vector<1x16x16xf32> to vector<16x16xf32>
    %15 = vector.extract_strided_slice %1 {offsets = [0, 2], sizes = [16, 16], strides = [1, 1]} : vector<16x18xf32> to vector<16x16xf32>
    %cst_11 = arith.constant dense<0.000000e+00> : vector<16x16xf32>
    %16 = tpu.matmul %14, %15, %cst_11 {dimension_numbers = #tpu.dot_dimension_numbers<[1], [0], [0], [1], [0, 0, 1, 1], [], []>} : vector<16x16xf32>, vector<16x16xf32>, vector<16x16xf32> -> vector<16x16xf32>
    %17 = arith.addf %12, %16 : vector<16x16xf32>
    %c0_12 = arith.constant 0 : index
    %c0_13 = arith.constant 0 : index
    %18 = vector.load %arg3[%c0_12, %c0_13] : memref<16x1xf32, #tpu.memory_space<vmem>>, vector<16x1xf32>
    %19 = vector.broadcast %18 : vector<16x1xf32> to vector<16x16xf32>
    %20 = arith.addf %17, %19 : vector<16x16xf32>
    %21 = vector.shape_cast %20 : vector<16x16xf32> to vector<1x16x16xf32>
    %cst_14 = arith.constant dense<0.000000e+00> : vector<1xf32>
    %22 = vector.multi_reduction <add>, %21, %cst_14 [1, 2] : vector<1x16x16xf32> to vector<1xf32>
    %23 = vector.shape_cast %22 : vector<1xf32> to vector<1x1x1xf32>
    %24 = vector.extract %23[0, 0, 0] : f32 from vector<1x1x1xf32>
    %25 = vector.broadcast %24 : f32 to vector<1x1xf32>
    %cst_15 = arith.constant 2.560000e+02 : f32
    %26 = vector.broadcast %cst_15 : f32 to vector<1x1xf32>
    %27 = arith.divf %25, %26 : vector<1x1xf32>
    %28 = vector.broadcast %27 : vector<1x1xf32> to vector<16x16xf32>
    %29 = arith.subf %20, %28 : vector<16x16xf32>
    %30 = arith.mulf %29, %29 : vector<16x16xf32>
    %31 = vector.shape_cast %30 : vector<16x16xf32> to vector<1x16x16xf32>
    %cst_16 = arith.constant dense<0.000000e+00> : vector<1xf32>
    %32 = vector.multi_reduction <add>, %31, %cst_16 [1, 2] : vector<1x16x16xf32> to vector<1xf32>
    %33 = vector.shape_cast %32 : vector<1xf32> to vector<1x1x1xf32>
    %34 = vector.extract %33[0, 0, 0] : f32 from vector<1x1x1xf32>
    %35 = vector.broadcast %34 : f32 to vector<1x1xf32>
    %cst_17 = arith.constant 2.560000e+02 : f32
    %36 = vector.broadcast %cst_17 : f32 to vector<1x1xf32>
    %37 = arith.divf %35, %36 : vector<1x1xf32>
    %38 = vector.broadcast %27 : vector<1x1xf32> to vector<16x16xf32>
    %39 = arith.subf %20, %38 : vector<16x16xf32>
    %cst_18 = arith.constant 9.99999974E-6 : f32
    %40 = vector.broadcast %cst_18 : f32 to vector<1x1xf32>
    %41 = arith.addf %37, %40 : vector<1x1xf32>
    %42 = math.rsqrt %41 : vector<1x1xf32>
    %43 = vector.broadcast %42 : vector<1x1xf32> to vector<16x16xf32>
    %44 = arith.mulf %39, %43 : vector<16x16xf32>
    %c0_19 = arith.constant 0 : index
    %c0_20 = arith.constant 0 : index
    %45 = vector.load %arg4[%c0_19, %c0_20] : memref<16x1xf32, #tpu.memory_space<vmem>>, vector<16x1xf32>
    %46 = vector.broadcast %45 : vector<16x1xf32> to vector<16x16xf32>
    %47 = arith.mulf %44, %46 : vector<16x16xf32>
    %c0_21 = arith.constant 0 : index
    %c0_22 = arith.constant 0 : index
    %48 = vector.load %arg5[%c0_21, %c0_22] : memref<16x1xf32, #tpu.memory_space<vmem>>, vector<16x1xf32>
    %49 = vector.broadcast %48 : vector<16x1xf32> to vector<16x16xf32>
    %50 = arith.addf %47, %49 : vector<16x16xf32>
    %51 = math.tanh %50 : vector<16x16xf32>
    %c0_23 = arith.constant 0 : index
    %c0_24 = arith.constant 0 : index
    %c0_25 = arith.constant 0 : index
    %52 = vector.load %arg6[%c0_23, %c0_24, %c0_25] : memref<1x16x16xf32, #tpu.memory_space<vmem>>, vector<1x16x16xf32>
    %53 = vector.shape_cast %52 : vector<1x16x16xf32> to vector<16x16xf32>
    %54 = vector.shape_cast %51 : vector<16x16xf32> to vector<1x16x16xf32>
    tpu.vector_store %arg6[%c0_23, %c0_24, %c0_25], %54 {strides = array<i32>} : memref<1x16x16xf32, #tpu.memory_space<vmem>>, vector<1x16x16xf32>,
    return
  }
  func.func @transform_0(%arg0: i32) -> (i32, i32, i32) {
    %c0_i32 = arith.constant 0 : i32
    %c0_i32_0 = arith.constant 0 : i32
    %c0_i32_1 = arith.constant 0 : i32
    return %arg0, %c0_i32, %c0_i32_0 : i32, i32, i32
  }
  func.func @transform_1(%arg0: i32) -> (i32, i32, i32) {
    %c0_i32 = arith.constant 0 : i32
    %c0_i32_0 = arith.constant 0 : i32
    %c0_i32_1 = arith.constant 0 : i32
    %c0_i32_2 = arith.constant 0 : i32
    return %c0_i32, %c0_i32_0, %c0_i32_1 : i32, i32, i32
  }
  func.func @transform_2(%arg0: i32) -> (i32, i32) {
    %c0_i32 = arith.constant 0 : i32
    %c0_i32_0 = arith.constant 0 : i32
    %c0_i32_1 = arith.constant 0 : i32
    return %c0_i32, %c0_i32_0 : i32, i32
  }
  func.func @transform_3(%arg0: i32) -> (i32, i32) {
    %c0_i32 = arith.constant 0 : i32
    %c0_i32_0 = arith.constant 0 : i32
    %c0_i32_1 = arith.constant 0 : i32
    return %c0_i32, %c0_i32_0 : i32, i32
  }
  func.func @transform_4(%arg0: i32) -> (i32, i32) {
    %c0_i32 = arith.constant 0 : i32
    %c0_i32_0 = arith.constant 0 : i32
    %c0_i32_1 = arith.constant 0 : i32
    return %c0_i32, %c0_i32_0 : i32, i32
  }
  func.func @transform_5(%arg0: i32) -> (i32, i32, i32) {
    %c0_i32 = arith.constant 0 : i32
    %c0_i32_0 = arith.constant 0 : i32
    %c0_i32_1 = arith.constant 0 : i32
    return %arg0, %c0_i32, %c0_i32_0 : i32, i32, i32
  }
}

module attributes {stable_mosaic.version = 11 : i64} {
  func.func @_gru_bidir_kernel(%arg0: i32, %arg1: memref<1x16x1xf32, #tpu.memory_space<vmem>>, %arg2: memref<1x24xf32, #tpu.memory_space<vmem>>, %arg3: memref<8x24xf32, #tpu.memory_space<vmem>>, %arg4: memref<1x24xf32, #tpu.memory_space<vmem>>, %arg5: memref<1x24xf32, #tpu.memory_space<vmem>>, %arg6: memref<1x24xf32, #tpu.memory_space<vmem>>, %arg7: memref<8x24xf32, #tpu.memory_space<vmem>>, %arg8: memref<1x24xf32, #tpu.memory_space<vmem>>, %arg9: memref<1x24xf32, #tpu.memory_space<vmem>>, %arg10: memref<1x16x16xf32, #tpu.memory_space<vmem>>, %arg11: memref<16x24xf32, #tpu.memory_space<vmem>>, %arg12: memref<16x24xf32, #tpu.memory_space<vmem>>, %arg13: memref<16x16xf32, #tpu.memory_space<vmem>>) attributes {dimension_semantics = [#tpu.dimension_semantics<parallel>], iteration_bounds = array<i64: 2>, scalar_prefetch = 0 : i64, scratch_operands = 3 : i64, tpu.core_type = #tpu.core_type<tc>, window_params = [{transform_indices = @transform_0, window_bounds = array<i64: 1, 16, 1>}, {pipeline_mode = #tpu.pipeline_mode<synchronous>, transform_indices = @transform_1, window_bounds = array<i64: 1, 24>}, {pipeline_mode = #tpu.pipeline_mode<synchronous>, transform_indices = @transform_2, window_bounds = array<i64: 8, 24>}, {pipeline_mode = #tpu.pipeline_mode<synchronous>, transform_indices = @transform_3, window_bounds = array<i64: 1, 24>}, {pipeline_mode = #tpu.pipeline_mode<synchronous>, transform_indices = @transform_4, window_bounds = array<i64: 1, 24>}, {pipeline_mode = #tpu.pipeline_mode<synchronous>, transform_indices = @transform_5, window_bounds = array<i64: 1, 24>}, {pipeline_mode = #tpu.pipeline_mode<synchronous>, transform_indices = @transform_6, window_bounds = array<i64: 8, 24>}, {pipeline_mode = #tpu.pipeline_mode<synchronous>, transform_indices = @transform_7, window_bounds = array<i64: 1, 24>}, {pipeline_mode = #tpu.pipeline_mode<synchronous>, transform_indices = @transform_8, window_bounds = array<i64: 1, 24>}, {transform_indices = @transform_9, window_bounds = array<i64: 1, 16, 16>}]} {
    %c0 = arith.constant 0 : index
    %c0_0 = arith.constant 0 : index
    %c0_1 = arith.constant 0 : index
    %0 = vector.load %arg1[%c0, %c0_0, %c0_1] : memref<1x16x1xf32, #tpu.memory_space<vmem>>, vector<1x16x1xf32>
    %1 = vector.shape_cast %0 : vector<1x16x1xf32> to vector<16x1xf32>
    %c0_2 = arith.constant 0 : index
    %c0_3 = arith.constant 0 : index
    %2 = vector.load %arg2[%c0_2, %c0_3] : memref<1x24xf32, #tpu.memory_space<vmem>>, vector<1x24xf32>
    %cst = arith.constant dense<0.000000e+00> : vector<16x24xf32>
    %3 = tpu.matmul %1, %2, %cst {dimension_numbers = #tpu.dot_dimension_numbers<[1], [0], [0], [1], [0, 0, 1, 1], [], []>} : vector<16x1xf32>, vector<1x24xf32>, vector<16x24xf32> -> vector<16x24xf32>
    %c0_4 = arith.constant 0 : index
    %c0_5 = arith.constant 0 : index
    %4 = vector.load %arg4[%c0_4, %c0_5] : memref<1x24xf32, #tpu.memory_space<vmem>>, vector<1x24xf32>
    %5 = vector.broadcast %4 : vector<1x24xf32> to vector<16x24xf32>
    %6 = arith.addf %3, %5 : vector<16x24xf32>
    %c0_6 = arith.constant 0 : index
    %c0_7 = arith.constant 0 : index
    %7 = vector.load %arg11[%c0_6, %c0_7] : memref<16x24xf32, #tpu.memory_space<vmem>>, vector<16x24xf32>
    tpu.vector_store %arg11[%c0_6, %c0_7], %6 {strides = array<i32>} : memref<16x24xf32, #tpu.memory_space<vmem>>, vector<16x24xf32>,
    %c0_8 = arith.constant 0 : index
    %c0_9 = arith.constant 0 : index
    %8 = vector.load %arg6[%c0_8, %c0_9] : memref<1x24xf32, #tpu.memory_space<vmem>>, vector<1x24xf32>
    %cst_10 = arith.constant dense<0.000000e+00> : vector<16x24xf32>
    %9 = tpu.matmul %1, %8, %cst_10 {dimension_numbers = #tpu.dot_dimension_numbers<[1], [0], [0], [1], [0, 0, 1, 1], [], []>} : vector<16x1xf32>, vector<1x24xf32>, vector<16x24xf32> -> vector<16x24xf32>
    %c0_11 = arith.constant 0 : index
    %c0_12 = arith.constant 0 : index
    %10 = vector.load %arg8[%c0_11, %c0_12] : memref<1x24xf32, #tpu.memory_space<vmem>>, vector<1x24xf32>
    %11 = vector.broadcast %10 : vector<1x24xf32> to vector<16x24xf32>
    %12 = arith.addf %9, %11 : vector<16x24xf32>
    %c0_13 = arith.constant 0 : index
    %c0_14 = arith.constant 0 : index
    %13 = vector.load %arg12[%c0_13, %c0_14] : memref<16x24xf32, #tpu.memory_space<vmem>>, vector<16x24xf32>
    tpu.vector_store %arg12[%c0_13, %c0_14], %12 {strides = array<i32>} : memref<16x24xf32, #tpu.memory_space<vmem>>, vector<16x24xf32>,
    %c0_15 = arith.constant 0 : index
    %c0_16 = arith.constant 0 : index
    %14 = vector.load %arg3[%c0_15, %c0_16] : memref<8x24xf32, #tpu.memory_space<vmem>>, vector<8x24xf32>
    %c0_17 = arith.constant 0 : index
    %c0_18 = arith.constant 0 : index
    %15 = vector.load %arg5[%c0_17, %c0_18] : memref<1x24xf32, #tpu.memory_space<vmem>>, vector<1x24xf32>
    %c0_19 = arith.constant 0 : index
    %c0_20 = arith.constant 0 : index
    %16 = vector.load %arg7[%c0_19, %c0_20] : memref<8x24xf32, #tpu.memory_space<vmem>>, vector<8x24xf32>
    %c0_21 = arith.constant 0 : index
    %c0_22 = arith.constant 0 : index
    %17 = vector.load %arg9[%c0_21, %c0_22] : memref<1x24xf32, #tpu.memory_space<vmem>>, vector<1x24xf32>
    %cst_23 = arith.constant 0.000000e+00 : f32
    %18 = vector.broadcast %cst_23 : f32 to vector<1x8xf32>
    %c0_i32 = arith.constant 0 : i32
    %c16_i32 = arith.constant 16 : i32
    %19 = arith.addi %c0_i32, %c16_i32 : i32
    %c1_i32 = arith.constant 1 : i32
    %20:2 = scf.for %arg14 = %c0_i32 to %19 step %c1_i32 iter_args(%arg15 = %18, %arg16 = %18) -> (vector<1x8xf32>, vector<1x8xf32>)  : i32 {
      %c15_i32 = arith.constant 15 : i32
      %25 = arith.subi %c15_i32, %arg14 : i32
      %26 = arith.index_cast %arg14 : i32 to index
      %c0_30 = arith.constant 0 : index
      %27 = vector.load %arg11[%26, %c0_30] : memref<16x24xf32, #tpu.memory_space<vmem>>, vector<1x24xf32>
      %cst_31 = arith.constant dense<0.000000e+00> : vector<1x24xf32>
      %28 = tpu.matmul %arg15, %14, %cst_31 {dimension_numbers = #tpu.dot_dimension_numbers<[1], [0], [0], [1], [0, 0, 1, 1], [], []>} : vector<1x8xf32>, vector<8x24xf32>, vector<1x24xf32> -> vector<1x24xf32>
      %29 = arith.addf %28, %15 : vector<1x24xf32>
      %30 = vector.extract_strided_slice %27 {offsets = [0, 0], sizes = [1, 8], strides = [1, 1]} : vector<1x24xf32> to vector<1x8xf32>
      %31 = vector.extract_strided_slice %29 {offsets = [0, 0], sizes = [1, 8], strides = [1, 1]} : vector<1x24xf32> to vector<1x8xf32>
      %32 = arith.addf %30, %31 : vector<1x8xf32>
      %33 = arith.negf %32 : vector<1x8xf32>
      %34 = math.exp %33 : vector<1x8xf32>
      %cst_32 = arith.constant 1.000000e+00 : f32
      %35 = vector.broadcast %cst_32 : f32 to vector<1x8xf32>
      %36 = arith.addf %35, %34 : vector<1x8xf32>
      %37 = arith.divf %35, %36 : vector<1x8xf32>
      %38 = vector.extract_strided_slice %27 {offsets = [0, 8], sizes = [1, 8], strides = [1, 1]} : vector<1x24xf32> to vector<1x8xf32>
      %39 = vector.extract_strided_slice %29 {offsets = [0, 8], sizes = [1, 8], strides = [1, 1]} : vector<1x24xf32> to vector<1x8xf32>
      %40 = arith.addf %38, %39 : vector<1x8xf32>
      %41 = arith.negf %40 : vector<1x8xf32>
      %42 = math.exp %41 : vector<1x8xf32>
      %cst_33 = arith.constant 1.000000e+00 : f32
      %43 = vector.broadcast %cst_33 : f32 to vector<1x8xf32>
      %44 = arith.addf %43, %42 : vector<1x8xf32>
      %45 = arith.divf %43, %44 : vector<1x8xf32>
      %46 = vector.extract_strided_slice %27 {offsets = [0, 16], sizes = [1, 8], strides = [1, 1]} : vector<1x24xf32> to vector<1x8xf32>
      %47 = vector.extract_strided_slice %29 {offsets = [0, 16], sizes = [1, 8], strides = [1, 1]} : vector<1x24xf32> to vector<1x8xf32>
      %48 = arith.mulf %37, %47 : vector<1x8xf32>
      %49 = arith.addf %46, %48 : vector<1x8xf32>
      %50 = math.tanh %49 : vector<1x8xf32>
      %cst_34 = arith.constant 1.000000e+00 : f32
      %51 = vector.broadcast %cst_34 : f32 to vector<1x8xf32>
      %52 = arith.subf %51, %45 : vector<1x8xf32>
      %53 = arith.mulf %52, %50 : vector<1x8xf32>
      %54 = arith.mulf %45, %arg15 : vector<1x8xf32>
      %55 = arith.addf %53, %54 : vector<1x8xf32>
      %56 = arith.index_cast %25 : i32 to index
      %c0_35 = arith.constant 0 : index
      %57 = vector.load %arg12[%56, %c0_35] : memref<16x24xf32, #tpu.memory_space<vmem>>, vector<1x24xf32>
      %cst_36 = arith.constant dense<0.000000e+00> : vector<1x24xf32>
      %58 = tpu.matmul %arg16, %16, %cst_36 {dimension_numbers = #tpu.dot_dimension_numbers<[1], [0], [0], [1], [0, 0, 1, 1], [], []>} : vector<1x8xf32>, vector<8x24xf32>, vector<1x24xf32> -> vector<1x24xf32>
      %59 = arith.addf %58, %17 : vector<1x24xf32>
      %60 = vector.extract_strided_slice %57 {offsets = [0, 0], sizes = [1, 8], strides = [1, 1]} : vector<1x24xf32> to vector<1x8xf32>
      %61 = vector.extract_strided_slice %59 {offsets = [0, 0], sizes = [1, 8], strides = [1, 1]} : vector<1x24xf32> to vector<1x8xf32>
      %62 = arith.addf %60, %61 : vector<1x8xf32>
      %63 = arith.negf %62 : vector<1x8xf32>
      %64 = math.exp %63 : vector<1x8xf32>
      %cst_37 = arith.constant 1.000000e+00 : f32
      %65 = vector.broadcast %cst_37 : f32 to vector<1x8xf32>
      %66 = arith.addf %65, %64 : vector<1x8xf32>
      %67 = arith.divf %65, %66 : vector<1x8xf32>
      %68 = vector.extract_strided_slice %57 {offsets = [0, 8], sizes = [1, 8], strides = [1, 1]} : vector<1x24xf32> to vector<1x8xf32>
      %69 = vector.extract_strided_slice %59 {offsets = [0, 8], sizes = [1, 8], strides = [1, 1]} : vector<1x24xf32> to vector<1x8xf32>
      %70 = arith.addf %68, %69 : vector<1x8xf32>
      %71 = arith.negf %70 : vector<1x8xf32>
      %72 = math.exp %71 : vector<1x8xf32>
      %cst_38 = arith.constant 1.000000e+00 : f32
      %73 = vector.broadcast %cst_38 : f32 to vector<1x8xf32>
      %74 = arith.addf %73, %72 : vector<1x8xf32>
      %75 = arith.divf %73, %74 : vector<1x8xf32>
      %76 = vector.extract_strided_slice %57 {offsets = [0, 16], sizes = [1, 8], strides = [1, 1]} : vector<1x24xf32> to vector<1x8xf32>
      %77 = vector.extract_strided_slice %59 {offsets = [0, 16], sizes = [1, 8], strides = [1, 1]} : vector<1x24xf32> to vector<1x8xf32>
      %78 = arith.mulf %67, %77 : vector<1x8xf32>
      %79 = arith.addf %76, %78 : vector<1x8xf32>
      %80 = math.tanh %79 : vector<1x8xf32>
      %cst_39 = arith.constant 1.000000e+00 : f32
      %81 = vector.broadcast %cst_39 : f32 to vector<1x8xf32>
      %82 = arith.subf %81, %75 : vector<1x8xf32>
      %83 = arith.mulf %82, %80 : vector<1x8xf32>
      %84 = arith.mulf %75, %arg16 : vector<1x8xf32>
      %85 = arith.addf %83, %84 : vector<1x8xf32>
      %86 = arith.index_cast %arg14 : i32 to index
      %c0_40 = arith.constant 0 : index
      %87 = vector.load %arg13[%86, %c0_40] : memref<16x16xf32, #tpu.memory_space<vmem>>, vector<1x8xf32>
      tpu.vector_store %arg13[%86, %c0_40], %55 {strides = array<i32>} : memref<16x16xf32, #tpu.memory_space<vmem>>, vector<1x8xf32>,
      %88 = arith.index_cast %25 : i32 to index
      %c8 = arith.constant 8 : index
      %89 = vector.load %arg13[%88, %c8] : memref<16x16xf32, #tpu.memory_space<vmem>>, vector<1x8xf32>
      tpu.vector_store %arg13[%88, %c8], %85 {strides = array<i32>} : memref<16x16xf32, #tpu.memory_space<vmem>>, vector<1x8xf32>,
      scf.yield %55, %85 : vector<1x8xf32>, vector<1x8xf32>
    }
    %c16_i32_24 = arith.constant 16 : i32
    %c0_25 = arith.constant 0 : index
    %c0_26 = arith.constant 0 : index
    %21 = vector.load %arg13[%c0_25, %c0_26] : memref<16x16xf32, #tpu.memory_space<vmem>>, vector<16x16xf32>
    %c0_27 = arith.constant 0 : index
    %c0_28 = arith.constant 0 : index
    %c0_29 = arith.constant 0 : index
    %22 = vector.load %arg10[%c0_27, %c0_28, %c0_29] : memref<1x16x16xf32, #tpu.memory_space<vmem>>, vector<1x16x16xf32>
    %23 = vector.shape_cast %22 : vector<1x16x16xf32> to vector<16x16xf32>
    %24 = vector.shape_cast %21 : vector<16x16xf32> to vector<1x16x16xf32>
    tpu.vector_store %arg10[%c0_27, %c0_28, %c0_29], %24 {strides = array<i32>} : memref<1x16x16xf32, #tpu.memory_space<vmem>>, vector<1x16x16xf32>,
    return
  }
  func.func @transform_0(%arg0: i32) -> (i32, i32, i32) {
    %c0_i32 = arith.constant 0 : i32
    %c0_i32_0 = arith.constant 0 : i32
    %c0_i32_1 = arith.constant 0 : i32
    return %arg0, %c0_i32, %c0_i32_0 : i32, i32, i32
  }
  func.func @transform_1(%arg0: i32) -> (i32, i32) {
    %c0_i32 = arith.constant 0 : i32
    %c0_i32_0 = arith.constant 0 : i32
    %c0_i32_1 = arith.constant 0 : i32
    return %c0_i32, %c0_i32_0 : i32, i32
  }
  func.func @transform_2(%arg0: i32) -> (i32, i32) {
    %c0_i32 = arith.constant 0 : i32
    %c0_i32_0 = arith.constant 0 : i32
    %c0_i32_1 = arith.constant 0 : i32
    return %c0_i32, %c0_i32_0 : i32, i32
  }
  func.func @transform_3(%arg0: i32) -> (i32, i32) {
    %c0_i32 = arith.constant 0 : i32
    %c0_i32_0 = arith.constant 0 : i32
    %c0_i32_1 = arith.constant 0 : i32
    return %c0_i32, %c0_i32_0 : i32, i32
  }
  func.func @transform_4(%arg0: i32) -> (i32, i32) {
    %c0_i32 = arith.constant 0 : i32
    %c0_i32_0 = arith.constant 0 : i32
    %c0_i32_1 = arith.constant 0 : i32
    return %c0_i32, %c0_i32_0 : i32, i32
  }
  func.func @transform_5(%arg0: i32) -> (i32, i32) {
    %c0_i32 = arith.constant 0 : i32
    %c0_i32_0 = arith.constant 0 : i32
    %c0_i32_1 = arith.constant 0 : i32
    return %c0_i32, %c0_i32_0 : i32, i32
  }
  func.func @transform_6(%arg0: i32) -> (i32, i32) {
    %c0_i32 = arith.constant 0 : i32
    %c0_i32_0 = arith.constant 0 : i32
    %c0_i32_1 = arith.constant 0 : i32
    return %c0_i32, %c0_i32_0 : i32, i32
  }
  func.func @transform_7(%arg0: i32) -> (i32, i32) {
    %c0_i32 = arith.constant 0 : i32
    %c0_i32_0 = arith.constant 0 : i32
    %c0_i32_1 = arith.constant 0 : i32
    return %c0_i32, %c0_i32_0 : i32, i32
  }
  func.func @transform_8(%arg0: i32) -> (i32, i32) {
    %c0_i32 = arith.constant 0 : i32
    %c0_i32_0 = arith.constant 0 : i32
    %c0_i32_1 = arith.constant 0 : i32
    return %c0_i32, %c0_i32_0 : i32, i32
  }
  func.func @transform_9(%arg0: i32) -> (i32, i32, i32) {
    %c0_i32 = arith.constant 0 : i32
    %c0_i32_0 = arith.constant 0 : i32
    %c0_i32_1 = arith.constant 0 : i32
    return %arg0, %c0_i32, %c0_i32_0 : i32, i32, i32
  }
}

module attributes {stable_mosaic.version = 11 : i64} {
  func.func @_gru_bidir_kernel(%arg0: i32, %arg1: memref<1x16x16xf32, #tpu.memory_space<vmem>>, %arg2: memref<16x24xf32, #tpu.memory_space<vmem>>, %arg3: memref<8x24xf32, #tpu.memory_space<vmem>>, %arg4: memref<1x24xf32, #tpu.memory_space<vmem>>, %arg5: memref<1x24xf32, #tpu.memory_space<vmem>>, %arg6: memref<16x24xf32, #tpu.memory_space<vmem>>, %arg7: memref<8x24xf32, #tpu.memory_space<vmem>>, %arg8: memref<1x24xf32, #tpu.memory_space<vmem>>, %arg9: memref<1x24xf32, #tpu.memory_space<vmem>>, %arg10: memref<1x16x16xf32, #tpu.memory_space<vmem>>, %arg11: memref<16x24xf32, #tpu.memory_space<vmem>>, %arg12: memref<16x24xf32, #tpu.memory_space<vmem>>, %arg13: memref<16x16xf32, #tpu.memory_space<vmem>>) attributes {dimension_semantics = [#tpu.dimension_semantics<parallel>], iteration_bounds = array<i64: 2>, scalar_prefetch = 0 : i64, scratch_operands = 3 : i64, tpu.core_type = #tpu.core_type<tc>, window_params = [{transform_indices = @transform_0, window_bounds = array<i64: 1, 16, 16>}, {pipeline_mode = #tpu.pipeline_mode<synchronous>, transform_indices = @transform_1, window_bounds = array<i64: 16, 24>}, {pipeline_mode = #tpu.pipeline_mode<synchronous>, transform_indices = @transform_2, window_bounds = array<i64: 8, 24>}, {pipeline_mode = #tpu.pipeline_mode<synchronous>, transform_indices = @transform_3, window_bounds = array<i64: 1, 24>}, {pipeline_mode = #tpu.pipeline_mode<synchronous>, transform_indices = @transform_4, window_bounds = array<i64: 1, 24>}, {pipeline_mode = #tpu.pipeline_mode<synchronous>, transform_indices = @transform_5, window_bounds = array<i64: 16, 24>}, {pipeline_mode = #tpu.pipeline_mode<synchronous>, transform_indices = @transform_6, window_bounds = array<i64: 8, 24>}, {pipeline_mode = #tpu.pipeline_mode<synchronous>, transform_indices = @transform_7, window_bounds = array<i64: 1, 24>}, {pipeline_mode = #tpu.pipeline_mode<synchronous>, transform_indices = @transform_8, window_bounds = array<i64: 1, 24>}, {transform_indices = @transform_9, window_bounds = array<i64: 1, 16, 16>}]} {
    %c0 = arith.constant 0 : index
    %c0_0 = arith.constant 0 : index
    %c0_1 = arith.constant 0 : index
    %0 = vector.load %arg1[%c0, %c0_0, %c0_1] : memref<1x16x16xf32, #tpu.memory_space<vmem>>, vector<1x16x16xf32>
    %1 = vector.shape_cast %0 : vector<1x16x16xf32> to vector<16x16xf32>
    %c0_2 = arith.constant 0 : index
    %c0_3 = arith.constant 0 : index
    %2 = vector.load %arg2[%c0_2, %c0_3] : memref<16x24xf32, #tpu.memory_space<vmem>>, vector<16x24xf32>
    %cst = arith.constant dense<0.000000e+00> : vector<16x24xf32>
    %3 = tpu.matmul %1, %2, %cst {dimension_numbers = #tpu.dot_dimension_numbers<[1], [0], [0], [1], [0, 0, 1, 1], [], []>} : vector<16x16xf32>, vector<16x24xf32>, vector<16x24xf32> -> vector<16x24xf32>
    %c0_4 = arith.constant 0 : index
    %c0_5 = arith.constant 0 : index
    %4 = vector.load %arg4[%c0_4, %c0_5] : memref<1x24xf32, #tpu.memory_space<vmem>>, vector<1x24xf32>
    %5 = vector.broadcast %4 : vector<1x24xf32> to vector<16x24xf32>
    %6 = arith.addf %3, %5 : vector<16x24xf32>
    %c0_6 = arith.constant 0 : index
    %c0_7 = arith.constant 0 : index
    %7 = vector.load %arg11[%c0_6, %c0_7] : memref<16x24xf32, #tpu.memory_space<vmem>>, vector<16x24xf32>
    tpu.vector_store %arg11[%c0_6, %c0_7], %6 {strides = array<i32>} : memref<16x24xf32, #tpu.memory_space<vmem>>, vector<16x24xf32>,
    %c0_8 = arith.constant 0 : index
    %c0_9 = arith.constant 0 : index
    %8 = vector.load %arg6[%c0_8, %c0_9] : memref<16x24xf32, #tpu.memory_space<vmem>>, vector<16x24xf32>
    %cst_10 = arith.constant dense<0.000000e+00> : vector<16x24xf32>
    %9 = tpu.matmul %1, %8, %cst_10 {dimension_numbers = #tpu.dot_dimension_numbers<[1], [0], [0], [1], [0, 0, 1, 1], [], []>} : vector<16x16xf32>, vector<16x24xf32>, vector<16x24xf32> -> vector<16x24xf32>
    %c0_11 = arith.constant 0 : index
    %c0_12 = arith.constant 0 : index
    %10 = vector.load %arg8[%c0_11, %c0_12] : memref<1x24xf32, #tpu.memory_space<vmem>>, vector<1x24xf32>
    %11 = vector.broadcast %10 : vector<1x24xf32> to vector<16x24xf32>
    %12 = arith.addf %9, %11 : vector<16x24xf32>
    %c0_13 = arith.constant 0 : index
    %c0_14 = arith.constant 0 : index
    %13 = vector.load %arg12[%c0_13, %c0_14] : memref<16x24xf32, #tpu.memory_space<vmem>>, vector<16x24xf32>
    tpu.vector_store %arg12[%c0_13, %c0_14], %12 {strides = array<i32>} : memref<16x24xf32, #tpu.memory_space<vmem>>, vector<16x24xf32>,
    %c0_15 = arith.constant 0 : index
    %c0_16 = arith.constant 0 : index
    %14 = vector.load %arg3[%c0_15, %c0_16] : memref<8x24xf32, #tpu.memory_space<vmem>>, vector<8x24xf32>
    %c0_17 = arith.constant 0 : index
    %c0_18 = arith.constant 0 : index
    %15 = vector.load %arg5[%c0_17, %c0_18] : memref<1x24xf32, #tpu.memory_space<vmem>>, vector<1x24xf32>
    %c0_19 = arith.constant 0 : index
    %c0_20 = arith.constant 0 : index
    %16 = vector.load %arg7[%c0_19, %c0_20] : memref<8x24xf32, #tpu.memory_space<vmem>>, vector<8x24xf32>
    %c0_21 = arith.constant 0 : index
    %c0_22 = arith.constant 0 : index
    %17 = vector.load %arg9[%c0_21, %c0_22] : memref<1x24xf32, #tpu.memory_space<vmem>>, vector<1x24xf32>
    %cst_23 = arith.constant 0.000000e+00 : f32
    %18 = vector.broadcast %cst_23 : f32 to vector<1x8xf32>
    %c0_i32 = arith.constant 0 : i32
    %c16_i32 = arith.constant 16 : i32
    %19 = arith.addi %c0_i32, %c16_i32 : i32
    %c1_i32 = arith.constant 1 : i32
    %20:2 = scf.for %arg14 = %c0_i32 to %19 step %c1_i32 iter_args(%arg15 = %18, %arg16 = %18) -> (vector<1x8xf32>, vector<1x8xf32>)  : i32 {
      %c15_i32 = arith.constant 15 : i32
      %25 = arith.subi %c15_i32, %arg14 : i32
      %26 = arith.index_cast %arg14 : i32 to index
      %c0_30 = arith.constant 0 : index
      %27 = vector.load %arg11[%26, %c0_30] : memref<16x24xf32, #tpu.memory_space<vmem>>, vector<1x24xf32>
      %cst_31 = arith.constant dense<0.000000e+00> : vector<1x24xf32>
      %28 = tpu.matmul %arg15, %14, %cst_31 {dimension_numbers = #tpu.dot_dimension_numbers<[1], [0], [0], [1], [0, 0, 1, 1], [], []>} : vector<1x8xf32>, vector<8x24xf32>, vector<1x24xf32> -> vector<1x24xf32>
      %29 = arith.addf %28, %15 : vector<1x24xf32>
      %30 = vector.extract_strided_slice %27 {offsets = [0, 0], sizes = [1, 8], strides = [1, 1]} : vector<1x24xf32> to vector<1x8xf32>
      %31 = vector.extract_strided_slice %29 {offsets = [0, 0], sizes = [1, 8], strides = [1, 1]} : vector<1x24xf32> to vector<1x8xf32>
      %32 = arith.addf %30, %31 : vector<1x8xf32>
      %33 = arith.negf %32 : vector<1x8xf32>
      %34 = math.exp %33 : vector<1x8xf32>
      %cst_32 = arith.constant 1.000000e+00 : f32
      %35 = vector.broadcast %cst_32 : f32 to vector<1x8xf32>
      %36 = arith.addf %35, %34 : vector<1x8xf32>
      %37 = arith.divf %35, %36 : vector<1x8xf32>
      %38 = vector.extract_strided_slice %27 {offsets = [0, 8], sizes = [1, 8], strides = [1, 1]} : vector<1x24xf32> to vector<1x8xf32>
      %39 = vector.extract_strided_slice %29 {offsets = [0, 8], sizes = [1, 8], strides = [1, 1]} : vector<1x24xf32> to vector<1x8xf32>
      %40 = arith.addf %38, %39 : vector<1x8xf32>
      %41 = arith.negf %40 : vector<1x8xf32>
      %42 = math.exp %41 : vector<1x8xf32>
      %cst_33 = arith.constant 1.000000e+00 : f32
      %43 = vector.broadcast %cst_33 : f32 to vector<1x8xf32>
      %44 = arith.addf %43, %42 : vector<1x8xf32>
      %45 = arith.divf %43, %44 : vector<1x8xf32>
      %46 = vector.extract_strided_slice %27 {offsets = [0, 16], sizes = [1, 8], strides = [1, 1]} : vector<1x24xf32> to vector<1x8xf32>
      %47 = vector.extract_strided_slice %29 {offsets = [0, 16], sizes = [1, 8], strides = [1, 1]} : vector<1x24xf32> to vector<1x8xf32>
      %48 = arith.mulf %37, %47 : vector<1x8xf32>
      %49 = arith.addf %46, %48 : vector<1x8xf32>
      %50 = math.tanh %49 : vector<1x8xf32>
      %cst_34 = arith.constant 1.000000e+00 : f32
      %51 = vector.broadcast %cst_34 : f32 to vector<1x8xf32>
      %52 = arith.subf %51, %45 : vector<1x8xf32>
      %53 = arith.mulf %52, %50 : vector<1x8xf32>
      %54 = arith.mulf %45, %arg15 : vector<1x8xf32>
      %55 = arith.addf %53, %54 : vector<1x8xf32>
      %56 = arith.index_cast %25 : i32 to index
      %c0_35 = arith.constant 0 : index
      %57 = vector.load %arg12[%56, %c0_35] : memref<16x24xf32, #tpu.memory_space<vmem>>, vector<1x24xf32>
      %cst_36 = arith.constant dense<0.000000e+00> : vector<1x24xf32>
      %58 = tpu.matmul %arg16, %16, %cst_36 {dimension_numbers = #tpu.dot_dimension_numbers<[1], [0], [0], [1], [0, 0, 1, 1], [], []>} : vector<1x8xf32>, vector<8x24xf32>, vector<1x24xf32> -> vector<1x24xf32>
      %59 = arith.addf %58, %17 : vector<1x24xf32>
      %60 = vector.extract_strided_slice %57 {offsets = [0, 0], sizes = [1, 8], strides = [1, 1]} : vector<1x24xf32> to vector<1x8xf32>
      %61 = vector.extract_strided_slice %59 {offsets = [0, 0], sizes = [1, 8], strides = [1, 1]} : vector<1x24xf32> to vector<1x8xf32>
      %62 = arith.addf %60, %61 : vector<1x8xf32>
      %63 = arith.negf %62 : vector<1x8xf32>
      %64 = math.exp %63 : vector<1x8xf32>
      %cst_37 = arith.constant 1.000000e+00 : f32
      %65 = vector.broadcast %cst_37 : f32 to vector<1x8xf32>
      %66 = arith.addf %65, %64 : vector<1x8xf32>
      %67 = arith.divf %65, %66 : vector<1x8xf32>
      %68 = vector.extract_strided_slice %57 {offsets = [0, 8], sizes = [1, 8], strides = [1, 1]} : vector<1x24xf32> to vector<1x8xf32>
      %69 = vector.extract_strided_slice %59 {offsets = [0, 8], sizes = [1, 8], strides = [1, 1]} : vector<1x24xf32> to vector<1x8xf32>
      %70 = arith.addf %68, %69 : vector<1x8xf32>
      %71 = arith.negf %70 : vector<1x8xf32>
      %72 = math.exp %71 : vector<1x8xf32>
      %cst_38 = arith.constant 1.000000e+00 : f32
      %73 = vector.broadcast %cst_38 : f32 to vector<1x8xf32>
      %74 = arith.addf %73, %72 : vector<1x8xf32>
      %75 = arith.divf %73, %74 : vector<1x8xf32>
      %76 = vector.extract_strided_slice %57 {offsets = [0, 16], sizes = [1, 8], strides = [1, 1]} : vector<1x24xf32> to vector<1x8xf32>
      %77 = vector.extract_strided_slice %59 {offsets = [0, 16], sizes = [1, 8], strides = [1, 1]} : vector<1x24xf32> to vector<1x8xf32>
      %78 = arith.mulf %67, %77 : vector<1x8xf32>
      %79 = arith.addf %76, %78 : vector<1x8xf32>
      %80 = math.tanh %79 : vector<1x8xf32>
      %cst_39 = arith.constant 1.000000e+00 : f32
      %81 = vector.broadcast %cst_39 : f32 to vector<1x8xf32>
      %82 = arith.subf %81, %75 : vector<1x8xf32>
      %83 = arith.mulf %82, %80 : vector<1x8xf32>
      %84 = arith.mulf %75, %arg16 : vector<1x8xf32>
      %85 = arith.addf %83, %84 : vector<1x8xf32>
      %86 = arith.index_cast %arg14 : i32 to index
      %c0_40 = arith.constant 0 : index
      %87 = vector.load %arg13[%86, %c0_40] : memref<16x16xf32, #tpu.memory_space<vmem>>, vector<1x8xf32>
      tpu.vector_store %arg13[%86, %c0_40], %55 {strides = array<i32>} : memref<16x16xf32, #tpu.memory_space<vmem>>, vector<1x8xf32>,
      %88 = arith.index_cast %25 : i32 to index
      %c8 = arith.constant 8 : index
      %89 = vector.load %arg13[%88, %c8] : memref<16x16xf32, #tpu.memory_space<vmem>>, vector<1x8xf32>
      tpu.vector_store %arg13[%88, %c8], %85 {strides = array<i32>} : memref<16x16xf32, #tpu.memory_space<vmem>>, vector<1x8xf32>,
      scf.yield %55, %85 : vector<1x8xf32>, vector<1x8xf32>
    }
    %c16_i32_24 = arith.constant 16 : i32
    %c0_25 = arith.constant 0 : index
    %c0_26 = arith.constant 0 : index
    %21 = vector.load %arg13[%c0_25, %c0_26] : memref<16x16xf32, #tpu.memory_space<vmem>>, vector<16x16xf32>
    %c0_27 = arith.constant 0 : index
    %c0_28 = arith.constant 0 : index
    %c0_29 = arith.constant 0 : index
    %22 = vector.load %arg10[%c0_27, %c0_28, %c0_29] : memref<1x16x16xf32, #tpu.memory_space<vmem>>, vector<1x16x16xf32>
    %23 = vector.shape_cast %22 : vector<1x16x16xf32> to vector<16x16xf32>
    %24 = vector.shape_cast %21 : vector<16x16xf32> to vector<1x16x16xf32>
    tpu.vector_store %arg10[%c0_27, %c0_28, %c0_29], %24 {strides = array<i32>} : memref<1x16x16xf32, #tpu.memory_space<vmem>>, vector<1x16x16xf32>,
    return
  }
  func.func @transform_0(%arg0: i32) -> (i32, i32, i32) {
    %c0_i32 = arith.constant 0 : i32
    %c0_i32_0 = arith.constant 0 : i32
    %c0_i32_1 = arith.constant 0 : i32
    return %arg0, %c0_i32, %c0_i32_0 : i32, i32, i32
  }
  func.func @transform_1(%arg0: i32) -> (i32, i32) {
    %c0_i32 = arith.constant 0 : i32
    %c0_i32_0 = arith.constant 0 : i32
    %c0_i32_1 = arith.constant 0 : i32
    return %c0_i32, %c0_i32_0 : i32, i32
  }
  func.func @transform_2(%arg0: i32) -> (i32, i32) {
    %c0_i32 = arith.constant 0 : i32
    %c0_i32_0 = arith.constant 0 : i32
    %c0_i32_1 = arith.constant 0 : i32
    return %c0_i32, %c0_i32_0 : i32, i32
  }
  func.func @transform_3(%arg0: i32) -> (i32, i32) {
    %c0_i32 = arith.constant 0 : i32
    %c0_i32_0 = arith.constant 0 : i32
    %c0_i32_1 = arith.constant 0 : i32
    return %c0_i32, %c0_i32_0 : i32, i32
  }
  func.func @transform_4(%arg0: i32) -> (i32, i32) {
    %c0_i32 = arith.constant 0 : i32
    %c0_i32_0 = arith.constant 0 : i32
    %c0_i32_1 = arith.constant 0 : i32
    return %c0_i32, %c0_i32_0 : i32, i32
  }
  func.func @transform_5(%arg0: i32) -> (i32, i32) {
    %c0_i32 = arith.constant 0 : i32
    %c0_i32_0 = arith.constant 0 : i32
    %c0_i32_1 = arith.constant 0 : i32
    return %c0_i32, %c0_i32_0 : i32, i32
  }
  func.func @transform_6(%arg0: i32) -> (i32, i32) {
    %c0_i32 = arith.constant 0 : i32
    %c0_i32_0 = arith.constant 0 : i32
    %c0_i32_1 = arith.constant 0 : i32
    return %c0_i32, %c0_i32_0 : i32, i32
  }
  func.func @transform_7(%arg0: i32) -> (i32, i32) {
    %c0_i32 = arith.constant 0 : i32
    %c0_i32_0 = arith.constant 0 : i32
    %c0_i32_1 = arith.constant 0 : i32
    return %c0_i32, %c0_i32_0 : i32, i32
  }
  func.func @transform_8(%arg0: i32) -> (i32, i32) {
    %c0_i32 = arith.constant 0 : i32
    %c0_i32_0 = arith.constant 0 : i32
    %c0_i32_1 = arith.constant 0 : i32
    return %c0_i32, %c0_i32_0 : i32, i32
  }
  func.func @transform_9(%arg0: i32) -> (i32, i32, i32) {
    %c0_i32 = arith.constant 0 : i32
    %c0_i32_0 = arith.constant 0 : i32
    %c0_i32_1 = arith.constant 0 : i32
    return %arg0, %c0_i32, %c0_i32_0 : i32, i32, i32
  }
}

module attributes {stable_mosaic.version = 11 : i64} {
  func.func @_conv_gn_tanh_kernel(%arg0: i32, %arg1: memref<1x16x16xf32, #tpu.memory_space<vmem>>, %arg2: memref<1x16x16xf32, #tpu.memory_space<vmem>>, %arg3: memref<16x1xf32, #tpu.memory_space<vmem>>, %arg4: memref<16x1xf32, #tpu.memory_space<vmem>>, %arg5: memref<16x1xf32, #tpu.memory_space<vmem>>, %arg6: memref<1x16x16xf32, #tpu.memory_space<vmem>>, %arg7: memref<1x16x16xf32, #tpu.memory_space<vmem>>) attributes {dimension_semantics = [#tpu.dimension_semantics<parallel>], iteration_bounds = array<i64: 2>, scalar_prefetch = 0 : i64, scratch_operands = 0 : i64, tpu.core_type = #tpu.core_type<tc>, window_params = [{transform_indices = @transform_0, window_bounds = array<i64: 1, 16, 16>}, {pipeline_mode = #tpu.pipeline_mode<synchronous>, transform_indices = @transform_1, window_bounds = array<i64: 1, 16, 16>}, {pipeline_mode = #tpu.pipeline_mode<synchronous>, transform_indices = @transform_2, window_bounds = array<i64: 16, 1>}, {pipeline_mode = #tpu.pipeline_mode<synchronous>, transform_indices = @transform_3, window_bounds = array<i64: 16, 1>}, {pipeline_mode = #tpu.pipeline_mode<synchronous>, transform_indices = @transform_4, window_bounds = array<i64: 16, 1>}, {transform_indices = @transform_5, window_bounds = array<i64: 1, 16, 16>}, {transform_indices = @transform_6, window_bounds = array<i64: 1, 16, 16>}]} {
    %c0 = arith.constant 0 : index
    %c0_0 = arith.constant 0 : index
    %c0_1 = arith.constant 0 : index
    %0 = vector.load %arg1[%c0, %c0_0, %c0_1] : memref<1x16x16xf32, #tpu.memory_space<vmem>>, vector<1x16x16xf32>
    %1 = vector.shape_cast %0 : vector<1x16x16xf32> to vector<16x16xf32>
    %cst = arith.constant 0.000000e+00 : f32
    %2 = vector.broadcast %cst : f32 to vector<16x16xf32>
    %c0_2 = arith.constant 0 : index
    %c0_3 = arith.constant 0 : index
    %c0_4 = arith.constant 0 : index
    %3 = vector.load %arg2[%c0_2, %c0_3, %c0_4] : memref<1x16x16xf32, #tpu.memory_space<vmem>>, vector<1x16x16xf32>
    %4 = vector.shape_cast %3 : vector<1x16x16xf32> to vector<16x16xf32>
    %cst_5 = arith.constant dense<0.000000e+00> : vector<16x16xf32>
    %5 = tpu.matmul %4, %1, %cst_5 {dimension_numbers = #tpu.dot_dimension_numbers<[1], [0], [0], [1], [0, 0, 1, 1], [], []>} : vector<16x16xf32>, vector<16x16xf32>, vector<16x16xf32> -> vector<16x16xf32>
    %6 = arith.addf %2, %5 : vector<16x16xf32>
    %c0_6 = arith.constant 0 : index
    %c0_7 = arith.constant 0 : index
    %7 = vector.load %arg3[%c0_6, %c0_7] : memref<16x1xf32, #tpu.memory_space<vmem>>, vector<16x1xf32>
    %8 = vector.broadcast %7 : vector<16x1xf32> to vector<16x16xf32>
    %9 = arith.addf %6, %8 : vector<16x16xf32>
    %10 = vector.shape_cast %9 : vector<16x16xf32> to vector<1x16x16xf32>
    %cst_8 = arith.constant dense<0.000000e+00> : vector<1xf32>
    %11 = vector.multi_reduction <add>, %10, %cst_8 [1, 2] : vector<1x16x16xf32> to vector<1xf32>
    %12 = vector.shape_cast %11 : vector<1xf32> to vector<1x1x1xf32>
    %13 = vector.extract %12[0, 0, 0] : f32 from vector<1x1x1xf32>
    %14 = vector.broadcast %13 : f32 to vector<1x1xf32>
    %cst_9 = arith.constant 2.560000e+02 : f32
    %15 = vector.broadcast %cst_9 : f32 to vector<1x1xf32>
    %16 = arith.divf %14, %15 : vector<1x1xf32>
    %17 = vector.broadcast %16 : vector<1x1xf32> to vector<16x16xf32>
    %18 = arith.subf %9, %17 : vector<16x16xf32>
    %19 = arith.mulf %18, %18 : vector<16x16xf32>
    %20 = vector.shape_cast %19 : vector<16x16xf32> to vector<1x16x16xf32>
    %cst_10 = arith.constant dense<0.000000e+00> : vector<1xf32>
    %21 = vector.multi_reduction <add>, %20, %cst_10 [1, 2] : vector<1x16x16xf32> to vector<1xf32>
    %22 = vector.shape_cast %21 : vector<1xf32> to vector<1x1x1xf32>
    %23 = vector.extract %22[0, 0, 0] : f32 from vector<1x1x1xf32>
    %24 = vector.broadcast %23 : f32 to vector<1x1xf32>
    %cst_11 = arith.constant 2.560000e+02 : f32
    %25 = vector.broadcast %cst_11 : f32 to vector<1x1xf32>
    %26 = arith.divf %24, %25 : vector<1x1xf32>
    %27 = vector.broadcast %16 : vector<1x1xf32> to vector<16x16xf32>
    %28 = arith.subf %9, %27 : vector<16x16xf32>
    %cst_12 = arith.constant 9.99999974E-6 : f32
    %29 = vector.broadcast %cst_12 : f32 to vector<1x1xf32>
    %30 = arith.addf %26, %29 : vector<1x1xf32>
    %31 = math.rsqrt %30 : vector<1x1xf32>
    %32 = vector.broadcast %31 : vector<1x1xf32> to vector<16x16xf32>
    %33 = arith.mulf %28, %32 : vector<16x16xf32>
    %c0_13 = arith.constant 0 : index
    %c0_14 = arith.constant 0 : index
    %34 = vector.load %arg4[%c0_13, %c0_14] : memref<16x1xf32, #tpu.memory_space<vmem>>, vector<16x1xf32>
    %35 = vector.broadcast %34 : vector<16x1xf32> to vector<16x16xf32>
    %36 = arith.mulf %33, %35 : vector<16x16xf32>
    %c0_15 = arith.constant 0 : index
    %c0_16 = arith.constant 0 : index
    %37 = vector.load %arg5[%c0_15, %c0_16] : memref<16x1xf32, #tpu.memory_space<vmem>>, vector<16x1xf32>
    %38 = vector.broadcast %37 : vector<16x1xf32> to vector<16x16xf32>
    %39 = arith.addf %36, %38 : vector<16x16xf32>
    %40 = math.tanh %39 : vector<16x16xf32>
    %c0_17 = arith.constant 0 : index
    %c0_18 = arith.constant 0 : index
    %c0_19 = arith.constant 0 : index
    %41 = vector.load %arg6[%c0_17, %c0_18, %c0_19] : memref<1x16x16xf32, #tpu.memory_space<vmem>>, vector<1x16x16xf32>
    %42 = vector.shape_cast %41 : vector<1x16x16xf32> to vector<16x16xf32>
    %43 = arith.addf %40, %42 : vector<16x16xf32>
    %c0_20 = arith.constant 0 : index
    %c0_21 = arith.constant 0 : index
    %c0_22 = arith.constant 0 : index
    %44 = vector.load %arg7[%c0_20, %c0_21, %c0_22] : memref<1x16x16xf32, #tpu.memory_space<vmem>>, vector<1x16x16xf32>
    %45 = vector.shape_cast %44 : vector<1x16x16xf32> to vector<16x16xf32>
    %46 = vector.shape_cast %43 : vector<16x16xf32> to vector<1x16x16xf32>
    tpu.vector_store %arg7[%c0_20, %c0_21, %c0_22], %46 {strides = array<i32>} : memref<1x16x16xf32, #tpu.memory_space<vmem>>, vector<1x16x16xf32>,
    return
  }
  func.func @transform_0(%arg0: i32) -> (i32, i32, i32) {
    %c0_i32 = arith.constant 0 : i32
    %c0_i32_0 = arith.constant 0 : i32
    %c0_i32_1 = arith.constant 0 : i32
    return %arg0, %c0_i32, %c0_i32_0 : i32, i32, i32
  }
  func.func @transform_1(%arg0: i32) -> (i32, i32, i32) {
    %c0_i32 = arith.constant 0 : i32
    %c0_i32_0 = arith.constant 0 : i32
    %c0_i32_1 = arith.constant 0 : i32
    %c0_i32_2 = arith.constant 0 : i32
    return %c0_i32, %c0_i32_0, %c0_i32_1 : i32, i32, i32
  }
  func.func @transform_2(%arg0: i32) -> (i32, i32) {
    %c0_i32 = arith.constant 0 : i32
    %c0_i32_0 = arith.constant 0 : i32
    %c0_i32_1 = arith.constant 0 : i32
    return %c0_i32, %c0_i32_0 : i32, i32
  }
  func.func @transform_3(%arg0: i32) -> (i32, i32) {
    %c0_i32 = arith.constant 0 : i32
    %c0_i32_0 = arith.constant 0 : i32
    %c0_i32_1 = arith.constant 0 : i32
    return %c0_i32, %c0_i32_0 : i32, i32
  }
  func.func @transform_4(%arg0: i32) -> (i32, i32) {
    %c0_i32 = arith.constant 0 : i32
    %c0_i32_0 = arith.constant 0 : i32
    %c0_i32_1 = arith.constant 0 : i32
    return %c0_i32, %c0_i32_0 : i32, i32
  }
  func.func @transform_5(%arg0: i32) -> (i32, i32, i32) {
    %c0_i32 = arith.constant 0 : i32
    %c0_i32_0 = arith.constant 0 : i32
    %c0_i32_1 = arith.constant 0 : i32
    return %arg0, %c0_i32, %c0_i32_0 : i32, i32, i32
  }
  func.func @transform_6(%arg0: i32) -> (i32, i32, i32) {
    %c0_i32 = arith.constant 0 : i32
    %c0_i32_0 = arith.constant 0 : i32
    %c0_i32_1 = arith.constant 0 : i32
    return %arg0, %c0_i32, %c0_i32_0 : i32, i32, i32
  }
}

module attributes {stable_mosaic.version = 11 : i64} {
  func.func @_conv_gn_tanh_kernel(%arg0: i32, %arg1: memref<1x16x35xf32, #tpu.memory_space<vmem>>, %arg2: memref<4x8x16xf32, #tpu.memory_space<vmem>>, %arg3: memref<8x1xf32, #tpu.memory_space<vmem>>, %arg4: memref<8x1xf32, #tpu.memory_space<vmem>>, %arg5: memref<8x1xf32, #tpu.memory_space<vmem>>, %arg6: memref<1x8x32xf32, #tpu.memory_space<vmem>>) attributes {dimension_semantics = [#tpu.dimension_semantics<parallel>], iteration_bounds = array<i64: 2>, scalar_prefetch = 0 : i64, scratch_operands = 0 : i64, tpu.core_type = #tpu.core_type<tc>, window_params = [{transform_indices = @transform_0, window_bounds = array<i64: 1, 16, 35>}, {pipeline_mode = #tpu.pipeline_mode<synchronous>, transform_indices = @transform_1, window_bounds = array<i64: 4, 8, 16>}, {pipeline_mode = #tpu.pipeline_mode<synchronous>, transform_indices = @transform_2, window_bounds = array<i64: 8, 1>}, {pipeline_mode = #tpu.pipeline_mode<synchronous>, transform_indices = @transform_3, window_bounds = array<i64: 8, 1>}, {pipeline_mode = #tpu.pipeline_mode<synchronous>, transform_indices = @transform_4, window_bounds = array<i64: 8, 1>}, {transform_indices = @transform_5, window_bounds = array<i64: 1, 8, 32>}]} {
    %c0 = arith.constant 0 : index
    %c0_0 = arith.constant 0 : index
    %c0_1 = arith.constant 0 : index
    %0 = vector.load %arg1[%c0, %c0_0, %c0_1] : memref<1x16x35xf32, #tpu.memory_space<vmem>>, vector<1x16x35xf32>
    %1 = vector.shape_cast %0 : vector<1x16x35xf32> to vector<16x35xf32>
    %cst = arith.constant 0.000000e+00 : f32
    %2 = vector.broadcast %cst : f32 to vector<8x32xf32>
    %c0_2 = arith.constant 0 : index
    %c0_3 = arith.constant 0 : index
    %c0_4 = arith.constant 0 : index
    %3 = vector.load %arg2[%c0_2, %c0_3, %c0_4] : memref<4x8x16xf32, #tpu.memory_space<vmem>>, vector<1x8x16xf32>
    %4 = vector.shape_cast %3 : vector<1x8x16xf32> to vector<8x16xf32>
    %5 = vector.extract_strided_slice %1 {offsets = [0, 0], sizes = [16, 32], strides = [1, 1]} : vector<16x35xf32> to vector<16x32xf32>
    %cst_5 = arith.constant dense<0.000000e+00> : vector<8x32xf32>
    %6 = tpu.matmul %4, %5, %cst_5 {dimension_numbers = #tpu.dot_dimension_numbers<[1], [0], [0], [1], [0, 0, 1, 1], [], []>} : vector<8x16xf32>, vector<16x32xf32>, vector<8x32xf32> -> vector<8x32xf32>
    %7 = arith.addf %2, %6 : vector<8x32xf32>
    %c1 = arith.constant 1 : index
    %c0_6 = arith.constant 0 : index
    %c0_7 = arith.constant 0 : index
    %8 = vector.load %arg2[%c1, %c0_6, %c0_7] : memref<4x8x16xf32, #tpu.memory_space<vmem>>, vector<1x8x16xf32>
    %9 = vector.shape_cast %8 : vector<1x8x16xf32> to vector<8x16xf32>
    %10 = vector.extract_strided_slice %1 {offsets = [0, 1], sizes = [16, 32], strides = [1, 1]} : vector<16x35xf32> to vector<16x32xf32>
    %cst_8 = arith.constant dense<0.000000e+00> : vector<8x32xf32>
    %11 = tpu.matmul %9, %10, %cst_8 {dimension_numbers = #tpu.dot_dimension_numbers<[1], [0], [0], [1], [0, 0, 1, 1], [], []>} : vector<8x16xf32>, vector<16x32xf32>, vector<8x32xf32> -> vector<8x32xf32>
    %12 = arith.addf %7, %11 : vector<8x32xf32>
    %c2 = arith.constant 2 : index
    %c0_9 = arith.constant 0 : index
    %c0_10 = arith.constant 0 : index
    %13 = vector.load %arg2[%c2, %c0_9, %c0_10] : memref<4x8x16xf32, #tpu.memory_space<vmem>>, vector<1x8x16xf32>
    %14 = vector.shape_cast %13 : vector<1x8x16xf32> to vector<8x16xf32>
    %15 = vector.extract_strided_slice %1 {offsets = [0, 2], sizes = [16, 32], strides = [1, 1]} : vector<16x35xf32> to vector<16x32xf32>
    %cst_11 = arith.constant dense<0.000000e+00> : vector<8x32xf32>
    %16 = tpu.matmul %14, %15, %cst_11 {dimension_numbers = #tpu.dot_dimension_numbers<[1], [0], [0], [1], [0, 0, 1, 1], [], []>} : vector<8x16xf32>, vector<16x32xf32>, vector<8x32xf32> -> vector<8x32xf32>
    %17 = arith.addf %12, %16 : vector<8x32xf32>
    %c3 = arith.constant 3 : index
    %c0_12 = arith.constant 0 : index
    %c0_13 = arith.constant 0 : index
    %18 = vector.load %arg2[%c3, %c0_12, %c0_13] : memref<4x8x16xf32, #tpu.memory_space<vmem>>, vector<1x8x16xf32>
    %19 = vector.shape_cast %18 : vector<1x8x16xf32> to vector<8x16xf32>
    %20 = vector.extract_strided_slice %1 {offsets = [0, 3], sizes = [16, 32], strides = [1, 1]} : vector<16x35xf32> to vector<16x32xf32>
    %cst_14 = arith.constant dense<0.000000e+00> : vector<8x32xf32>
    %21 = tpu.matmul %19, %20, %cst_14 {dimension_numbers = #tpu.dot_dimension_numbers<[1], [0], [0], [1], [0, 0, 1, 1], [], []>} : vector<8x16xf32>, vector<16x32xf32>, vector<8x32xf32> -> vector<8x32xf32>
    %22 = arith.addf %17, %21 : vector<8x32xf32>
    %c0_15 = arith.constant 0 : index
    %c0_16 = arith.constant 0 : index
    %23 = vector.load %arg3[%c0_15, %c0_16] : memref<8x1xf32, #tpu.memory_space<vmem>>, vector<8x1xf32>
    %24 = vector.broadcast %23 : vector<8x1xf32> to vector<8x32xf32>
    %25 = arith.addf %22, %24 : vector<8x32xf32>
    %26 = vector.shape_cast %25 : vector<8x32xf32> to vector<1x8x32xf32>
    %cst_17 = arith.constant dense<0.000000e+00> : vector<1xf32>
    %27 = vector.multi_reduction <add>, %26, %cst_17 [1, 2] : vector<1x8x32xf32> to vector<1xf32>
    %28 = vector.shape_cast %27 : vector<1xf32> to vector<1x1x1xf32>
    %29 = vector.extract %28[0, 0, 0] : f32 from vector<1x1x1xf32>
    %30 = vector.broadcast %29 : f32 to vector<1x1xf32>
    %cst_18 = arith.constant 2.560000e+02 : f32
    %31 = vector.broadcast %cst_18 : f32 to vector<1x1xf32>
    %32 = arith.divf %30, %31 : vector<1x1xf32>
    %33 = vector.broadcast %32 : vector<1x1xf32> to vector<8x32xf32>
    %34 = arith.subf %25, %33 : vector<8x32xf32>
    %35 = arith.mulf %34, %34 : vector<8x32xf32>
    %36 = vector.shape_cast %35 : vector<8x32xf32> to vector<1x8x32xf32>
    %cst_19 = arith.constant dense<0.000000e+00> : vector<1xf32>
    %37 = vector.multi_reduction <add>, %36, %cst_19 [1, 2] : vector<1x8x32xf32> to vector<1xf32>
    %38 = vector.shape_cast %37 : vector<1xf32> to vector<1x1x1xf32>
    %39 = vector.extract %38[0, 0, 0] : f32 from vector<1x1x1xf32>
    %40 = vector.broadcast %39 : f32 to vector<1x1xf32>
    %cst_20 = arith.constant 2.560000e+02 : f32
    %41 = vector.broadcast %cst_20 : f32 to vector<1x1xf32>
    %42 = arith.divf %40, %41 : vector<1x1xf32>
    %43 = vector.broadcast %32 : vector<1x1xf32> to vector<8x32xf32>
    %44 = arith.subf %25, %43 : vector<8x32xf32>
    %cst_21 = arith.constant 9.99999974E-6 : f32
    %45 = vector.broadcast %cst_21 : f32 to vector<1x1xf32>
    %46 = arith.addf %42, %45 : vector<1x1xf32>
    %47 = math.rsqrt %46 : vector<1x1xf32>
    %48 = vector.broadcast %47 : vector<1x1xf32> to vector<8x32xf32>
    %49 = arith.mulf %44, %48 : vector<8x32xf32>
    %c0_22 = arith.constant 0 : index
    %c0_23 = arith.constant 0 : index
    %50 = vector.load %arg4[%c0_22, %c0_23] : memref<8x1xf32, #tpu.memory_space<vmem>>, vector<8x1xf32>
    %51 = vector.broadcast %50 : vector<8x1xf32> to vector<8x32xf32>
    %52 = arith.mulf %49, %51 : vector<8x32xf32>
    %c0_24 = arith.constant 0 : index
    %c0_25 = arith.constant 0 : index
    %53 = vector.load %arg5[%c0_24, %c0_25] : memref<8x1xf32, #tpu.memory_space<vmem>>, vector<8x1xf32>
    %54 = vector.broadcast %53 : vector<8x1xf32> to vector<8x32xf32>
    %55 = arith.addf %52, %54 : vector<8x32xf32>
    %56 = math.tanh %55 : vector<8x32xf32>
    %c0_26 = arith.constant 0 : index
    %c0_27 = arith.constant 0 : index
    %c0_28 = arith.constant 0 : index
    %57 = vector.load %arg6[%c0_26, %c0_27, %c0_28] : memref<1x8x32xf32, #tpu.memory_space<vmem>>, vector<1x8x32xf32>
    %58 = vector.shape_cast %57 : vector<1x8x32xf32> to vector<8x32xf32>
    %59 = vector.shape_cast %56 : vector<8x32xf32> to vector<1x8x32xf32>
    tpu.vector_store %arg6[%c0_26, %c0_27, %c0_28], %59 {strides = array<i32>} : memref<1x8x32xf32, #tpu.memory_space<vmem>>, vector<1x8x32xf32>,
    return
  }
  func.func @transform_0(%arg0: i32) -> (i32, i32, i32) {
    %c0_i32 = arith.constant 0 : i32
    %c0_i32_0 = arith.constant 0 : i32
    %c0_i32_1 = arith.constant 0 : i32
    return %arg0, %c0_i32, %c0_i32_0 : i32, i32, i32
  }
  func.func @transform_1(%arg0: i32) -> (i32, i32, i32) {
    %c0_i32 = arith.constant 0 : i32
    %c0_i32_0 = arith.constant 0 : i32
    %c0_i32_1 = arith.constant 0 : i32
    %c0_i32_2 = arith.constant 0 : i32
    return %c0_i32, %c0_i32_0, %c0_i32_1 : i32, i32, i32
  }
  func.func @transform_2(%arg0: i32) -> (i32, i32) {
    %c0_i32 = arith.constant 0 : i32
    %c0_i32_0 = arith.constant 0 : i32
    %c0_i32_1 = arith.constant 0 : i32
    return %c0_i32, %c0_i32_0 : i32, i32
  }
  func.func @transform_3(%arg0: i32) -> (i32, i32) {
    %c0_i32 = arith.constant 0 : i32
    %c0_i32_0 = arith.constant 0 : i32
    %c0_i32_1 = arith.constant 0 : i32
    return %c0_i32, %c0_i32_0 : i32, i32
  }
  func.func @transform_4(%arg0: i32) -> (i32, i32) {
    %c0_i32 = arith.constant 0 : i32
    %c0_i32_0 = arith.constant 0 : i32
    %c0_i32_1 = arith.constant 0 : i32
    return %c0_i32, %c0_i32_0 : i32, i32
  }
  func.func @transform_5(%arg0: i32) -> (i32, i32, i32) {
    %c0_i32 = arith.constant 0 : i32
    %c0_i32_0 = arith.constant 0 : i32
    %c0_i32_1 = arith.constant 0 : i32
    return %arg0, %c0_i32, %c0_i32_0 : i32, i32, i32
  }
}

module attributes {stable_mosaic.version = 11 : i64} {
  func.func @_conv_gn_tanh_kernel(%arg0: i32, %arg1: memref<1x8x67xf32, #tpu.memory_space<vmem>>, %arg2: memref<4x8x8xf32, #tpu.memory_space<vmem>>, %arg3: memref<8x1xf32, #tpu.memory_space<vmem>>, %arg4: memref<8x1xf32, #tpu.memory_space<vmem>>, %arg5: memref<8x1xf32, #tpu.memory_space<vmem>>, %arg6: memref<1x8x64xf32, #tpu.memory_space<vmem>>) attributes {dimension_semantics = [#tpu.dimension_semantics<parallel>], iteration_bounds = array<i64: 2>, scalar_prefetch = 0 : i64, scratch_operands = 0 : i64, tpu.core_type = #tpu.core_type<tc>, window_params = [{transform_indices = @transform_0, window_bounds = array<i64: 1, 8, 67>}, {pipeline_mode = #tpu.pipeline_mode<synchronous>, transform_indices = @transform_1, window_bounds = array<i64: 4, 8, 8>}, {pipeline_mode = #tpu.pipeline_mode<synchronous>, transform_indices = @transform_2, window_bounds = array<i64: 8, 1>}, {pipeline_mode = #tpu.pipeline_mode<synchronous>, transform_indices = @transform_3, window_bounds = array<i64: 8, 1>}, {pipeline_mode = #tpu.pipeline_mode<synchronous>, transform_indices = @transform_4, window_bounds = array<i64: 8, 1>}, {transform_indices = @transform_5, window_bounds = array<i64: 1, 8, 64>}]} {
    %c0 = arith.constant 0 : index
    %c0_0 = arith.constant 0 : index
    %c0_1 = arith.constant 0 : index
    %0 = vector.load %arg1[%c0, %c0_0, %c0_1] : memref<1x8x67xf32, #tpu.memory_space<vmem>>, vector<1x8x67xf32>
    %1 = vector.shape_cast %0 : vector<1x8x67xf32> to vector<8x67xf32>
    %cst = arith.constant 0.000000e+00 : f32
    %2 = vector.broadcast %cst : f32 to vector<8x64xf32>
    %c0_2 = arith.constant 0 : index
    %c0_3 = arith.constant 0 : index
    %c0_4 = arith.constant 0 : index
    %3 = vector.load %arg2[%c0_2, %c0_3, %c0_4] : memref<4x8x8xf32, #tpu.memory_space<vmem>>, vector<1x8x8xf32>
    %4 = vector.shape_cast %3 : vector<1x8x8xf32> to vector<8x8xf32>
    %5 = vector.extract_strided_slice %1 {offsets = [0, 0], sizes = [8, 64], strides = [1, 1]} : vector<8x67xf32> to vector<8x64xf32>
    %cst_5 = arith.constant dense<0.000000e+00> : vector<8x64xf32>
    %6 = tpu.matmul %4, %5, %cst_5 {dimension_numbers = #tpu.dot_dimension_numbers<[1], [0], [0], [1], [0, 0, 1, 1], [], []>} : vector<8x8xf32>, vector<8x64xf32>, vector<8x64xf32> -> vector<8x64xf32>
    %7 = arith.addf %2, %6 : vector<8x64xf32>
    %c1 = arith.constant 1 : index
    %c0_6 = arith.constant 0 : index
    %c0_7 = arith.constant 0 : index
    %8 = vector.load %arg2[%c1, %c0_6, %c0_7] : memref<4x8x8xf32, #tpu.memory_space<vmem>>, vector<1x8x8xf32>
    %9 = vector.shape_cast %8 : vector<1x8x8xf32> to vector<8x8xf32>
    %10 = vector.extract_strided_slice %1 {offsets = [0, 1], sizes = [8, 64], strides = [1, 1]} : vector<8x67xf32> to vector<8x64xf32>
    %cst_8 = arith.constant dense<0.000000e+00> : vector<8x64xf32>
    %11 = tpu.matmul %9, %10, %cst_8 {dimension_numbers = #tpu.dot_dimension_numbers<[1], [0], [0], [1], [0, 0, 1, 1], [], []>} : vector<8x8xf32>, vector<8x64xf32>, vector<8x64xf32> -> vector<8x64xf32>
    %12 = arith.addf %7, %11 : vector<8x64xf32>
    %c2 = arith.constant 2 : index
    %c0_9 = arith.constant 0 : index
    %c0_10 = arith.constant 0 : index
    %13 = vector.load %arg2[%c2, %c0_9, %c0_10] : memref<4x8x8xf32, #tpu.memory_space<vmem>>, vector<1x8x8xf32>
    %14 = vector.shape_cast %13 : vector<1x8x8xf32> to vector<8x8xf32>
    %15 = vector.extract_strided_slice %1 {offsets = [0, 2], sizes = [8, 64], strides = [1, 1]} : vector<8x67xf32> to vector<8x64xf32>
    %cst_11 = arith.constant dense<0.000000e+00> : vector<8x64xf32>
    %16 = tpu.matmul %14, %15, %cst_11 {dimension_numbers = #tpu.dot_dimension_numbers<[1], [0], [0], [1], [0, 0, 1, 1], [], []>} : vector<8x8xf32>, vector<8x64xf32>, vector<8x64xf32> -> vector<8x64xf32>
    %17 = arith.addf %12, %16 : vector<8x64xf32>
    %c3 = arith.constant 3 : index
    %c0_12 = arith.constant 0 : index
    %c0_13 = arith.constant 0 : index
    %18 = vector.load %arg2[%c3, %c0_12, %c0_13] : memref<4x8x8xf32, #tpu.memory_space<vmem>>, vector<1x8x8xf32>
    %19 = vector.shape_cast %18 : vector<1x8x8xf32> to vector<8x8xf32>
    %20 = vector.extract_strided_slice %1 {offsets = [0, 3], sizes = [8, 64], strides = [1, 1]} : vector<8x67xf32> to vector<8x64xf32>
    %cst_14 = arith.constant dense<0.000000e+00> : vector<8x64xf32>
    %21 = tpu.matmul %19, %20, %cst_14 {dimension_numbers = #tpu.dot_dimension_numbers<[1], [0], [0], [1], [0, 0, 1, 1], [], []>} : vector<8x8xf32>, vector<8x64xf32>, vector<8x64xf32> -> vector<8x64xf32>
    %22 = arith.addf %17, %21 : vector<8x64xf32>
    %c0_15 = arith.constant 0 : index
    %c0_16 = arith.constant 0 : index
    %23 = vector.load %arg3[%c0_15, %c0_16] : memref<8x1xf32, #tpu.memory_space<vmem>>, vector<8x1xf32>
    %24 = vector.broadcast %23 : vector<8x1xf32> to vector<8x64xf32>
    %25 = arith.addf %22, %24 : vector<8x64xf32>
    %26 = vector.shape_cast %25 : vector<8x64xf32> to vector<1x8x64xf32>
    %cst_17 = arith.constant dense<0.000000e+00> : vector<1xf32>
    %27 = vector.multi_reduction <add>, %26, %cst_17 [1, 2] : vector<1x8x64xf32> to vector<1xf32>
    %28 = vector.shape_cast %27 : vector<1xf32> to vector<1x1x1xf32>
    %29 = vector.extract %28[0, 0, 0] : f32 from vector<1x1x1xf32>
    %30 = vector.broadcast %29 : f32 to vector<1x1xf32>
    %cst_18 = arith.constant 5.120000e+02 : f32
    %31 = vector.broadcast %cst_18 : f32 to vector<1x1xf32>
    %32 = arith.divf %30, %31 : vector<1x1xf32>
    %33 = vector.broadcast %32 : vector<1x1xf32> to vector<8x64xf32>
    %34 = arith.subf %25, %33 : vector<8x64xf32>
    %35 = arith.mulf %34, %34 : vector<8x64xf32>
    %36 = vector.shape_cast %35 : vector<8x64xf32> to vector<1x8x64xf32>
    %cst_19 = arith.constant dense<0.000000e+00> : vector<1xf32>
    %37 = vector.multi_reduction <add>, %36, %cst_19 [1, 2] : vector<1x8x64xf32> to vector<1xf32>
    %38 = vector.shape_cast %37 : vector<1xf32> to vector<1x1x1xf32>
    %39 = vector.extract %38[0, 0, 0] : f32 from vector<1x1x1xf32>
    %40 = vector.broadcast %39 : f32 to vector<1x1xf32>
    %cst_20 = arith.constant 5.120000e+02 : f32
    %41 = vector.broadcast %cst_20 : f32 to vector<1x1xf32>
    %42 = arith.divf %40, %41 : vector<1x1xf32>
    %43 = vector.broadcast %32 : vector<1x1xf32> to vector<8x64xf32>
    %44 = arith.subf %25, %43 : vector<8x64xf32>
    %cst_21 = arith.constant 9.99999974E-6 : f32
    %45 = vector.broadcast %cst_21 : f32 to vector<1x1xf32>
    %46 = arith.addf %42, %45 : vector<1x1xf32>
    %47 = math.rsqrt %46 : vector<1x1xf32>
    %48 = vector.broadcast %47 : vector<1x1xf32> to vector<8x64xf32>
    %49 = arith.mulf %44, %48 : vector<8x64xf32>
    %c0_22 = arith.constant 0 : index
    %c0_23 = arith.constant 0 : index
    %50 = vector.load %arg4[%c0_22, %c0_23] : memref<8x1xf32, #tpu.memory_space<vmem>>, vector<8x1xf32>
    %51 = vector.broadcast %50 : vector<8x1xf32> to vector<8x64xf32>
    %52 = arith.mulf %49, %51 : vector<8x64xf32>
    %c0_24 = arith.constant 0 : index
    %c0_25 = arith.constant 0 : index
    %53 = vector.load %arg5[%c0_24, %c0_25] : memref<8x1xf32, #tpu.memory_space<vmem>>, vector<8x1xf32>
    %54 = vector.broadcast %53 : vector<8x1xf32> to vector<8x64xf32>
    %55 = arith.addf %52, %54 : vector<8x64xf32>
    %56 = math.tanh %55 : vector<8x64xf32>
    %c0_26 = arith.constant 0 : index
    %c0_27 = arith.constant 0 : index
    %c0_28 = arith.constant 0 : index
    %57 = vector.load %arg6[%c0_26, %c0_27, %c0_28] : memref<1x8x64xf32, #tpu.memory_space<vmem>>, vector<1x8x64xf32>
    %58 = vector.shape_cast %57 : vector<1x8x64xf32> to vector<8x64xf32>
    %59 = vector.shape_cast %56 : vector<8x64xf32> to vector<1x8x64xf32>
    tpu.vector_store %arg6[%c0_26, %c0_27, %c0_28], %59 {strides = array<i32>} : memref<1x8x64xf32, #tpu.memory_space<vmem>>, vector<1x8x64xf32>,
    return
  }
  func.func @transform_0(%arg0: i32) -> (i32, i32, i32) {
    %c0_i32 = arith.constant 0 : i32
    %c0_i32_0 = arith.constant 0 : i32
    %c0_i32_1 = arith.constant 0 : i32
    return %arg0, %c0_i32, %c0_i32_0 : i32, i32, i32
  }
  func.func @transform_1(%arg0: i32) -> (i32, i32, i32) {
    %c0_i32 = arith.constant 0 : i32
    %c0_i32_0 = arith.constant 0 : i32
    %c0_i32_1 = arith.constant 0 : i32
    %c0_i32_2 = arith.constant 0 : i32
    return %c0_i32, %c0_i32_0, %c0_i32_1 : i32, i32, i32
  }
  func.func @transform_2(%arg0: i32) -> (i32, i32) {
    %c0_i32 = arith.constant 0 : i32
    %c0_i32_0 = arith.constant 0 : i32
    %c0_i32_1 = arith.constant 0 : i32
    return %c0_i32, %c0_i32_0 : i32, i32
  }
  func.func @transform_3(%arg0: i32) -> (i32, i32) {
    %c0_i32 = arith.constant 0 : i32
    %c0_i32_0 = arith.constant 0 : i32
    %c0_i32_1 = arith.constant 0 : i32
    return %c0_i32, %c0_i32_0 : i32, i32
  }
  func.func @transform_4(%arg0: i32) -> (i32, i32) {
    %c0_i32 = arith.constant 0 : i32
    %c0_i32_0 = arith.constant 0 : i32
    %c0_i32_1 = arith.constant 0 : i32
    return %c0_i32, %c0_i32_0 : i32, i32
  }
  func.func @transform_5(%arg0: i32) -> (i32, i32, i32) {
    %c0_i32 = arith.constant 0 : i32
    %c0_i32_0 = arith.constant 0 : i32
    %c0_i32_1 = arith.constant 0 : i32
    return %arg0, %c0_i32, %c0_i32_0 : i32, i32, i32
  }
}

module attributes {stable_mosaic.version = 11 : i64} {
  func.func @_gru_bidir_kernel(%arg0: i32, %arg1: memref<1x64x8xf32, #tpu.memory_space<vmem>>, %arg2: memref<8x24xf32, #tpu.memory_space<vmem>>, %arg3: memref<8x24xf32, #tpu.memory_space<vmem>>, %arg4: memref<1x24xf32, #tpu.memory_space<vmem>>, %arg5: memref<1x24xf32, #tpu.memory_space<vmem>>, %arg6: memref<8x24xf32, #tpu.memory_space<vmem>>, %arg7: memref<8x24xf32, #tpu.memory_space<vmem>>, %arg8: memref<1x24xf32, #tpu.memory_space<vmem>>, %arg9: memref<1x24xf32, #tpu.memory_space<vmem>>, %arg10: memref<16x1xf32, #tpu.memory_space<vmem>>, %arg11: memref<1x1xf32, #tpu.memory_space<vmem>>, %arg12: memref<1x64x1xf32, #tpu.memory_space<vmem>>, %arg13: memref<64x24xf32, #tpu.memory_space<vmem>>, %arg14: memref<64x24xf32, #tpu.memory_space<vmem>>, %arg15: memref<64x16xf32, #tpu.memory_space<vmem>>) attributes {dimension_semantics = [#tpu.dimension_semantics<parallel>], iteration_bounds = array<i64: 2>, scalar_prefetch = 0 : i64, scratch_operands = 3 : i64, tpu.core_type = #tpu.core_type<tc>, window_params = [{transform_indices = @transform_0, window_bounds = array<i64: 1, 64, 8>}, {pipeline_mode = #tpu.pipeline_mode<synchronous>, transform_indices = @transform_1, window_bounds = array<i64: 8, 24>}, {pipeline_mode = #tpu.pipeline_mode<synchronous>, transform_indices = @transform_2, window_bounds = array<i64: 8, 24>}, {pipeline_mode = #tpu.pipeline_mode<synchronous>, transform_indices = @transform_3, window_bounds = array<i64: 1, 24>}, {pipeline_mode = #tpu.pipeline_mode<synchronous>, transform_indices = @transform_4, window_bounds = array<i64: 1, 24>}, {pipeline_mode = #tpu.pipeline_mode<synchronous>, transform_indices = @transform_5, window_bounds = array<i64: 8, 24>}, {pipeline_mode = #tpu.pipeline_mode<synchronous>, transform_indices = @transform_6, window_bounds = array<i64: 8, 24>}, {pipeline_mode = #tpu.pipeline_mode<synchronous>, transform_indices = @transform_7, window_bounds = array<i64: 1, 24>}, {pipeline_mode = #tpu.pipeline_mode<synchronous>, transform_indices = @transform_8, window_bounds = array<i64: 1, 24>}, {pipeline_mode = #tpu.pipeline_mode<synchronous>, transform_indices = @transform_9, window_bounds = array<i64: 16, 1>}, {pipeline_mode = #tpu.pipeline_mode<synchronous>, transform_indices = @transform_10, window_bounds = array<i64: 1, 1>}, {transform_indices = @transform_11, window_bounds = array<i64: 1, 64, 1>}]} {
    %c0 = arith.constant 0 : index
    %c0_0 = arith.constant 0 : index
    %c0_1 = arith.constant 0 : index
    %0 = vector.load %arg1[%c0, %c0_0, %c0_1] : memref<1x64x8xf32, #tpu.memory_space<vmem>>, vector<1x64x8xf32>
    %1 = vector.shape_cast %0 : vector<1x64x8xf32> to vector<64x8xf32>
    %c0_2 = arith.constant 0 : index
    %c0_3 = arith.constant 0 : index
    %2 = vector.load %arg2[%c0_2, %c0_3] : memref<8x24xf32, #tpu.memory_space<vmem>>, vector<8x24xf32>
    %cst = arith.constant dense<0.000000e+00> : vector<64x24xf32>
    %3 = tpu.matmul %1, %2, %cst {dimension_numbers = #tpu.dot_dimension_numbers<[1], [0], [0], [1], [0, 0, 1, 1], [], []>} : vector<64x8xf32>, vector<8x24xf32>, vector<64x24xf32> -> vector<64x24xf32>
    %c0_4 = arith.constant 0 : index
    %c0_5 = arith.constant 0 : index
    %4 = vector.load %arg4[%c0_4, %c0_5] : memref<1x24xf32, #tpu.memory_space<vmem>>, vector<1x24xf32>
    %5 = vector.broadcast %4 : vector<1x24xf32> to vector<64x24xf32>
    %6 = arith.addf %3, %5 : vector<64x24xf32>
    %c0_6 = arith.constant 0 : index
    %c0_7 = arith.constant 0 : index
    %7 = vector.load %arg13[%c0_6, %c0_7] : memref<64x24xf32, #tpu.memory_space<vmem>>, vector<64x24xf32>
    tpu.vector_store %arg13[%c0_6, %c0_7], %6 {strides = array<i32>} : memref<64x24xf32, #tpu.memory_space<vmem>>, vector<64x24xf32>,
    %c0_8 = arith.constant 0 : index
    %c0_9 = arith.constant 0 : index
    %8 = vector.load %arg6[%c0_8, %c0_9] : memref<8x24xf32, #tpu.memory_space<vmem>>, vector<8x24xf32>
    %cst_10 = arith.constant dense<0.000000e+00> : vector<64x24xf32>
    %9 = tpu.matmul %1, %8, %cst_10 {dimension_numbers = #tpu.dot_dimension_numbers<[1], [0], [0], [1], [0, 0, 1, 1], [], []>} : vector<64x8xf32>, vector<8x24xf32>, vector<64x24xf32> -> vector<64x24xf32>
    %c0_11 = arith.constant 0 : index
    %c0_12 = arith.constant 0 : index
    %10 = vector.load %arg8[%c0_11, %c0_12] : memref<1x24xf32, #tpu.memory_space<vmem>>, vector<1x24xf32>
    %11 = vector.broadcast %10 : vector<1x24xf32> to vector<64x24xf32>
    %12 = arith.addf %9, %11 : vector<64x24xf32>
    %c0_13 = arith.constant 0 : index
    %c0_14 = arith.constant 0 : index
    %13 = vector.load %arg14[%c0_13, %c0_14] : memref<64x24xf32, #tpu.memory_space<vmem>>, vector<64x24xf32>
    tpu.vector_store %arg14[%c0_13, %c0_14], %12 {strides = array<i32>} : memref<64x24xf32, #tpu.memory_space<vmem>>, vector<64x24xf32>,
    %c0_15 = arith.constant 0 : index
    %c0_16 = arith.constant 0 : index
    %14 = vector.load %arg3[%c0_15, %c0_16] : memref<8x24xf32, #tpu.memory_space<vmem>>, vector<8x24xf32>
    %c0_17 = arith.constant 0 : index
    %c0_18 = arith.constant 0 : index
    %15 = vector.load %arg5[%c0_17, %c0_18] : memref<1x24xf32, #tpu.memory_space<vmem>>, vector<1x24xf32>
    %c0_19 = arith.constant 0 : index
    %c0_20 = arith.constant 0 : index
    %16 = vector.load %arg7[%c0_19, %c0_20] : memref<8x24xf32, #tpu.memory_space<vmem>>, vector<8x24xf32>
    %c0_21 = arith.constant 0 : index
    %c0_22 = arith.constant 0 : index
    %17 = vector.load %arg9[%c0_21, %c0_22] : memref<1x24xf32, #tpu.memory_space<vmem>>, vector<1x24xf32>
    %cst_23 = arith.constant 0.000000e+00 : f32
    %18 = vector.broadcast %cst_23 : f32 to vector<1x8xf32>
    %c0_i32 = arith.constant 0 : i32
    %c64_i32 = arith.constant 64 : i32
    %19 = arith.addi %c0_i32, %c64_i32 : i32
    %c1_i32 = arith.constant 1 : i32
    %20:2 = scf.for %arg16 = %c0_i32 to %19 step %c1_i32 iter_args(%arg17 = %18, %arg18 = %18) -> (vector<1x8xf32>, vector<1x8xf32>)  : i32 {
      %c63_i32 = arith.constant 63 : i32
      %30 = arith.subi %c63_i32, %arg16 : i32
      %31 = arith.index_cast %arg16 : i32 to index
      %c0_35 = arith.constant 0 : index
      %32 = vector.load %arg13[%31, %c0_35] : memref<64x24xf32, #tpu.memory_space<vmem>>, vector<1x24xf32>
      %cst_36 = arith.constant dense<0.000000e+00> : vector<1x24xf32>
      %33 = tpu.matmul %arg17, %14, %cst_36 {dimension_numbers = #tpu.dot_dimension_numbers<[1], [0], [0], [1], [0, 0, 1, 1], [], []>} : vector<1x8xf32>, vector<8x24xf32>, vector<1x24xf32> -> vector<1x24xf32>
      %34 = arith.addf %33, %15 : vector<1x24xf32>
      %35 = vector.extract_strided_slice %32 {offsets = [0, 0], sizes = [1, 8], strides = [1, 1]} : vector<1x24xf32> to vector<1x8xf32>
      %36 = vector.extract_strided_slice %34 {offsets = [0, 0], sizes = [1, 8], strides = [1, 1]} : vector<1x24xf32> to vector<1x8xf32>
      %37 = arith.addf %35, %36 : vector<1x8xf32>
      %38 = arith.negf %37 : vector<1x8xf32>
      %39 = math.exp %38 : vector<1x8xf32>
      %cst_37 = arith.constant 1.000000e+00 : f32
      %40 = vector.broadcast %cst_37 : f32 to vector<1x8xf32>
      %41 = arith.addf %40, %39 : vector<1x8xf32>
      %42 = arith.divf %40, %41 : vector<1x8xf32>
      %43 = vector.extract_strided_slice %32 {offsets = [0, 8], sizes = [1, 8], strides = [1, 1]} : vector<1x24xf32> to vector<1x8xf32>
      %44 = vector.extract_strided_slice %34 {offsets = [0, 8], sizes = [1, 8], strides = [1, 1]} : vector<1x24xf32> to vector<1x8xf32>
      %45 = arith.addf %43, %44 : vector<1x8xf32>
      %46 = arith.negf %45 : vector<1x8xf32>
      %47 = math.exp %46 : vector<1x8xf32>
      %cst_38 = arith.constant 1.000000e+00 : f32
      %48 = vector.broadcast %cst_38 : f32 to vector<1x8xf32>
      %49 = arith.addf %48, %47 : vector<1x8xf32>
      %50 = arith.divf %48, %49 : vector<1x8xf32>
      %51 = vector.extract_strided_slice %32 {offsets = [0, 16], sizes = [1, 8], strides = [1, 1]} : vector<1x24xf32> to vector<1x8xf32>
      %52 = vector.extract_strided_slice %34 {offsets = [0, 16], sizes = [1, 8], strides = [1, 1]} : vector<1x24xf32> to vector<1x8xf32>
      %53 = arith.mulf %42, %52 : vector<1x8xf32>
      %54 = arith.addf %51, %53 : vector<1x8xf32>
      %55 = math.tanh %54 : vector<1x8xf32>
      %cst_39 = arith.constant 1.000000e+00 : f32
      %56 = vector.broadcast %cst_39 : f32 to vector<1x8xf32>
      %57 = arith.subf %56, %50 : vector<1x8xf32>
      %58 = arith.mulf %57, %55 : vector<1x8xf32>
      %59 = arith.mulf %50, %arg17 : vector<1x8xf32>
      %60 = arith.addf %58, %59 : vector<1x8xf32>
      %61 = arith.index_cast %30 : i32 to index
      %c0_40 = arith.constant 0 : index
      %62 = vector.load %arg14[%61, %c0_40] : memref<64x24xf32, #tpu.memory_space<vmem>>, vector<1x24xf32>
      %cst_41 = arith.constant dense<0.000000e+00> : vector<1x24xf32>
      %63 = tpu.matmul %arg18, %16, %cst_41 {dimension_numbers = #tpu.dot_dimension_numbers<[1], [0], [0], [1], [0, 0, 1, 1], [], []>} : vector<1x8xf32>, vector<8x24xf32>, vector<1x24xf32> -> vector<1x24xf32>
      %64 = arith.addf %63, %17 : vector<1x24xf32>
      %65 = vector.extract_strided_slice %62 {offsets = [0, 0], sizes = [1, 8], strides = [1, 1]} : vector<1x24xf32> to vector<1x8xf32>
      %66 = vector.extract_strided_slice %64 {offsets = [0, 0], sizes = [1, 8], strides = [1, 1]} : vector<1x24xf32> to vector<1x8xf32>
      %67 = arith.addf %65, %66 : vector<1x8xf32>
      %68 = arith.negf %67 : vector<1x8xf32>
      %69 = math.exp %68 : vector<1x8xf32>
      %cst_42 = arith.constant 1.000000e+00 : f32
      %70 = vector.broadcast %cst_42 : f32 to vector<1x8xf32>
      %71 = arith.addf %70, %69 : vector<1x8xf32>
      %72 = arith.divf %70, %71 : vector<1x8xf32>
      %73 = vector.extract_strided_slice %62 {offsets = [0, 8], sizes = [1, 8], strides = [1, 1]} : vector<1x24xf32> to vector<1x8xf32>
      %74 = vector.extract_strided_slice %64 {offsets = [0, 8], sizes = [1, 8], strides = [1, 1]} : vector<1x24xf32> to vector<1x8xf32>
      %75 = arith.addf %73, %74 : vector<1x8xf32>
      %76 = arith.negf %75 : vector<1x8xf32>
      %77 = math.exp %76 : vector<1x8xf32>
      %cst_43 = arith.constant 1.000000e+00 : f32
      %78 = vector.broadcast %cst_43 : f32 to vector<1x8xf32>
      %79 = arith.addf %78, %77 : vector<1x8xf32>
      %80 = arith.divf %78, %79 : vector<1x8xf32>
      %81 = vector.extract_strided_slice %62 {offsets = [0, 16], sizes = [1, 8], strides = [1, 1]} : vector<1x24xf32> to vector<1x8xf32>
      %82 = vector.extract_strided_slice %64 {offsets = [0, 16], sizes = [1, 8], strides = [1, 1]} : vector<1x24xf32> to vector<1x8xf32>
      %83 = arith.mulf %72, %82 : vector<1x8xf32>
      %84 = arith.addf %81, %83 : vector<1x8xf32>
      %85 = math.tanh %84 : vector<1x8xf32>
      %cst_44 = arith.constant 1.000000e+00 : f32
      %86 = vector.broadcast %cst_44 : f32 to vector<1x8xf32>
      %87 = arith.subf %86, %80 : vector<1x8xf32>
      %88 = arith.mulf %87, %85 : vector<1x8xf32>
      %89 = arith.mulf %80, %arg18 : vector<1x8xf32>
      %90 = arith.addf %88, %89 : vector<1x8xf32>
      %91 = arith.index_cast %arg16 : i32 to index
      %c0_45 = arith.constant 0 : index
      %92 = vector.load %arg15[%91, %c0_45] : memref<64x16xf32, #tpu.memory_space<vmem>>, vector<1x8xf32>
      tpu.vector_store %arg15[%91, %c0_45], %60 {strides = array<i32>} : memref<64x16xf32, #tpu.memory_space<vmem>>, vector<1x8xf32>,
      %93 = arith.index_cast %30 : i32 to index
      %c8 = arith.constant 8 : index
      %94 = vector.load %arg15[%93, %c8] : memref<64x16xf32, #tpu.memory_space<vmem>>, vector<1x8xf32>
      tpu.vector_store %arg15[%93, %c8], %90 {strides = array<i32>} : memref<64x16xf32, #tpu.memory_space<vmem>>, vector<1x8xf32>,
      scf.yield %60, %90 : vector<1x8xf32>, vector<1x8xf32>
    }
    %c64_i32_24 = arith.constant 64 : i32
    %c0_25 = arith.constant 0 : index
    %c0_26 = arith.constant 0 : index
    %21 = vector.load %arg15[%c0_25, %c0_26] : memref<64x16xf32, #tpu.memory_space<vmem>>, vector<64x16xf32>
    %c0_27 = arith.constant 0 : index
    %c0_28 = arith.constant 0 : index
    %22 = vector.load %arg10[%c0_27, %c0_28] : memref<16x1xf32, #tpu.memory_space<vmem>>, vector<16x1xf32>
    %cst_29 = arith.constant dense<0.000000e+00> : vector<64x1xf32>
    %23 = tpu.matmul %21, %22, %cst_29 {dimension_numbers = #tpu.dot_dimension_numbers<[1], [0], [0], [1], [0, 0, 1, 1], [], []>} : vector<64x16xf32>, vector<16x1xf32>, vector<64x1xf32> -> vector<64x1xf32>
    %c0_30 = arith.constant 0 : index
    %c0_31 = arith.constant 0 : index
    %24 = vector.load %arg11[%c0_30, %c0_31] : memref<1x1xf32, #tpu.memory_space<vmem>>, vector<1x1xf32>
    %25 = vector.broadcast %24 : vector<1x1xf32> to vector<64x1xf32>
    %26 = arith.addf %23, %25 : vector<64x1xf32>
    %c0_32 = arith.constant 0 : index
    %c0_33 = arith.constant 0 : index
    %c0_34 = arith.constant 0 : index
    %27 = vector.load %arg12[%c0_32, %c0_33, %c0_34] : memref<1x64x1xf32, #tpu.memory_space<vmem>>, vector<1x64x1xf32>
    %28 = vector.shape_cast %27 : vector<1x64x1xf32> to vector<64x1xf32>
    %29 = vector.shape_cast %26 : vector<64x1xf32> to vector<1x64x1xf32>
    tpu.vector_store %arg12[%c0_32, %c0_33, %c0_34], %29 {strides = array<i32>} : memref<1x64x1xf32, #tpu.memory_space<vmem>>, vector<1x64x1xf32>,
    return
  }
  func.func @transform_0(%arg0: i32) -> (i32, i32, i32) {
    %c0_i32 = arith.constant 0 : i32
    %c0_i32_0 = arith.constant 0 : i32
    %c0_i32_1 = arith.constant 0 : i32
    return %arg0, %c0_i32, %c0_i32_0 : i32, i32, i32
  }
  func.func @transform_1(%arg0: i32) -> (i32, i32) {
    %c0_i32 = arith.constant 0 : i32
    %c0_i32_0 = arith.constant 0 : i32
    %c0_i32_1 = arith.constant 0 : i32
    return %c0_i32, %c0_i32_0 : i32, i32
  }
  func.func @transform_2(%arg0: i32) -> (i32, i32) {
    %c0_i32 = arith.constant 0 : i32
    %c0_i32_0 = arith.constant 0 : i32
    %c0_i32_1 = arith.constant 0 : i32
    return %c0_i32, %c0_i32_0 : i32, i32
  }
  func.func @transform_3(%arg0: i32) -> (i32, i32) {
    %c0_i32 = arith.constant 0 : i32
    %c0_i32_0 = arith.constant 0 : i32
    %c0_i32_1 = arith.constant 0 : i32
    return %c0_i32, %c0_i32_0 : i32, i32
  }
  func.func @transform_4(%arg0: i32) -> (i32, i32) {
    %c0_i32 = arith.constant 0 : i32
    %c0_i32_0 = arith.constant 0 : i32
    %c0_i32_1 = arith.constant 0 : i32
    return %c0_i32, %c0_i32_0 : i32, i32
  }
  func.func @transform_5(%arg0: i32) -> (i32, i32) {
    %c0_i32 = arith.constant 0 : i32
    %c0_i32_0 = arith.constant 0 : i32
    %c0_i32_1 = arith.constant 0 : i32
    return %c0_i32, %c0_i32_0 : i32, i32
  }
  func.func @transform_6(%arg0: i32) -> (i32, i32) {
    %c0_i32 = arith.constant 0 : i32
    %c0_i32_0 = arith.constant 0 : i32
    %c0_i32_1 = arith.constant 0 : i32
    return %c0_i32, %c0_i32_0 : i32, i32
  }
  func.func @transform_7(%arg0: i32) -> (i32, i32) {
    %c0_i32 = arith.constant 0 : i32
    %c0_i32_0 = arith.constant 0 : i32
    %c0_i32_1 = arith.constant 0 : i32
    return %c0_i32, %c0_i32_0 : i32, i32
  }
  func.func @transform_8(%arg0: i32) -> (i32, i32) {
    %c0_i32 = arith.constant 0 : i32
    %c0_i32_0 = arith.constant 0 : i32
    %c0_i32_1 = arith.constant 0 : i32
    return %c0_i32, %c0_i32_0 : i32, i32
  }
  func.func @transform_9(%arg0: i32) -> (i32, i32) {
    %c0_i32 = arith.constant 0 : i32
    %c0_i32_0 = arith.constant 0 : i32
    %c0_i32_1 = arith.constant 0 : i32
    return %c0_i32, %c0_i32_0 : i32, i32
  }
  func.func @transform_10(%arg0: i32) -> (i32, i32) {
    %c0_i32 = arith.constant 0 : i32
    %c0_i32_0 = arith.constant 0 : i32
    %c0_i32_1 = arith.constant 0 : i32
    return %c0_i32, %c0_i32_0 : i32, i32
  }
  func.func @transform_11(%arg0: i32) -> (i32, i32, i32) {
    %c0_i32 = arith.constant 0 : i32
    %c0_i32_0 = arith.constant 0 : i32
    %c0_i32_1 = arith.constant 0 : i32
    return %arg0, %c0_i32, %c0_i32_0 : i32, i32, i32
  }
}

</mosaic_0001>

<bundles_post_ra>
// kernel: forward.14
= control target key start
LH: loop header
LB: loop body
LE: loop exit
PB: predicated region body
PF: predicated region fallthrough
CT: control target
= control target key end

     0   :  { %s604_s18 = smov 0   ;;  %s673_s0 = inlined_call_operand.vmem [shape: f32[2,24,18], index: 0, kind: input, shape index: {}]   ;;  %s674_s1 = inlined_call_operand.vmem [shape: f32[3,16,24], index: 1, kind: input, shape index: {}]   ;;  %s675_s2 = inlined_call_operand.vmem [shape: f32[16,1], index: 2, kind: input, shape index: {}]   ;;  %s676_s3 = inlined_call_operand.vmem [shape: f32[16,1], index: 3, kind: input, shape index: {}]   ;;  %s677_s4 = inlined_call_operand.vmem [shape: f32[16,1], index: 4, kind: input, shape index: {}]   ;;  %s678_s5 = inlined_call_operand.vmem [shape: f32[2,16,16], index: 5, kind: output, shape index: {}]  }
   0x1 LB: > { %s501_s19 = sadd.s32 4294967295, %s568_s18   ;;  %p505_p0 = scmp.ge.s32.totalorder %s568_s18, 1  ;;  %s568_s18 = sphi %s604_s18, %s15_s18  }
   0x2   : > { %p187_p1 = scmp.lt.s32.totalorder %s568_s18, 3 }
   0x4   : > { %p188_p2 = pnand %p505_p0, %p187_p1 }
   0x5   : > { %p215_p3 = scmp.lt.s32.totalorder (!%p188_p2), %s501_s19, 1  ;;  %s570_s24 = smov (!%p188_p2), 126  }
   0x6   : > { %191 = sbr.rel (%p188_p2) target bundleno = 693 (0x2b5), region = 40  ;;  %s571_s25 = smov (!%p188_p2), 127  }
   0xb   : > { %s680_s19 = smov (!%p215_p3, %s501_s19), 1  ;;  %vm245_vm0 = vcmask 195584   ;;  %v347_v4 = vld [vmem:[%s675_s2] sm:$0xff]  ;;  %v572_v6 = vmov 0   ;;  %v348_v7 = vld [vmem:[%s675_s2 + $0x8] sm:$0xff]  ;;  %v509_v18 = vld [vmem:[%s674_s1 + $0x10] sm:$0xff] }
   0xc   : > { %s525_s20 = smul.u32 24, %s680_s19  ;;  %v228_v5 = vld [vmem:[%s674_s1] sm:$0xff]  ;;  %552 = vset.pattern.permute.xlu2 %v572_v6  ;;  %553 = vset.pattern.permute.xlu0 %v572_v6  ;;  %v229_v8 = vld [vmem:[%s674_s1 + $0x8] sm:$0xff]  ;;  %v510_v21 = vld [vmem:[%s674_s1 + $0x18] sm:$0xff]  ;;  %vm361_vm1 = vcmask 130048   ;;  %v573_v49 = vmov 256.0  }
   0xd   : > { %351 = vperm.xlu2 %552, %v347_v4   ;;  %v414_v9 = vld [vmem:[%s676_s3] sm:$0xff]  ;;  %v415_v15 = vld [vmem:[%s676_s3 + $0x8] sm:$0xff]  ;;  %554 = vrcp.f32 %v573_v49  ;;  %s521_s29 = sshll.u32 %s680_s19, 4 }
   0xe   : > { %s219_s23 = scalar_lea.vmem %s673_s0, %s525_s20  ;;  %v515_v17 = vld [vmem:[%s674_s1 + $0x20] sm:$0xff]  ;;  %v516_v23 = vld [vmem:[%s674_s1 + $0x28] sm:$0xff]  ;;  %s224_s7 = scalar_lea.vmem %s678_s5, %s521_s29 }
   0xf   : > { %v226_v0 = vld [vmem:[%s219_s23 + $0x8] sm:$0xff]  ;;  %v227_v1 = vld [vmem:[%s219_s23 + $0x10] sm:$0xff]  ;;  %v225_v3 = vld [vmem:[%s219_s23] sm:$0xff] }
  0x10   : > { %v542_v2 = vpack.i.bf16 %v226_v0, %v227_v1  ;;  %294 = vmatpush.msra.mxu1 %v227_v1  ;;  %v428_v22 = vld [vmem:[%s677_s4] sm:$0xff]  ;;  %v429_v24 = vld [vmem:[%s677_s4 + $0x8] sm:$0xff] }
  0x12   : > { %543 = vrot.lane.b32.xlu0 %v542_v2, %s570_s24  ;;  %548 = vrot.lane.b32.xlu1 %v542_v2, %s571_s25 }
  0x13   : > { %295 = vmatpush.msra.mxu1 %v226_v0  ;;  %v555_v50 = vpop.eup %554 }
  0x14   : > { %v376_v51 = vmul.f32 256.0, %v555_v50  ;;  %vm380_vm2 = vweird.f32 %v555_v50 }
  0x15   : > { %296 = vmatpush.msra.mxu1 %v225_v3  ;;  %356 = vperm.xlu2 %552, %v348_v7  }
  0x16   : > { %513 = vmatmul.msk.f32.vlgmr.msra.gmra.mxu1 %vm245_vm0, %v228_v5  ;;  %v377_v52 = vsub.f32 1.0, %v376_v51 }
  0x18   : > { %v378_v53 = vmul.f32 %v555_v50, %v377_v52 }
  0x1a   : > { %307 = vrot.lane.b32.xlu0 %v225_v3, %s570_s24  ;;  %236 = vrot.lane.b32.xlu1 %v225_v3, %s571_s25  ;;  %v379_v54 = vadd.f32 %v555_v50, %v378_v53 }
  0x1c   : > { %v381_v55 = vsel %vm380_vm2, %v555_v50, %v379_v54 }
  0x1d   : > { %418 = vperm.xlu2 %552, %v414_v9  }
  0x1e   : > { %514 = vmatmul.msk.f32.gmra.mxu1 %vm245_vm0, %v229_v8 }
  0x25   : > { %423 = vperm.xlu2 %552, %v415_v15  }
  0x2d   : > { %432 = vperm.xlu2 %552, %v428_v22  }
  0x35   : > { %437 = vperm.xlu2 %552, %v429_v24  }
  0x67   : > { %v352_v27 = vpop.permute.xlu2 %351 }
  0x6f   : > { %v357_v37 = vpop.permute.xlu2 %356 }
  0x77   : > { %v419_v8 = vpop.permute.xlu2 %418 }
  0x84   : > { %v544_v10 = vpop.permute.xlu0 %543  ;;  %v549_v11 = vpop.permute.xlu1 %548 }
  0x85   : > { %v545_v12 = vunpack.i.l.bf16 %v544_v10  ;;  %v550_v13 = vunpack.i.l.bf16 %v549_v11  ;;  %v551_v14 = vunpack.i.h.bf16 %v549_v11  ;;  %v546_v16 = vunpack.i.h.bf16 %v544_v10 }
  0x87   : > { %335 = vmatpush.msra.mxu2 %v545_v12  ;;  %265 = vmatpush.msra.mxu0 %v550_v13  ;;  %v424_v12 = vpop.permute.xlu2 %423 }
  0x88   : > { %522 = vmatpush.msra.mxu3 %v550_v13 }
  0x89   : > { %336 = vmatpush.msra.mxu2 %v546_v16  ;;  %266 = vmatpush.msra.mxu0 %v551_v14 }
  0x8a   : > { %523 = vmatpush.msra.mxu3 %v551_v14 }
  0x8c   : > { %v308_v19 = vpop.permute.xlu0 %307  ;;  %v237_v20 = vpop.permute.xlu1 %236 }
  0x8d   : > { %337 = vmatpush.msra.mxu2 %v308_v19  ;;  %267 = vmatpush.msra.mxu0 %v237_v20 }
  0x8e   : > { %517 = vmatmul.msk.f32.vlgmr.msra.gmra.mxu2 %vm245_vm0, %v515_v17  ;;  %511 = vmatmul.msk.f32.vlgmr.msra.gmra.mxu0 %vm245_vm0, %v509_v18 }
  0x8f   : > { %524 = vmatpush.msra.mxu3 %v237_v20  ;;  %v433_v16 = vpop.permute.xlu2 %432 }
  0x90   : > { %512 = vmatmul.msk.f32.vlgmr.msra.gmra.mxu3 %vm245_vm0, %v510_v21 }
  0x93   : > { %v298_v25 = vpop.f32.mrf.mxu1 }
  0x96   : > { %518 = vmatmul.msk.f32.gmra.mxu2 %vm245_vm0, %v516_v23 }
  0x9b   : > { %v301_v31 = vpop.f32.mrf.mxu1 }
 0x10b   : > { %v269_v26 = vpop.f32.mrf.mxu0 }
 0x10c   : > { %v299_v29 = vadd.f32 %v298_v25, %v269_v26  ;;  %v438_v25 = vpop.permute.xlu2 %437 }
 0x111   : > { %v339_v28 = vpop.f32.mrf.mxu2 }
 0x112   : > { %v345_v32 = vadd.f32 %v339_v28, %v299_v29 }
 0x113   : > { %v272_v30 = vpop.f32.mrf.mxu3 }
 0x114   : > { %v302_v33 = vadd.f32 %v301_v31, %v272_v30  ;;  %v359_v35 = vadd.f32 %v352_v27, %v345_v32 }
 0x116   : > { %v362_v39 = vsel %vm361_vm1, %v359_v35, 0.0 }
 0x119   : > { %v342_v34 = vpop.f32.mrf.mxu2 }
 0x11a   : > { %v346_v36 = vadd.f32 %v342_v34, %v302_v33 }
 0x11c   : > { %v360_v38 = vadd.f32 %v357_v37, %v346_v36 }
 0x11e   : > { %v363_v40 = vsel %vm361_vm1, %v360_v38, 0.0 }
 0x11f   : > { %v364_v41 = vadd.f32 %v363_v40, %v362_v39 }
 0x121   : > { %365 = vadd.xlane.f32.xlu0 %v364_v41 }
 0x194   : > { %v366_v42 = vpop.xlane.xlu0 %365 }
 0x195   : > { %v367_v43 = vrot.slane %v366_v42, 4 }
 0x197   : > { %v368_v44 = vadd.f32 %v367_v43, %v366_v42 }
 0x199   : > { %v369_v45 = vrot.slane %v368_v44, 2 }
 0x19b   : > { %v370_v46 = vadd.f32 %v369_v45, %v368_v44 }
 0x19d   : > { %v371_v47 = vrot.slane %v370_v46, 1 }
 0x19f   : > { %v372_v48 = vadd.f32 %v371_v47, %v370_v46 }
 0x1a1   : > { %526 = vpush %v372_v48 }
 0x1d2   : > { %s527_s27 = spop %526 }
 0x1d3   : > { %v374_v56 = vstv %s527_s27 }
 0x1d4   : > { %v382_v57 = vmul.f32 %v381_v55, %v374_v56 }
 0x1d6   : > { %v383_v58 = vsub.f32 %v359_v35, %v382_v57  ;;  %v384_v59 = vsub.f32 %v360_v38, %v382_v57 }
 0x1d8   : > { %v385_v60 = vmul.f32 %v383_v58, %v383_v58  ;;  %v386_v61 = vmul.f32 %v384_v59, %v384_v59 }
 0x1da   : > { %v387_v62 = vsel %vm361_vm1, %v385_v60, 0.0  ;;  %v388_v63 = vsel %vm361_vm1, %v386_v61, 0.0 }
 0x1db   : > { %v389_v0 = vadd.f32 %v388_v63, %v387_v62 }
 0x1dd   : > { %390 = vadd.xlane.f32.xlu1 %v389_v0 }
 0x250   : > { %v391_v1 = vpop.xlane.xlu1 %390 }
 0x251   : > { %v392_v2 = vrot.slane %v391_v1, 4 }
 0x253   : > { %v393_v3 = vadd.f32 %v392_v2, %v391_v1 }
 0x255   : > { %v394_v4 = vrot.slane %v393_v3, 2 }
 0x257   : > { %v395_v5 = vadd.f32 %v394_v4, %v393_v3 }
 0x259   : > { %v396_v6 = vrot.slane %v395_v5, 1 }
 0x25b   : > { %v397_v7 = vadd.f32 %v396_v6, %v395_v5 }
 0x25d   : > { %528 = vpush %v397_v7 }
 0x28e   : > { %s529_s28 = spop %528 }
 0x28f   : > { %v399_v9 = vstv %s529_s28 }
 0x290   : > { %v400_v10 = vmul.f32 %v399_v9, %v381_v55 }
 0x292   : > { %v401_v11 = vadd.f32 1e-05, %v400_v10 }
 0x294   : > { %556 = vrsqrt.f32 %v401_v11  ;;  %vm408_vm4 = vweird.f32 %v401_v11 }
 0x29a   : > { %v557_v13 = vpop.eup %556 }
 0x29b   : > { %v403_v14 = vmul.f32 %v557_v13, %v401_v11  ;;  %vm409_vm3 = vweird.f32 %v557_v13 }
 0x29c   : > { %vm410_vm5 = vmor %vm408_vm4, %vm409_vm3 }
 0x29d   : > { %v404_v15 = vmul.f32 %v557_v13, %v403_v14 }
 0x29f   : > { %v405_v17 = vmul.f32 0.5, %v404_v15 }
 0x2a1   : > { %v406_v18 = vsub.f32 1.5, %v405_v17 }
 0x2a3   : > { %v407_v19 = vmul.f32 %v557_v13, %v406_v18 }
 0x2a5   : > { %v411_v20 = vsel %vm410_vm5, %v557_v13, %v407_v19 }
 0x2a6   : > { %v412_v21 = vmul.f32 %v411_v20, %v383_v58  ;;  %v413_v22 = vmul.f32 %v411_v20, %v384_v59 }
 0x2a8   : > { %v426_v23 = vmul.f32 %v419_v8, %v412_v21  ;;  %v427_v24 = vmul.f32 %v424_v12, %v413_v22 }
 0x2aa   : > { %v440_v26 = vadd.f32 %v433_v16, %v426_v23  ;;  %v441_v27 = vadd.f32 %v438_v25, %v427_v24 }
 0x2ac   : > { %558 = vtanh.f32 %v440_v26 }
 0x2ad   : > { %560 = vtanh.f32 %v441_v27 }
 0x2b2   : > { %v559_v28 = vpop.eup %558 }
 0x2b3   : > { %v561_v29 = vpop.eup %560  ;;  %444 = vst.msk [vmem:[%s224_s7] sm:$0xff] %vm361_vm1, %v559_v28 }
 0x2b4   : > { %445 = vst.msk [vmem:[%s224_s7 + $0x8] sm:$0xff] %vm361_vm1, %v561_v29 }
 0x2b5 PF: > { %s15_s18 = sadd.s32 1, %s568_s18  }
 0x2b6   : > { %p12_p4 = scmp.ge.s32.totalorder %s15_s18, 4  }
 0x2b8   :  { %14 = sbr.rel (!%p12_p4) target bundleno = 1 (0x1), region = 72 }

// kernel: forward.10
= control target key start
LH: loop header
LB: loop body
LE: loop exit
PB: predicated region body
PF: predicated region fallthrough
CT: control target
= control target key end

     0   :  { %s781_s18 = smov 0   ;;  %s921_s0 = inlined_call_operand.vmem [shape: f32[2,1,40], index: 0, kind: input, shape index: {}]   ;;  %s922_s1 = inlined_call_operand.vmem [shape: f32[3,8,5], index: 1, kind: input, shape index: {}]   ;;  %s923_s2 = inlined_call_operand.vmem [shape: f32[3,8,1], index: 2, kind: input, shape index: {}]   ;;  %s924_s3 = inlined_call_operand.vmem [shape: f32[3,8,1], index: 3, kind: input, shape index: {}]   ;;  %s925_s4 = inlined_call_operand.vmem [shape: f32[3,8,1], index: 4, kind: input, shape index: {}]   ;;  %s926_s5 = inlined_call_operand.vmem [shape: f32[2,24,16], index: 5, kind: output, shape index: {}]  }
   0x1 LB: > { %s642_s19 = sadd.s32 4294967295, %s733_s18   ;;  %p646_p0 = scmp.ge.s32.totalorder %s733_s18, 1  ;;  %s733_s18 = sphi %s781_s18, %s15_s18  }
   0x2   : > { %p185_p1 = scmp.lt.s32.totalorder %s733_s18, 3 }
   0x4   : > { %p186_p2 = pnand %p646_p0, %p185_p1 }
   0x5   : > { %p211_p3 = scmp.lt.s32.totalorder (!%p186_p2), %s642_s19, 1  ;;  %s740_s25 = smov (!%p186_p2), 127  }
   0x6   : > { %189 = sbr.rel (%p186_p2) target bundleno = 1411 (0x583), region = 40  ;;  %s741_s26 = smov (!%p186_p2), 125  }
   0x7   : > { %s742_s27 = smov (!%p186_p2), 126   ;;  %s743_s28 = smov (!%p186_p2), 124  }
   0x8   : > { %s744_s8 = smov (!%p186_p2), 118   ;;  %s745_s9 = smov (!%p186_p2), 119  }
   0x9   : > { %s746_s12 = smov (!%p186_p2), 122   ;;  %s747_s13 = smov (!%p186_p2), 116  }
   0xa   : > { %s749_s21 = smov (!%p186_p2), 110   ;;  %s750_s22 = smov (!%p186_p2), 104  }
   0xb   : > { %v220_v0 = vld [vmem:[%s922_s1] sm:$0xff]  ;;  %v735_v1 = vmov 1   ;;  %v736_v2 = vmov 3   ;;  %s928_s19 = smov (!%p211_p3, %s642_s19), 1  ;;  %v737_v3 = vmov 0   ;;  %v738_v4 = vmov 2  }
   0xc   : > { %695 = vset.pattern.permute.xlu0 %v735_v1  ;;  %697 = vset.pattern.permute.xlu1 %v736_v2  ;;  %s213_s24 = scalar_lea.vmem %s921_s0, %s928_s19  ;;  %v739_v5 = vmov 4   ;;  %v271_v15 = vld [vmem:[%s923_s2] sm:$0xff]  ;;  %v648_v16 = vld [vmem:[%s922_s1 + $0x8] sm:$0xff]  ;;  %vm282_vm0 = vcmask 130048   ;;  %v748_v59 = vmov 128.0   ;;  %s658_s16 = smul.u32 24, %s928_s19 }
   0xd   : > { %232 = vperm.xlu0 %695, %v220_v0   ;;  %252 = vperm.xlu1 %697, %v220_v0   ;;  %v803_v6 = vld [vmem:[%s213_s24] ss:$0 sm:$0xff]  ;;  %v649_v37 = vld [vmem:[%s923_s2 + $0x8] sm:$0xff]  ;;  %713 = vrcp.f32 %v748_v59 }
   0xe   : > { %699 = vset.pattern.permute.xlu2 %v737_v3 }
   0xf   : > { %223 = vperm.xlu2 %699, %v220_v0  }
  0x13   : > { %v714_v60 = vpop.eup %713 }
  0x14   : > { %v295_v61 = vmul.f32 128.0, %v714_v60  ;;  %vm299_vm1 = vweird.f32 %v714_v60 }
  0x15   : > { %696 = vset.pattern.permute.xlu0 %v738_v4  ;;  %698 = vset.pattern.permute.xlu1 %v739_v5 }
  0x16   : > { %242 = vperm.xlu0 %696, %v220_v0   ;;  %262 = vperm.xlu1 %698, %v220_v0   ;;  %v296_v62 = vsub.f32 1.0, %v295_v61 }
  0x17   : > { %702 = vset.pattern.permute.xlu2 %v738_v4 }
  0x18   : > { %v297_v63 = vmul.f32 %v714_v60, %v296_v62 }
  0x1a   : > { %v298_v0 = vadd.f32 %v714_v60, %v297_v63 }
  0x1e   : > { %700 = vset.pattern.permute.xlu1 %v737_v3 }
  0x69   : > { %v224_v17 = vpop.permute.xlu2 %223 }
  0x6a   : > { %v229_v19 = vmul.f32 %v803_v6, %v224_v17 }
  0x7f   : > { %v233_v7 = vpop.permute.xlu0 %232  ;;  %v253_v8 = vpop.permute.xlu1 %252 }
  0x80   : > { %v235_v9 = vmul.f32 %v803_v6, %v233_v7  ;;  %v255_v10 = vmul.f32 %v803_v6, %v253_v8 }
  0x82   : > { %237 = vrot.lane.b32.xlu2 %v235_v9, %s740_s25 }
  0x88   : > { %v243_v11 = vpop.permute.xlu0 %242  ;;  %v263_v12 = vpop.permute.xlu1 %262 }
  0x89   : > { %v245_v13 = vmul.f32 %v803_v6, %v243_v11  ;;  %v265_v14 = vmul.f32 %v803_v6, %v263_v12  ;;  %v653_v12 = vld [vmem:[%s923_s2 + $0x10] sm:$0xff] }
  0x8a   : > { %257 = vrot.lane.b32.xlu2 %v255_v10, %s741_s26 }
  0x8b   : > { %247 = vrot.lane.b32.xlu1 %v245_v13, %s742_s27  ;;  %267 = vrot.lane.b32.xlu0 %v265_v14, %s743_s28  ;;  %v652_v13 = vld [vmem:[%s922_s1 + $0x10] sm:$0xff] }
  0x93   : > { %274 = vperm.xlu1 %700, %v271_v15  }
  0x9b   : > { %701 = vset.pattern.permute.xlu1 %v735_v1 }
  0x9c   : > { %362 = vperm.xlu1 %701, %v648_v16  }
  0xa4   : > { %703 = vset.pattern.permute.xlu1 %v736_v2 }
  0xa5   : > { %382 = vperm.xlu1 %703, %v648_v16  }
  0xad   : > { %705 = vset.pattern.permute.xlu1 %v737_v3 }
  0xae   : > { %356 = vperm.xlu1 %705, %v648_v16  }
  0xdc   : > { %v238_v18 = vpop.permute.xlu2 %237 }
  0xdd   : > { %v240_v20 = vadd.f32 %v238_v18, %v229_v19 }
  0xe4   : > { %v258_v23 = vpop.permute.xlu2 %257 }
  0xfd   : > { %v248_v21 = vpop.permute.xlu1 %247  ;;  %v268_v25 = vpop.permute.xlu0 %267 }
  0xfe   : > { %v250_v22 = vadd.f32 %v248_v21, %v240_v20 }
 0x100   : > { %v260_v24 = vadd.f32 %v258_v23, %v250_v22 }
 0x102   : > { %v270_v26 = vadd.f32 %v268_v25, %v260_v24 }
 0x105   : > { %v275_v27 = vpop.permute.xlu1 %274 }
 0x106   : > { %v277_v28 = vadd.f32 %v275_v27, %v270_v26 }
 0x108   : > { %279 = vrot.lane.b32.xlu2 %v277_v28, %s744_s8 }
 0x10e   : > { %v363_v29 = vpop.permute.xlu1 %362 }
 0x10f   : > { %v365_v30 = vmul.f32 %v803_v6, %v363_v29 }
 0x110   : > { %372 = vperm.xlu2 %702, %v648_v16  }
 0x117   : > { %v383_v33 = vpop.permute.xlu1 %382 }
 0x118   : > { %704 = vset.pattern.permute.xlu2 %v739_v5  ;;  %v385_v34 = vmul.f32 %v803_v6, %v383_v33 }
 0x119   : > { %392 = vperm.xlu2 %704, %v648_v16  }
 0x120   : > { %v357_v41 = vpop.permute.xlu1 %356 }
 0x121   : > { %706 = vset.pattern.permute.xlu2 %v737_v3  ;;  %v359_v44 = vmul.f32 %v803_v6, %v357_v41 }
 0x122   : > { %367 = vrot.lane.b32.xlu2 %v365_v30, %s741_s26 }
 0x12a   : > { %387 = vrot.lane.b32.xlu2 %v385_v34, %s745_s9 }
 0x132   : > { %405 = vperm.xlu2 %706, %v649_v37  }
 0x13a   : > { %707 = vset.pattern.permute.xlu2 %v735_v1  ;;  %v840_v1 = vsel %vm299_vm1, %v714_v60, %v298_v0 }
 0x162   : > { %v280_v31 = vpop.permute.xlu2 %279 }
 0x163   : > { %v283_v32 = vsel %vm282_vm0, %v280_v31, 0.0 }
 0x164   : > { %284 = vadd.xlane.f32.xlu0 %v283_v32 }
 0x16a   : > { %v373_v35 = vpop.permute.xlu2 %372 }
 0x16b   : > { %v375_v36 = vmul.f32 %v803_v6, %v373_v35 }
 0x16d   : > { %377 = vrot.lane.b32.xlu1 %v375_v36, %s746_s12 }
 0x173   : > { %v393_v38 = vpop.permute.xlu2 %392 }
 0x174   : > { %v395_v39 = vmul.f32 %v803_v6, %v393_v38 }
 0x176   : > { %397 = vrot.lane.b32.xlu1 %v395_v39, %s747_s13 }
 0x17c   : > { %v368_v40 = vpop.permute.xlu2 %367 }
 0x17d   : > { %v370_v47 = vadd.f32 %v368_v40, %v359_v44 }
 0x184   : > { %v388_v48 = vpop.permute.xlu2 %387 }
 0x18c   : > { %v406_v56 = vpop.permute.xlu2 %405 }
 0x1d7   : > { %v285_v42 = vpop.xlane.xlu0 %284 }
 0x1d8   : > { %v286_v43 = vrot.slane %v285_v42, 4 }
 0x1da   : > { %v287_v45 = vadd.f32 %v286_v43, %v285_v42 }
 0x1dc   : > { %v288_v46 = vrot.slane %v287_v45, 2 }
 0x1de   : > { %v289_v49 = vadd.f32 %v288_v46, %v287_v45 }
 0x1df   : > { %v378_v50 = vpop.permute.xlu1 %377 }
 0x1e0   : > { %v290_v51 = vrot.slane %v289_v49, 1  ;;  %v380_v52 = vadd.f32 %v378_v50, %v370_v47 }
 0x1e2   : > { %v291_v53 = vadd.f32 %v290_v51, %v289_v49  ;;  %v390_v54 = vadd.f32 %v388_v48, %v380_v52  ;;  %v650_v52 = vld [vmem:[%s924_s3 + $0x8] sm:$0xff] }
 0x1e4   : > { %659 = vpush %v291_v53 }
 0x1e8   : > { %v398_v55 = vpop.permute.xlu1 %397 }
 0x1e9   : > { %v400_v57 = vadd.f32 %v398_v55, %v390_v54  ;;  %v332_v55 = vld [vmem:[%s924_s3] sm:$0xff] }
 0x1eb   : > { %v836_v58 = vadd.f32 %v406_v56, %v400_v57  ;;  %v651_v56 = vld [vmem:[%s925_s4 + $0x8] sm:$0xff] }
 0x1ed   : > { %410 = vrot.lane.b32.xlu2 %v836_v58, %s746_s12 }
 0x1f5   : > { %487 = vperm.xlu2 %707, %v652_v13  }
 0x1fd   : > { %708 = vset.pattern.permute.xlu2 %v736_v2 }
 0x1fe   : > { %507 = vperm.xlu2 %708, %v652_v13  }
 0x206   : > { %709 = vset.pattern.permute.xlu2 %v739_v5 }
 0x207   : > { %517 = vperm.xlu2 %709, %v652_v13  }
 0x20f   : > { %711 = vset.pattern.permute.xlu2 %v737_v3 }
 0x215   : > { %s660_s14 = spop %659 }
 0x216   : > { %v293_v4 = vstv %s660_s14 }
 0x217   : > { %v301_v7 = vmul.f32 %v840_v1, %v293_v4 }
 0x219   : > { %v843_v8 = vsub.f32 %v277_v28, %v301_v7 }
 0x21b   : > { %v303_v9 = vmul.f32 %v843_v8, %v843_v8 }
 0x21d   : > { %305 = vrot.lane.b32.xlu1 %v303_v9, %s744_s8 }
 0x247   : > { %v411_v10 = vpop.permute.xlu2 %410 }
 0x248   : > { %v413_v11 = vsel %vm282_vm0, %v411_v10, 0.0 }
 0x249   : > { %414 = vadd.xlane.f32.xlu1 %v413_v11 }
 0x24f   : > { %v488_v16 = vpop.permute.xlu2 %487 }
 0x250   : > { %v490_v17 = vmul.f32 %v803_v6, %v488_v16 }
 0x252   : > { %492 = vrot.lane.b32.xlu2 %v490_v17, %s746_s12 }
 0x258   : > { %v508_v2 = vpop.permute.xlu2 %507 }
 0x259   : > { %v510_v18 = vmul.f32 %v803_v6, %v508_v2 }
 0x261   : > { %v518_v33 = vpop.permute.xlu2 %517 }
 0x262   : > { %530 = vperm.xlu1 %705, %v653_v12   ;;  %v520_v34 = vmul.f32 %v803_v6, %v518_v33 }
 0x28f   : > { %v306_v14 = vpop.permute.xlu1 %305 }
 0x290   : > { %v308_v15 = vsel %vm282_vm0, %v306_v14, 0.0 }
 0x291   : > { %309 = vadd.xlane.f32.xlu0 %v308_v15 }
 0x2a5   : > { %497 = vperm.xlu0 %696, %v652_v13  }
 0x2ac   : > { %v493_v39 = vpop.permute.xlu2 %492 }
 0x2ad   : > { %710 = vset.pattern.permute.xlu0 %v737_v3 }
 0x2ae   : > { %481 = vperm.xlu0 %710, %v652_v13  }
 0x2b6   : > { %512 = vrot.lane.b32.xlu0 %v510_v18, %s749_s21  ;;  %s908_s21 = scalar_lea.vmem %s926_s5, %s658_s16 }
 0x2bc   : > { %v415_v5 = vpop.xlane.xlu1 %414 }
 0x2bd   : > { %v416_v19 = vrot.slane %v415_v5, 4 }
 0x2bf   : > { %v417_v20 = vadd.f32 %v416_v19, %v415_v5 }
 0x2c1   : > { %v418_v21 = vrot.slane %v417_v20, 2 }
 0x2c3   : > { %v419_v25 = vadd.f32 %v418_v21, %v417_v20 }
 0x2c5   : > { %v420_v27 = vrot.slane %v419_v25, 1 }
 0x2c7   : > { %v421_v30 = vadd.f32 %v420_v27, %v419_v25 }
 0x2d4   : > { %v531_v49 = vpop.permute.xlu1 %530 }
 0x304   : > { %v310_v22 = vpop.xlane.xlu0 %309 }
 0x305   : > { %v311_v23 = vrot.slane %v310_v22, 4 }
 0x307   : > { %v312_v24 = vadd.f32 %v311_v23, %v310_v22 }
 0x309   : > { %v313_v3 = vrot.slane %v312_v24, 2 }
 0x30b   : > { %v314_v26 = vadd.f32 %v313_v3, %v312_v24  ;;  %v655_v24 = vld [vmem:[%s925_s4 + $0x10] sm:$0xff] }
 0x30d   : > { %v315_v28 = vrot.slane %v314_v26, 1 }
 0x30f   : > { %v316_v29 = vadd.f32 %v315_v28, %v314_v26 }
 0x311   : > { %661 = vpush %v316_v29 }
 0x312   : > { %663 = vpush %v421_v30 }
 0x317   : > { %v498_v31 = vpop.permute.xlu0 %497 }
 0x318   : > { %v500_v32 = vmul.f32 %v803_v6, %v498_v31 }
 0x31a   : > { %502 = vrot.lane.b32.xlu2 %v500_v32, %s747_s13 }
 0x320   : > { %v482_v40 = vpop.permute.xlu0 %481 }
 0x321   : > { %v484_v41 = vmul.f32 %v803_v6, %v482_v40  ;;  %v654_v6 = vld [vmem:[%s924_s3 + $0x10] sm:$0xff] }
 0x322   : > { %522 = vrot.lane.b32.xlu2 %v520_v34, %s750_s22 }
 0x323   : > { %v495_v42 = vadd.f32 %v493_v39, %v484_v41 }
 0x328   : > { %v513_v45 = vpop.permute.xlu0 %512 }
 0x342   : > { %s866_s23 = spop %661 }
 0x343   : > { %s664_s24 = spop %663  ;;  %v318_v57 = vstv %s866_s23 }
 0x344   : > { %v423_v35 = vstv %s664_s24 }
 0x345   : > { %v424_v36 = vmul.f32 %v423_v35, %v840_v1 }
 0x347   : > { %v870_v37 = vsub.f32 %v836_v58, %v424_v36  ;;  %v319_v58 = vmul.f32 %v318_v57, %v840_v1 }
 0x349   : > { %v426_v38 = vmul.f32 %v870_v37, %v870_v37  ;;  %v320_v59 = vadd.f32 1e-05, %v319_v58 }
 0x34b   : > { %428 = vrot.lane.b32.xlu0 %v426_v38, %s746_s12  ;;  %715 = vrsqrt.f32 %v320_v59  ;;  %vm327_vm3 = vweird.f32 %v320_v59 }
 0x351   : > { %v716_v60 = vpop.eup %715 }
 0x352   : > { %v322_v61 = vmul.f32 %v716_v60, %v320_v59  ;;  %vm328_vm2 = vweird.f32 %v716_v60 }
 0x353   : > { %vm329_vm4 = vmor %vm327_vm3, %vm328_vm2 }
 0x354   : > { %v323_v62 = vmul.f32 %v716_v60, %v322_v61 }
 0x356   : > { %v324_v0 = vmul.f32 0.5, %v323_v62 }
 0x358   : > { %v325_v7 = vsub.f32 1.5, %v324_v0 }
 0x35a   : > { %v326_v12 = vmul.f32 %v716_v60, %v325_v7 }
 0x35c   : > { %v330_v15 = vsel %vm329_vm4, %v716_v60, %v326_v12 }
 0x35d   : > { %v331_v2 = vmul.f32 %v330_v15, %v843_v8 }
 0x374   : > { %v503_v43 = vpop.permute.xlu2 %502 }
 0x375   : > { %v505_v44 = vadd.f32 %v503_v43, %v495_v42 }
 0x377   : > { %v515_v46 = vadd.f32 %v513_v45, %v505_v44  ;;  %v339_v44 = vld [vmem:[%s925_s4] sm:$0xff] }
 0x37c   : > { %v523_v47 = vpop.permute.xlu2 %522 }
 0x37d   : > { %v525_v48 = vadd.f32 %v523_v47, %v515_v46 }
 0x37f   : > { %v533_v50 = vadd.f32 %v531_v49, %v525_v48 }
 0x381   : > { %v534_v51 = vsel %vm282_vm0, %v533_v50, 0.0 }
 0x382   : > { %535 = vadd.xlane.f32.xlu0 %v534_v51 }
 0x396   : > { %459 = vperm.xlu0 %710, %v650_v52  }
 0x39e   : > { %576 = vperm.xlu0 %710, %v654_v6  }
 0x3bd   : > { %v429_v53 = vpop.permute.xlu0 %428 }
 0x3be   : > { %v431_v54 = vsel %vm282_vm0, %v429_v53, 0.0 }
 0x3bf   : > { %432 = vadd.xlane.f32.xlu2 %v431_v54 }
 0x3d7   : > { %335 = vperm.xlu2 %711, %v332_v55  }
 0x3df   : > { %467 = vperm.xlu2 %711, %v651_v56  }
 0x3e7   : > { %584 = vperm.xlu2 %711, %v655_v24  }
 0x3f5   : > { %v536_v63 = vpop.xlane.xlu0 %535 }
 0x3f6   : > { %v537_v4 = vrot.slane %v536_v63, 4 }
 0x3f8   : > { %v538_v9 = vadd.f32 %v537_v4, %v536_v63 }
 0x3fa   : > { %v539_v10 = vrot.slane %v538_v9, 2 }
 0x3fc   : > { %v540_v16 = vadd.f32 %v539_v10, %v538_v9 }
 0x3fe   : > { %v541_v19 = vrot.slane %v540_v16, 1 }
 0x400   : > { %v542_v23 = vadd.f32 %v541_v19, %v540_v16 }
 0x408   : > { %v460_v40 = vpop.permute.xlu0 %459 }
 0x410   : > { %v577_v9 = vpop.permute.xlu0 %576 }
 0x432   : > { %v433_v11 = vpop.xlane.xlu2 %432 }
 0x433   : > { %v434_v13 = vrot.slane %v433_v11, 4 }
 0x435   : > { %v435_v14 = vadd.f32 %v434_v13, %v433_v11 }
 0x437   : > { %v436_v17 = vrot.slane %v435_v14, 2 }
 0x439   : > { %v437_v18 = vadd.f32 %v436_v17, %v435_v14 }
 0x43a   : > { %v336_v5 = vpop.permute.xlu2 %335 }
 0x43b   : > { %v338_v20 = vmul.f32 %v336_v5, %v331_v2  ;;  %v438_v21 = vrot.slane %v437_v18, 1 }
 0x43d   : > { %v439_v22 = vadd.f32 %v438_v21, %v437_v18 }
 0x43f   : > { %665 = vpush %v439_v22 }
 0x440   : > { %667 = vpush %v542_v23 }
 0x442   : > { %v468_v41 = vpop.permute.xlu2 %467 }
 0x44a   : > { %v585_v46 = vpop.permute.xlu2 %584 }
 0x470   : > { %s666_s11 = spop %665 }
 0x471   : > { %v441_v25 = vstv %s666_s11  ;;  %s668_s13 = spop %667 }
 0x472   : > { %v442_v3 = vmul.f32 %v441_v25, %v840_v1  ;;  %v544_v8 = vstv %s668_s13 }
 0x473   : > { %v545_v26 = vmul.f32 %v544_v8, %v840_v1 }
 0x474   : > { %v443_v27 = vadd.f32 1e-05, %v442_v3 }
 0x475   : > { %v546_v28 = vsub.f32 %v533_v50, %v545_v26 }
 0x476   : > { %717 = vrsqrt.f32 %v443_v27  ;;  %vm450_vm6 = vweird.f32 %v443_v27 }
 0x477   : > { %v547_v29 = vmul.f32 %v546_v28, %v546_v28 }
 0x479   : > { %v548_v30 = vsel %vm282_vm0, %v547_v29, 0.0 }
 0x47a   : > { %549 = vadd.xlane.f32.xlu1 %v548_v30 }
 0x47c   : > { %v718_v31 = vpop.eup %717 }
 0x47d   : > { %v445_v32 = vmul.f32 %v718_v31, %v443_v27  ;;  %vm451_vm5 = vweird.f32 %v718_v31 }
 0x47e   : > { %vm452_vm7 = vmor %vm450_vm6, %vm451_vm5 }
 0x47f   : > { %v446_v33 = vmul.f32 %v718_v31, %v445_v32 }
 0x481   : > { %v447_v34 = vmul.f32 0.5, %v446_v33 }
 0x483   : > { %v448_v35 = vsub.f32 1.5, %v447_v34 }
 0x485   : > { %v449_v36 = vmul.f32 %v718_v31, %v448_v35 }
 0x487   : > { %v453_v38 = vsel %vm452_vm7, %v718_v31, %v449_v36 }
 0x488   : > { %v454_v39 = vmul.f32 %v453_v38, %v870_v37 }
 0x48a   : > { %v462_v42 = vmul.f32 %v460_v40, %v454_v39 }
 0x48c   : > { %v470_v43 = vadd.f32 %v468_v41, %v462_v42 }
 0x48e   : > { %719 = vtanh.f32 %v470_v43 }
 0x493   : > { %342 = vperm.xlu1 %705, %v339_v44  }
 0x494   : > { %v720_v45 = vpop.eup %719 }
 0x495   : > { %473 = vrot.lane.b32.xlu2 %v720_v45, %s746_s12 }
 0x4ed   : > { %v550_v47 = vpop.xlane.xlu1 %549 }
 0x4ee   : > { %v551_v37 = vrot.slane %v550_v47, 4 }
 0x4ef   : > { %v474_v48 = vpop.permute.xlu2 %473 }
 0x4f0   : > { %v552_v49 = vadd.f32 %v551_v37, %v550_v47  ;;  %476 = vst.msk [vmem:[%s908_s21 + $0x8] sm:$0xff] %vm282_vm0, %v474_v48 }
 0x4f2   : > { %v553_v50 = vrot.slane %v552_v49, 2 }
 0x4f4   : > { %v554_v51 = vadd.f32 %v553_v50, %v552_v49 }
 0x4f6   : > { %v555_v52 = vrot.slane %v554_v51, 1 }
 0x4f8   : > { %v556_v6 = vadd.f32 %v555_v52, %v554_v51 }
 0x4fa   : > { %669 = vpush %v556_v6 }
 0x505   : > { %v343_v53 = vpop.permute.xlu1 %342 }
 0x506   : > { %v345_v54 = vadd.f32 %v343_v53, %v338_v20 }
 0x508   : > { %721 = vtanh.f32 %v345_v54 }
 0x50e   : > { %v722_v55 = vpop.eup %721 }
 0x50f   : > { %348 = vrot.lane.b32.xlu0 %v722_v55, %s744_s8 }
 0x52b   : > { %s670_s19 = spop %669 }
 0x52c   : > { %v558_v56 = vstv %s670_s19 }
 0x52d   : > { %v559_v57 = vmul.f32 %v558_v56, %v840_v1 }
 0x52f   : > { %v560_v58 = vadd.f32 1e-05, %v559_v57 }
 0x531   : > { %723 = vrsqrt.f32 %v560_v58  ;;  %vm567_vm9 = vweird.f32 %v560_v58 }
 0x537   : > { %v724_v59 = vpop.eup %723 }
 0x538   : > { %v562_v60 = vmul.f32 %v724_v59, %v560_v58  ;;  %vm568_vm8 = vweird.f32 %v724_v59 }
 0x539   : > { %vm569_vm10 = vmor %vm567_vm9, %vm568_vm8 }
 0x53a   : > { %v563_v61 = vmul.f32 %v724_v59, %v562_v60 }
 0x53c   : > { %v564_v62 = vmul.f32 0.5, %v563_v61 }
 0x53e   : > { %v565_v63 = vsub.f32 1.5, %v564_v62 }
 0x540   : > { %v566_v0 = vmul.f32 %v724_v59, %v565_v63 }
 0x542   : > { %v570_v4 = vsel %vm569_vm10, %v724_v59, %v566_v0 }
 0x543   : > { %v571_v7 = vmul.f32 %v570_v4, %v546_v28 }
 0x545   : > { %v579_v10 = vmul.f32 %v577_v9, %v571_v7 }
 0x547   : > { %v587_v11 = vadd.f32 %v585_v46, %v579_v10 }
 0x549   : > { %725 = vtanh.f32 %v587_v11 }
 0x54f   : > { %v726_v1 = vpop.eup %725 }
 0x550   : > { %589 = vst.msk [vmem:[%s908_s21 + $0x10] sm:$0xff] %vm282_vm0, %v726_v1 }
 0x581   : > { %v349_v12 = vpop.permute.xlu0 %348 }
 0x582   : > { %351 = vst.msk [vmem:[%s908_s21] sm:$0xff] %vm282_vm0, %v349_v12 }
 0x583 PF: > { %s15_s18 = sadd.s32 1, %s733_s18  }
 0x584   : > { %p12_p4 = scmp.ge.s32.totalorder %s15_s18, 4  }
 0x586   :  { %14 = sbr.rel (!%p12_p4) target bundleno = 1 (0x1), region = 78 }

// kernel: forward.11
= control target key start
LH: loop header
LB: loop body
LE: loop exit
PB: predicated region body
PF: predicated region fallthrough
CT: control target
= control target key end

     0   :  { %s800_s30 = smov 0   ;;  %s895_s0 = inlined_call_operand.vmem [shape: f32[2,16,1], index: 0, kind: input, shape index: {}]   ;;  %s896_s1 = inlined_call_operand.vmem [shape: f32[1,24], index: 1, kind: input, shape index: {}]   ;;  %s897_s2 = inlined_call_operand.vmem [shape: f32[8,24], index: 2, kind: input, shape index: {}]   ;;  %s898_s3 = inlined_call_operand.vmem [shape: f32[1,24], index: 3, kind: input, shape index: {}]   ;;  %s899_s4 = inlined_call_operand.vmem [shape: f32[1,24], index: 4, kind: input, shape index: {}]   ;;  %s900_s5 = inlined_call_operand.vmem [shape: f32[1,24], index: 5, kind: input, shape index: {}]   ;;  %s901_s6 = inlined_call_operand.vmem [shape: f32[8,24], index: 6, kind: input, shape index: {}]   ;;  %s902_s7 = inlined_call_operand.vmem [shape: f32[1,24], index: 7, kind: input, shape index: {}]   ;;  %s903_s8 = inlined_call_operand.vmem [shape: f32[1,24], index: 8, kind: input, shape index: {}]   ;;  %s904_s9 = inlined_call_operand.vmem [shape: f32[2,16,16], index: 9, kind: output, shape index: {}]  }
   0x1 LB: > { %s641_s10 = sadd.s32 4294967295, %s733_s30   ;;  %p645_p0 = scmp.ge.s32.totalorder %s733_s30, 1  ;;  %s733_s30 = sphi %s800_s30, %s19_s30  }
   0x2   : > { %p287_p1 = scmp.lt.s32.totalorder %s733_s30, 3 }
   0x4   : > { %p288_p2 = pnand %p645_p0, %p287_p1 }
   0x5   : > { %p323_p3 = scmp.lt.s32.totalorder (!%p288_p2), %s641_s10, 1  ;;  %s852_s14 = smov (!%p288_p2), 0  }
   0x6   : > { %291 = sbr.rel (%p288_p2) target bundleno = 833 (0x341), region = 56 }
   0xb   : > { %v335_v0 = vld [vmem:[%s896_s1] sm:$0x1]  ;;  %vm347_vm0 = vcmask 1040384   ;;  %s906_s10 = smov (!%p323_p3, %s641_s10), 1  ;;  %vm340_vm1 = vcmask 7168   ;;  %vm374_vm2 = vcmask 195584  }
   0xc   : > { %v377_v1 = vld [vmem:[%s900_s5] sm:$0x1]  ;;  %664 = vmatpush.msk.msra.mxu2 %vm347_vm0, %v335_v0  ;;  %650 = vmatpush.msk.msra.mxu0 %vm347_vm0, %v335_v0  ;;  %s662_s15 = sshll.u32 %s906_s10, 4  ;;  %v848_v18 = vmov 0.0   ;;  %v850_v19 = vmov 0.0  }
   0xd   : > { %665 = vmatpush.msk.msra.mxu3 %vm347_vm0, %v377_v1  ;;  %653 = vmatpush.msk.msra.mxu1 %vm347_vm0, %v377_v1  ;;  %s327_s18 = scalar_lea.vmem %s895_s0, %s662_s15  ;;  %s820_s21 = scalar_lea.vmem %s904_s9, %s662_s15  ;;  %v825_v4 = vld [vmem:[%s897_s2] sm:$0xff] }
   0xe   : > { %v334_v2 = vld [vmem:[%s327_s18 + $0x8] sm:$0xff]  ;;  %v333_v3 = vld [vmem:[%s327_s18] sm:$0xff] }
   0xf   : > { %652 = vmatmul.msk.f32.vlgmr.msra.gmra.mxu2 %vm340_vm1, %v334_v2  ;;  %655 = vmatmul.msk.f32.vlgmr.msra.gmra.mxu3 %vm340_vm1, %v334_v2  ;;  %v830_v5 = vld [vmem:[%s899_s4] sm:$0x1] }
  0x10   : > { %651 = vmatmul.msk.f32.vlgmr.msra.gmra.mxu0 %vm340_vm1, %v333_v3  ;;  %654 = vmatmul.msk.f32.vlgmr.msra.gmra.mxu1 %vm340_vm1, %v333_v3  ;;  %v835_v6 = vld [vmem:[%s901_s6] sm:$0xff] }
  0x11   : > { %v840_v7 = vld [vmem:[%s903_s8] sm:$0x1] }
  0x12   : > { %v701_v8 = vld [vmem:[%s898_s3] ss:$0 sm:$0xff] }
  0x13   : > { %v702_v9 = vld [vmem:[%s902_s7] ss:$0 sm:$0xff] }
  0x8d   : > { %v368_v10 = vpop.f32.mrf.mxu0  ;;  %v402_v11 = vpop.f32.mrf.mxu1 }
  0x8e   : > { %v369_v12 = vadd.f32 %v701_v8, %v368_v10  ;;  %v403_v13 = vadd.f32 %v702_v9, %v402_v11 }
  0x90   : > { %375 = vst.msk [vmem:[#allocation2] sm:$0xff] %vm374_vm2, %v369_v12 }
  0x91   : > { %408 = vst.msk [vmem:[#allocation3] sm:$0xff] %vm374_vm2, %v403_v13 }
  0x92   : > { %v371_v14 = vpop.f32.mrf.mxu2  ;;  %v405_v15 = vpop.f32.mrf.mxu3 }
  0x93   : > { %v372_v16 = vadd.f32 %v701_v8, %v371_v14  ;;  %v406_v17 = vadd.f32 %v702_v9, %v405_v15 }
  0x95   : > { %376 = vst.msk [vmem:[#allocation2 + $0x8] sm:$0xff] %vm374_vm2, %v372_v16 }
  0x96   : > { %409 = vst.msk [vmem:[#allocation3 + $0x8] sm:$0xff] %vm374_vm2, %v406_v17 }
  0x97 LB: >> { %446 = vmatpush.msra.mxu0 %v825_v4  ;;  %512 = vmatpush.msra.mxu1 %v835_v6  ;;  %s747_s15 = smov 120   ;;  %vm428_vm3 = vcmask 64512   ;;  %s748_s16 = smov 112   ;;  %vm561_vm12 = vcmask 57344   ;;  %vm564_vm13 = vcmask 122944   ;;  %s745_s14 = sphi %s852_s14, %s419_s14   ;;  %v741_v19 = vphi %v850_v19, %v489_v19   ;;  %v737_v18 = vphi %v848_v18, %v555_v18  }
  0x98   : >> { %426 = vrot.lane.b32.xlu0 %v741_v19, %s747_s15  ;;  %s423_s17 = scalar_lea.vmem [#allocation2], %s745_s14  ;;  %s422_s18 = ssub.s32 15, %s745_s14 }
  0x99   : >> { %s490_s19 = scalar_lea.vmem [#allocation3], %s422_s18  ;;  %s749_s20 = smov 16  }
  0x9a   : >> { %s560_s22 = scalar_lea.vmem [#allocation4], %s745_s14  ;;  %s563_s23 = scalar_lea.vmem [#allocation4], %s422_s18 }
  0x9b   : >> { %s419_s14 = sadd.s32 1, %s745_s14  }
  0x9c   : >> { %v424_v26 = vld [vmem:[%s423_s17] sm:$0x1]  ;;  %p416_p4 = scmp.ge.s32.totalorder %s419_s14, 16  }
  0x9d   : >> { %v491_v29 = vld [vmem:[%s490_s19] sm:$0x1]  ;;  %vm568_vm14 = vcmask (%p416_p4), 130048  }
  0xa0   : >> { %493 = vrot.lane.b32.xlu0 %v737_v18, %s747_s15 }
 0x10a   : >> { %v427_v20 = vpop.permute.xlu0 %426 }
 0x10b   : >> { %656 = vmatmul.msk.f32.vlgmr.msra.gmra.mxu0 %vm428_vm3, %v427_v20 }
 0x112   : >> { %v494_v21 = vpop.permute.xlu0 %493 }
 0x113   : >> { %658 = vmatmul.msk.f32.vlgmr.msra.gmra.mxu1 %vm428_vm3, %v494_v21 }
 0x188   : >> { %v448_v22 = vpop.f32.mrf.mxu0 }
 0x189   : >> { %v449_v23 = vadd.f32 %v448_v22, %v830_v5 }
 0x18b   : >> { %472 = vrot.lane.b32.xlu1 %v449_v23, %s748_s16  ;;  %v451_v27 = vadd.f32 %v449_v23, %v424_v26 }
 0x18d   : >> { %v657_v28 = vmul.f32 -1.442695, %v451_v27 }
 0x18f   : >> { %703 = vpow2.f32 %v657_v28 }
 0x190   : >> { %v514_v24 = vpop.f32.mrf.mxu1 }
 0x191   : >> { %v515_v25 = vadd.f32 %v514_v24, %v840_v7 }
 0x193   : >> { %538 = vrot.lane.b32.xlu1 %v515_v25, %s748_s16  ;;  %v517_v30 = vadd.f32 %v515_v25, %v491_v29 }
 0x195   : >> { %v659_v31 = vmul.f32 -1.442695, %v517_v30  ;;  %v704_v32 = vpop.eup %703 }
 0x196   : >> { %v455_v33 = vadd.f32 1.0, %v704_v32 }
 0x197   : >> { %705 = vpow2.f32 %v659_v31 }
 0x198   : >> { %707 = vrcp.f32 %v455_v33  ;;  %v467_v44 = vand.u32 2147483648, %v455_v33  ;;  %vm461_vm5 = vweird.f32 %v455_v33  ;;  %v465_v45 = vand.u32 2147483647, %v455_v33 }
 0x19a   : >> { %v468_v48 = vor.u32 1.1754944e-38, %v467_v44  ;;  %vm466_vm7 = vcmp.eq.f32.partialorder %v465_v45, 8.507059e+37 }
 0x19d   : >> { %v706_v34 = vpop.eup %705 }
 0x19e   : >> { %v521_v35 = vadd.f32 1.0, %v706_v34  ;;  %v708_v36 = vpop.eup %707 }
 0x19f   : >> { %v457_v37 = vmul.f32 %v708_v36, %v455_v33  ;;  %vm462_vm4 = vweird.f32 %v708_v36 }
 0x1a0   : >> { %709 = vrcp.f32 %v521_v35  ;;  %vm463_vm6 = vmor %vm461_vm5, %vm462_vm4  ;;  %vm527_vm8 = vweird.f32 %v521_v35  ;;  %v533_v51 = vand.u32 2147483648, %v521_v35  ;;  %v531_v54 = vand.u32 2147483647, %v521_v35 }
 0x1a1   : >> { %v458_v38 = vsub.f32 1.0, %v457_v37 }
 0x1a2   : >> { %v534_v55 = vor.u32 1.1754944e-38, %v533_v51  ;;  %vm532_vm11 = vcmp.eq.f32.partialorder %v531_v54, 8.507059e+37 }
 0x1a3   : >> { %v459_v40 = vmul.f32 %v708_v36, %v458_v38 }
 0x1a5   : >> { %v460_v42 = vadd.f32 %v708_v36, %v459_v40 }
 0x1a6   : >> { %v710_v39 = vpop.eup %709 }
 0x1a7   : >> { %v523_v41 = vmul.f32 %v710_v39, %v521_v35  ;;  %v464_v46 = vsel %vm463_vm6, %v708_v36, %v460_v42  ;;  %vm528_vm9 = vweird.f32 %v710_v39 }
 0x1a8   : >> { %v469_v50 = vsel %vm466_vm7, %v468_v48, %v464_v46  ;;  %vm529_vm10 = vmor %vm527_vm8, %vm528_vm9 }
 0x1a9   : >> { %v524_v43 = vsub.f32 1.0, %v523_v41  ;;  %v482_v2 = vsub.f32 1.0, %v469_v50  ;;  %v488_v8 = vmul.f32 %v741_v19, %v469_v50 }
 0x1ab   : >> { %v525_v47 = vmul.f32 %v710_v39, %v524_v43 }
 0x1ad   : >> { %v526_v53 = vadd.f32 %v710_v39, %v525_v47 }
 0x1af   : >> { %v530_v56 = vsel %vm529_vm10, %v710_v39, %v526_v53 }
 0x1b0   : >> { %v535_v58 = vsel %vm532_vm11, %v534_v55, %v530_v56 }
 0x1b1   : >> { %v548_v11 = vsub.f32 1.0, %v535_v58  ;;  %v554_v13 = vmul.f32 %v737_v18, %v535_v58 }
 0x1fd   : >> { %v473_v49 = vpop.permute.xlu1 %472 }
 0x1fe   : >> { %v475_v52 = vmul.f32 %v473_v49, %v469_v50 }
 0x200   : >> { %477 = vrot.lane.b32.xlu2 %v475_v52, %s749_s20 }
 0x205   : >> { %v539_v57 = vpop.permute.xlu1 %538 }
 0x206   : >> { %v541_v59 = vmul.f32 %v539_v57, %v535_v58 }
 0x208   : >> { %543 = vrot.lane.b32.xlu2 %v541_v59, %s749_s20 }
 0x25a   : >> { %v478_v60 = vpop.permute.xlu2 %477 }
 0x25b   : >> { %v480_v61 = vadd.f32 %v478_v60, %v424_v26 }
 0x25d   : >> { %711 = vtanh.f32 %v480_v61 }
 0x262   : >> { %v544_v62 = vpop.permute.xlu2 %543 }
 0x263   : >> { %v712_v63 = vpop.eup %711  ;;  %v546_v0 = vadd.f32 %v544_v62, %v491_v29 }
 0x264   : >> { %484 = vrot.lane.b32.xlu0 %v712_v63, %s747_s15 }
 0x265   : >> { %713 = vtanh.f32 %v546_v0 }
 0x26b   : >> { %v714_v1 = vpop.eup %713 }
 0x26c   : >> { %550 = vrot.lane.b32.xlu1 %v714_v1, %s747_s15 }
 0x2d6   : >> { %v485_v3 = vpop.permute.xlu0 %484 }
 0x2d7   : >> { %v487_v9 = vmul.f32 %v485_v3, %v482_v2 }
 0x2d9   : >> { %v489_v19 = vadd.f32 %v488_v8, %v487_v9  }
 0x2db   : >> { %557 = vrot.lane.b32.xlu2 %v489_v19, %s747_s15 }
 0x2de   : >> { %v551_v10 = vpop.permute.xlu1 %550 }
 0x2df   : >> { %v553_v12 = vmul.f32 %v551_v10, %v548_v11 }
 0x2e1   : >> { %v555_v18 = vadd.f32 %v554_v13, %v553_v12  }
 0x333   : > { %418 = sbr.rel (!%p416_p4) target bundleno = 151 (0x97), region = 97 }
 0x335   : >> { %v558_v14 = vpop.permute.xlu2 %557 }
 0x336   : >> { %562 = vst.msk [vmem:[%s560_s22] sm:$0x1] %vm561_vm12, %v558_v14 }
 0x337   : >> { %565 = vst.msk [vmem:[%s563_s23] sm:$0x1] %vm564_vm13, %v555_v18 }
 0x33e   : > { %v566_v15 = vld [vmem:[#allocation4] sm:$0xff]  ;;  %v567_v16 = vld [vmem:[#allocation4 + $0x8] sm:$0xff] }
 0x33f   : > { %569 = vst.msk [vmem:[%s820_s21] sm:$0xff] %vm568_vm14, %v566_v15 }
 0x340   : > { %570 = vst.msk [vmem:[%s820_s21 + $0x8] sm:$0xff] %vm568_vm14, %v567_v16 }
 0x341 PF: > { %s19_s30 = sadd.s32 1, %s733_s30  }
 0x342   : > { %p16_p5 = scmp.ge.s32.totalorder %s19_s30, 4  }
 0x344   :  { %18 = sbr.rel (!%p16_p5) target bundleno = 1 (0x1), region = 108 }

// kernel: forward.15
= control target key start
LH: loop header
LB: loop body
LE: loop exit
PB: predicated region body
PF: predicated region fallthrough
CT: control target
= control target key end

     0   :  { %s596_s18 = smov 0   ;;  %s668_s0 = inlined_call_operand.vmem [shape: f32[2,16,18], index: 0, kind: input, shape index: {}]   ;;  %s669_s1 = inlined_call_operand.vmem [shape: f32[3,16,16], index: 1, kind: input, shape index: {}]   ;;  %s670_s2 = inlined_call_operand.vmem [shape: f32[16,1], index: 2, kind: input, shape index: {}]   ;;  %s671_s3 = inlined_call_operand.vmem [shape: f32[16,1], index: 3, kind: input, shape index: {}]   ;;  %s672_s4 = inlined_call_operand.vmem [shape: f32[16,1], index: 4, kind: input, shape index: {}]   ;;  %s673_s5 = inlined_call_operand.vmem [shape: f32[2,16,16], index: 5, kind: output, shape index: {}]  }
   0x1 LB: > { %s492_s19 = sadd.s32 4294967295, %s560_s18   ;;  %p496_p0 = scmp.ge.s32.totalorder %s560_s18, 1  ;;  %s560_s18 = sphi %s596_s18, %s15_s18  }
   0x2   : > { %p187_p1 = scmp.lt.s32.totalorder %s560_s18, 3 }
   0x4   : > { %p188_p2 = pnand %p496_p0, %p187_p1 }
   0x5   : > { %p215_p3 = scmp.lt.s32.totalorder (!%p188_p2), %s492_s19, 1  ;;  %s562_s24 = smov (!%p188_p2), 126  }
   0x6   : > { %191 = sbr.rel (%p188_p2) target bundleno = 690 (0x2b2), region = 40  ;;  %s563_s25 = smov (!%p188_p2), 127  }
   0xb   : > { %s675_s19 = smov (!%p215_p3, %s492_s19), 1  ;;  %v339_v3 = vld [vmem:[%s670_s2] sm:$0xff]  ;;  %v564_v4 = vmov 0   ;;  %v340_v5 = vld [vmem:[%s670_s2 + $0x8] sm:$0xff]  ;;  %vm240_vm0 = vcmask 130048   ;;  %v501_v17 = vld [vmem:[%s669_s1 + $0x10] sm:$0xff] }
   0xc   : > { %s513_s20 = sshll.u32 %s675_s19, 4  ;;  %543 = vset.pattern.permute.xlu1 %v564_v4  ;;  %544 = vset.pattern.permute.xlu0 %v564_v4  ;;  %v227_v6 = vld [vmem:[%s669_s1] sm:$0xff]  ;;  %v406_v7 = vld [vmem:[%s671_s3 + $0x8] sm:$0xff]  ;;  %v502_v18 = vld [vmem:[%s669_s1 + $0x18] sm:$0xff]  ;;  %v565_v44 = vmov 256.0  }
   0xd   : > { %s219_s23 = scalar_lea.vmem %s668_s0, %s513_s20  ;;  %343 = vperm.xlu1 %543, %v339_v3   ;;  %545 = vset.pattern.permute.xlu2 %v564_v4  ;;  %v228_v8 = vld [vmem:[%s669_s1 + $0x8] sm:$0xff]  ;;  %v507_v13 = vld [vmem:[%s669_s1 + $0x20] sm:$0xff]  ;;  %546 = vrcp.f32 %v565_v44  ;;  %s224_s7 = scalar_lea.vmem %s673_s5, %s513_s20 }
   0xe   : > { %v225_v0 = vld [vmem:[%s219_s23] sm:$0xff]  ;;  %v226_v1 = vld [vmem:[%s219_s23 + $0x8] sm:$0xff] }
   0xf   : > { %v533_v2 = vpack.i.bf16 %v225_v0, %v226_v1  ;;  %290 = vmatpush.msra.mxu1 %v226_v1  ;;  %v420_v9 = vld [vmem:[%s672_s4 + $0x8] sm:$0xff]  ;;  %v405_v45 = vld [vmem:[%s671_s3] sm:$0xff] }
  0x10   : > { %v508_v19 = vld [vmem:[%s669_s1 + $0x28] sm:$0xff]  ;;  %v419_v61 = vld [vmem:[%s672_s4] sm:$0xff] }
  0x11   : > { %534 = vrot.lane.b32.xlu0 %v533_v2, %s562_s24  ;;  %291 = vmatpush.msra.mxu1 %v225_v0 }
  0x12   : > { %505 = vmatmul.msk.f32.vlgmr.msra.gmra.mxu1 %vm240_vm0, %v227_v6 }
  0x13   : > { %v547_v46 = vpop.eup %546 }
  0x14   : > { %v367_v47 = vmul.f32 256.0, %v547_v46  ;;  %vm371_vm1 = vweird.f32 %v547_v46 }
  0x15   : > { %348 = vperm.xlu1 %543, %v340_v5  }
  0x16   : > { %v368_v48 = vsub.f32 1.0, %v367_v47 }
  0x18   : > { %v369_v49 = vmul.f32 %v547_v46, %v368_v48 }
  0x19   : > { %539 = vrot.lane.b32.xlu0 %v533_v2, %s563_s25 }
  0x1a   : > { %506 = vmatmul.msk.f32.gmra.mxu1 %vm240_vm0, %v228_v8  ;;  %v370_v50 = vadd.f32 %v547_v46, %v369_v49 }
  0x1c   : > { %v372_v51 = vsel %vm371_vm1, %v547_v46, %v370_v50 }
  0x1d   : > { %414 = vperm.xlu1 %543, %v406_v7  }
  0x21   : > { %409 = vperm.xlu0 %544, %v405_v45  }
  0x25   : > { %428 = vperm.xlu1 %543, %v420_v9  }
  0x7f   : > { %v344_v22 = vpop.permute.xlu1 %343 }
  0x83   : > { %v535_v10 = vpop.permute.xlu0 %534 }
  0x84   : > { %v536_v11 = vunpack.i.l.bf16 %v535_v10  ;;  %v537_v12 = vunpack.i.h.bf16 %v535_v10 }
  0x86   : > { %328 = vmatpush.msra.mxu2 %v536_v11 }
  0x87   : > { %v349_v32 = vpop.permute.xlu1 %348 }
  0x88   : > { %329 = vmatpush.msra.mxu2 %v537_v12 }
  0x89   : > { %509 = vmatmul.msk.f32.vlgmr.msra.gmra.mxu2 %vm240_vm0, %v507_v13 }
  0x8b   : > { %v540_v14 = vpop.permute.xlu0 %539 }
  0x8c   : > { %v541_v15 = vunpack.i.l.bf16 %v540_v14  ;;  %v542_v16 = vunpack.i.h.bf16 %v540_v14 }
  0x8e   : > { %261 = vmatpush.msra.mxu0 %v541_v15  ;;  %515 = vmatpush.msra.mxu3 %v541_v15 }
  0x8f   : > { %v293_v20 = vpop.f32.mrf.mxu1  ;;  %v415_v11 = vpop.permute.xlu1 %414 }
  0x90   : > { %262 = vmatpush.msra.mxu0 %v542_v16  ;;  %516 = vmatpush.msra.mxu3 %v542_v16 }
  0x91   : > { %503 = vmatmul.msk.f32.vlgmr.msra.gmra.mxu0 %vm240_vm0, %v501_v17  ;;  %504 = vmatmul.msk.f32.vlgmr.msra.gmra.mxu3 %vm240_vm0, %v502_v18 }
  0x92   : > { %510 = vmatmul.msk.f32.gmra.mxu2 %vm240_vm0, %v508_v19 }
  0x93   : > { %v410_v15 = vpop.permute.xlu0 %409 }
  0x97   : > { %v296_v25 = vpop.f32.mrf.mxu1 }
 0x10c   : > { %v331_v21 = vpop.f32.mrf.mxu2 }
 0x10e   : > { %v264_v23 = vpop.f32.mrf.mxu0 }
 0x10f   : > { %v294_v24 = vadd.f32 %v293_v20, %v264_v23 }
 0x111   : > { %v337_v26 = vadd.f32 %v331_v21, %v294_v24 }
 0x113   : > { %v351_v30 = vadd.f32 %v344_v22, %v337_v26  ;;  %v429_v22 = vpop.permute.xlu1 %428 }
 0x114   : > { %v267_v27 = vpop.f32.mrf.mxu3 }
 0x115   : > { %v297_v28 = vadd.f32 %v296_v25, %v267_v27  ;;  %v334_v29 = vpop.f32.mrf.mxu2  ;;  %v353_v34 = vsel %vm240_vm0, %v351_v30, 0.0 }
 0x117   : > { %v338_v31 = vadd.f32 %v334_v29, %v297_v28 }
 0x119   : > { %v352_v33 = vadd.f32 %v349_v32, %v338_v31 }
 0x11b   : > { %v354_v35 = vsel %vm240_vm0, %v352_v33, 0.0 }
 0x11c   : > { %v355_v36 = vadd.f32 %v354_v35, %v353_v34 }
 0x11e   : > { %356 = vadd.xlane.f32.xlu2 %v355_v36 }
 0x191   : > { %v357_v37 = vpop.xlane.xlu2 %356 }
 0x192   : > { %v358_v38 = vrot.slane %v357_v37, 4 }
 0x194   : > { %v359_v39 = vadd.f32 %v358_v38, %v357_v37 }
 0x196   : > { %v360_v40 = vrot.slane %v359_v39, 2 }
 0x198   : > { %v361_v41 = vadd.f32 %v360_v40, %v359_v39 }
 0x19a   : > { %v362_v42 = vrot.slane %v361_v41, 1 }
 0x19c   : > { %v363_v43 = vadd.f32 %v362_v42, %v361_v41 }
 0x19e   : > { %517 = vpush %v363_v43 }
 0x1cf   : > { %s518_s26 = spop %517 }
 0x1d0   : > { %v365_v52 = vstv %s518_s26 }
 0x1d1   : > { %v373_v53 = vmul.f32 %v372_v51, %v365_v52 }
 0x1d3   : > { %v374_v54 = vsub.f32 %v351_v30, %v373_v53  ;;  %v375_v55 = vsub.f32 %v352_v33, %v373_v53 }
 0x1d5   : > { %v376_v56 = vmul.f32 %v374_v54, %v374_v54  ;;  %v377_v57 = vmul.f32 %v375_v55, %v375_v55 }
 0x1d7   : > { %v378_v58 = vsel %vm240_vm0, %v376_v56, 0.0  ;;  %v379_v59 = vsel %vm240_vm0, %v377_v57, 0.0 }
 0x1d8   : > { %v380_v60 = vadd.f32 %v379_v59, %v378_v58 }
 0x1da   : > { %381 = vadd.xlane.f32.xlu2 %v380_v60 }
 0x1f2   : > { %423 = vperm.xlu2 %545, %v419_v61  }
 0x24d   : > { %v382_v62 = vpop.xlane.xlu2 %381 }
 0x24e   : > { %v383_v63 = vrot.slane %v382_v62, 4 }
 0x250   : > { %v384_v0 = vadd.f32 %v383_v63, %v382_v62 }
 0x252   : > { %v385_v1 = vrot.slane %v384_v0, 2 }
 0x254   : > { %v386_v2 = vadd.f32 %v385_v1, %v384_v0 }
 0x255   : > { %v424_v19 = vpop.permute.xlu2 %423 }
 0x256   : > { %v387_v3 = vrot.slane %v386_v2, 1 }
 0x258   : > { %v388_v4 = vadd.f32 %v387_v3, %v386_v2 }
 0x25a   : > { %519 = vpush %v388_v4 }
 0x28b   : > { %s520_s29 = spop %519 }
 0x28c   : > { %v390_v5 = vstv %s520_s29 }
 0x28d   : > { %v391_v6 = vmul.f32 %v390_v5, %v372_v51 }
 0x28f   : > { %v392_v7 = vadd.f32 1e-05, %v391_v6 }
 0x291   : > { %548 = vrsqrt.f32 %v392_v7  ;;  %vm399_vm3 = vweird.f32 %v392_v7 }
 0x297   : > { %v549_v8 = vpop.eup %548 }
 0x298   : > { %v394_v9 = vmul.f32 %v549_v8, %v392_v7  ;;  %vm400_vm2 = vweird.f32 %v549_v8 }
 0x299   : > { %vm401_vm4 = vmor %vm399_vm3, %vm400_vm2 }
 0x29a   : > { %v395_v10 = vmul.f32 %v549_v8, %v394_v9 }
 0x29c   : > { %v396_v12 = vmul.f32 0.5, %v395_v10 }
 0x29e   : > { %v397_v13 = vsub.f32 1.5, %v396_v12 }
 0x2a0   : > { %v398_v14 = vmul.f32 %v549_v8, %v397_v13 }
 0x2a2   : > { %v402_v16 = vsel %vm401_vm4, %v549_v8, %v398_v14 }
 0x2a3   : > { %v403_v17 = vmul.f32 %v402_v16, %v374_v54  ;;  %v404_v18 = vmul.f32 %v402_v16, %v375_v55 }
 0x2a5   : > { %v417_v20 = vmul.f32 %v410_v15, %v403_v17  ;;  %v418_v21 = vmul.f32 %v415_v11, %v404_v18 }
 0x2a7   : > { %v432_v23 = vadd.f32 %v429_v22, %v418_v21  ;;  %v431_v24 = vadd.f32 %v424_v19, %v417_v20 }
 0x2a9   : > { %550 = vtanh.f32 %v432_v23 }
 0x2aa   : > { %552 = vtanh.f32 %v431_v24 }
 0x2af   : > { %v551_v25 = vpop.eup %550 }
 0x2b0   : > { %v553_v26 = vpop.eup %552  ;;  %436 = vst.msk [vmem:[%s224_s7 + $0x8] sm:$0xff] %vm240_vm0, %v551_v25 }
 0x2b1   : > { %435 = vst.msk [vmem:[%s224_s7] sm:$0xff] %vm240_vm0, %v553_v26 }
 0x2b2 PF: > { %s15_s18 = sadd.s32 1, %s560_s18  }
 0x2b3   : > { %p12_p4 = scmp.ge.s32.totalorder %s15_s18, 4  }
 0x2b5   :  { %14 = sbr.rel (!%p12_p4) target bundleno = 1 (0x1), region = 72 }

// kernel: forward.12
= control target key start
LH: loop header
LB: loop body
LE: loop exit
PB: predicated region body
PF: predicated region fallthrough
CT: control target
= control target key end

     0   :  { %s794_s30 = smov 0   ;;  %s901_s0 = inlined_call_operand.vmem [shape: f32[2,16,16], index: 0, kind: input, shape index: {}]   ;;  %s902_s1 = inlined_call_operand.vmem [shape: f32[16,24], index: 1, kind: input, shape index: {}]   ;;  %s903_s2 = inlined_call_operand.vmem [shape: f32[8,24], index: 2, kind: input, shape index: {}]   ;;  %s904_s3 = inlined_call_operand.vmem [shape: f32[1,24], index: 3, kind: input, shape index: {}]   ;;  %s905_s4 = inlined_call_operand.vmem [shape: f32[1,24], index: 4, kind: input, shape index: {}]   ;;  %s906_s5 = inlined_call_operand.vmem [shape: f32[16,24], index: 5, kind: input, shape index: {}]   ;;  %s907_s6 = inlined_call_operand.vmem [shape: f32[8,24], index: 6, kind: input, shape index: {}]   ;;  %s908_s7 = inlined_call_operand.vmem [shape: f32[1,24], index: 7, kind: input, shape index: {}]   ;;  %s909_s8 = inlined_call_operand.vmem [shape: f32[1,24], index: 8, kind: input, shape index: {}]   ;;  %s910_s9 = inlined_call_operand.vmem [shape: f32[2,16,16], index: 9, kind: output, shape index: {}]  }
   0x1 LB: > { %s635_s10 = sadd.s32 4294967295, %s727_s30   ;;  %p639_p0 = scmp.ge.s32.totalorder %s727_s30, 1  ;;  %s727_s30 = sphi %s794_s30, %s19_s30  }
   0x2   : > { %p287_p1 = scmp.lt.s32.totalorder %s727_s30, 3 }
   0x4   : > { %p288_p2 = pnand %p639_p0, %p287_p1 }
   0x5   : > { %p323_p3 = scmp.lt.s32.totalorder (!%p288_p2), %s635_s10, 1  ;;  %s856_s18 = smov (!%p288_p2), 0  }
   0x6   : > { %291 = sbr.rel (%p288_p2) target bundleno = 834 (0x342), region = 56 }
   0xb   : > { %v336_v0 = vld [vmem:[%s902_s1 + $0x8] sm:$0xff]  ;;  %v335_v2 = vld [vmem:[%s902_s1] sm:$0xff]  ;;  %s912_s10 = smov (!%p323_p3, %s635_s10), 1  ;;  %vm341_vm0 = vcmask 130048   ;;  %vm371_vm1 = vcmask 195584   ;;  %v852_v20 = vmov 0.0  }
   0xc   : > { %v375_v1 = vld [vmem:[%s906_s5 + $0x8] sm:$0xff]  ;;  %656 = vmatpush.msra.mxu2 %v336_v0  ;;  %v374_v3 = vld [vmem:[%s906_s5] sm:$0xff]  ;;  %362 = vmatpush.msra.mxu0 %v336_v0  ;;  %s654_s19 = sshll.u32 %s912_s10, 4  ;;  %v854_v21 = vmov 0.0  }
   0xd   : > { %658 = vmatpush.msra.mxu3 %v375_v1  ;;  %394 = vmatpush.msra.mxu1 %v375_v1  ;;  %s327_s22 = scalar_lea.vmem %s901_s0, %s654_s19  ;;  %s820_s25 = scalar_lea.vmem %s910_s9, %s654_s19  ;;  %v829_v6 = vld [vmem:[%s903_s2] sm:$0xff] }
   0xe   : > { %657 = vmatpush.msra.mxu2 %v335_v2  ;;  %363 = vmatpush.msra.mxu0 %v335_v2  ;;  %v334_v4 = vld [vmem:[%s327_s22 + $0x8] sm:$0xff]  ;;  %v333_v5 = vld [vmem:[%s327_s22] sm:$0xff] }
   0xf   : > { %659 = vmatpush.msra.mxu3 %v374_v3  ;;  %395 = vmatpush.msra.mxu1 %v374_v3  ;;  %v834_v7 = vld [vmem:[%s905_s4] sm:$0x1] }
  0x10   : > { %645 = vmatmul.msk.f32.vlgmr.msra.gmra.mxu2 %vm341_vm0, %v334_v4  ;;  %647 = vmatmul.msk.f32.vlgmr.msra.gmra.mxu3 %vm341_vm0, %v334_v4  ;;  %v839_v8 = vld [vmem:[%s907_s6] sm:$0xff] }
  0x11   : > { %644 = vmatmul.msk.f32.vlgmr.msra.gmra.mxu0 %vm341_vm0, %v333_v5  ;;  %646 = vmatmul.msk.f32.vlgmr.msra.gmra.mxu1 %vm341_vm0, %v333_v5  ;;  %v844_v9 = vld [vmem:[%s909_s8] sm:$0x1] }
  0x12   : > { %v695_v10 = vld [vmem:[%s904_s3] ss:$0 sm:$0xff] }
  0x13   : > { %v696_v11 = vld [vmem:[%s908_s7] ss:$0 sm:$0xff] }
  0x8e   : > { %v365_v12 = vpop.f32.mrf.mxu0  ;;  %v397_v13 = vpop.f32.mrf.mxu1 }
  0x8f   : > { %v366_v14 = vadd.f32 %v695_v10, %v365_v12  ;;  %v398_v15 = vadd.f32 %v696_v11, %v397_v13 }
  0x91   : > { %372 = vst.msk [vmem:[#allocation2] sm:$0xff] %vm371_vm1, %v366_v14 }
  0x92   : > { %403 = vst.msk [vmem:[#allocation3] sm:$0xff] %vm371_vm1, %v398_v15 }
  0x93   : > { %v368_v16 = vpop.f32.mrf.mxu2  ;;  %v400_v17 = vpop.f32.mrf.mxu3 }
  0x94   : > { %v369_v18 = vadd.f32 %v695_v10, %v368_v16  ;;  %v401_v19 = vadd.f32 %v696_v11, %v400_v17 }
  0x96   : > { %373 = vst.msk [vmem:[#allocation2 + $0x8] sm:$0xff] %vm371_vm1, %v369_v18 }
  0x97   : > { %404 = vst.msk [vmem:[#allocation3 + $0x8] sm:$0xff] %vm371_vm1, %v401_v19 }
  0x98 LB: >> { %441 = vmatpush.msra.mxu0 %v829_v6  ;;  %507 = vmatpush.msra.mxu1 %v839_v8  ;;  %s741_s19 = smov 120   ;;  %vm423_vm2 = vcmask 64512   ;;  %s742_s20 = smov 112   ;;  %vm556_vm11 = vcmask 57344   ;;  %vm559_vm12 = vcmask 122944   ;;  %s739_s18 = sphi %s856_s18, %s414_s18   ;;  %v735_v21 = vphi %v854_v21, %v484_v21   ;;  %v731_v20 = vphi %v852_v20, %v550_v20  }
  0x99   : >> { %421 = vrot.lane.b32.xlu0 %v735_v21, %s741_s19  ;;  %s418_s21 = scalar_lea.vmem [#allocation2], %s739_s18  ;;  %s417_s22 = ssub.s32 15, %s739_s18 }
  0x9a   : >> { %s485_s23 = scalar_lea.vmem [#allocation3], %s417_s22  ;;  %s743_s24 = smov 16  }
  0x9b   : >> { %s555_s26 = scalar_lea.vmem [#allocation4], %s739_s18  ;;  %s558_s27 = scalar_lea.vmem [#allocation4], %s417_s22 }
  0x9c   : >> { %s414_s18 = sadd.s32 1, %s739_s18  }
  0x9d   : >> { %v419_v28 = vld [vmem:[%s418_s21] sm:$0x1]  ;;  %p411_p4 = scmp.ge.s32.totalorder %s414_s18, 16  }
  0x9e   : >> { %v486_v31 = vld [vmem:[%s485_s23] sm:$0x1] }
  0xa1   : >> { %488 = vrot.lane.b32.xlu0 %v731_v20, %s741_s19 }
 0x10b   : >> { %v422_v22 = vpop.permute.xlu0 %421 }
 0x10c   : >> { %648 = vmatmul.msk.f32.vlgmr.msra.gmra.mxu0 %vm423_vm2, %v422_v22 }
 0x113   : >> { %v489_v23 = vpop.permute.xlu0 %488 }
 0x114   : >> { %650 = vmatmul.msk.f32.vlgmr.msra.gmra.mxu1 %vm423_vm2, %v489_v23 }
 0x189   : >> { %v443_v24 = vpop.f32.mrf.mxu0 }
 0x18a   : >> { %v444_v25 = vadd.f32 %v443_v24, %v834_v7 }
 0x18c   : >> { %467 = vrot.lane.b32.xlu1 %v444_v25, %s742_s20  ;;  %v446_v29 = vadd.f32 %v444_v25, %v419_v28 }
 0x18e   : >> { %v649_v30 = vmul.f32 -1.442695, %v446_v29 }
 0x190   : >> { %697 = vpow2.f32 %v649_v30 }
 0x191   : >> { %v509_v26 = vpop.f32.mrf.mxu1 }
 0x192   : >> { %v510_v27 = vadd.f32 %v509_v26, %v844_v9 }
 0x194   : >> { %533 = vrot.lane.b32.xlu1 %v510_v27, %s742_s20  ;;  %v512_v32 = vadd.f32 %v510_v27, %v486_v31 }
 0x196   : >> { %v651_v33 = vmul.f32 -1.442695, %v512_v32  ;;  %v698_v34 = vpop.eup %697 }
 0x197   : >> { %v450_v35 = vadd.f32 1.0, %v698_v34 }
 0x198   : >> { %699 = vpow2.f32 %v651_v33 }
 0x199   : >> { %701 = vrcp.f32 %v450_v35  ;;  %v462_v46 = vand.u32 2147483648, %v450_v35  ;;  %vm456_vm4 = vweird.f32 %v450_v35  ;;  %v460_v47 = vand.u32 2147483647, %v450_v35 }
 0x19b   : >> { %v463_v50 = vor.u32 1.1754944e-38, %v462_v46  ;;  %vm461_vm6 = vcmp.eq.f32.partialorder %v460_v47, 8.507059e+37 }
 0x19e   : >> { %v700_v36 = vpop.eup %699 }
 0x19f   : >> { %v516_v37 = vadd.f32 1.0, %v700_v36  ;;  %v702_v38 = vpop.eup %701 }
 0x1a0   : >> { %v452_v39 = vmul.f32 %v702_v38, %v450_v35  ;;  %vm457_vm3 = vweird.f32 %v702_v38 }
 0x1a1   : >> { %703 = vrcp.f32 %v516_v37  ;;  %vm458_vm5 = vmor %vm456_vm4, %vm457_vm3  ;;  %vm522_vm7 = vweird.f32 %v516_v37  ;;  %v528_v53 = vand.u32 2147483648, %v516_v37  ;;  %v526_v56 = vand.u32 2147483647, %v516_v37 }
 0x1a2   : >> { %v453_v40 = vsub.f32 1.0, %v452_v39 }
 0x1a3   : >> { %v529_v57 = vor.u32 1.1754944e-38, %v528_v53  ;;  %vm527_vm10 = vcmp.eq.f32.partialorder %v526_v56, 8.507059e+37 }
 0x1a4   : >> { %v454_v42 = vmul.f32 %v702_v38, %v453_v40 }
 0x1a6   : >> { %v455_v44 = vadd.f32 %v702_v38, %v454_v42 }
 0x1a7   : >> { %v704_v41 = vpop.eup %703 }
 0x1a8   : >> { %v518_v43 = vmul.f32 %v704_v41, %v516_v37  ;;  %v459_v48 = vsel %vm458_vm5, %v702_v38, %v455_v44  ;;  %vm523_vm8 = vweird.f32 %v704_v41 }
 0x1a9   : >> { %v464_v52 = vsel %vm461_vm6, %v463_v50, %v459_v48  ;;  %vm524_vm9 = vmor %vm522_vm7, %vm523_vm8 }
 0x1aa   : >> { %v519_v45 = vsub.f32 1.0, %v518_v43  ;;  %v477_v4 = vsub.f32 1.0, %v464_v52  ;;  %v483_v10 = vmul.f32 %v735_v21, %v464_v52 }
 0x1ac   : >> { %v520_v49 = vmul.f32 %v704_v41, %v519_v45 }
 0x1ae   : >> { %v521_v55 = vadd.f32 %v704_v41, %v520_v49 }
 0x1b0   : >> { %v525_v58 = vsel %vm524_vm9, %v704_v41, %v521_v55 }
 0x1b1   : >> { %v530_v60 = vsel %vm527_vm10, %v529_v57, %v525_v58 }
 0x1b2   : >> { %v543_v13 = vsub.f32 1.0, %v530_v60  ;;  %v549_v15 = vmul.f32 %v731_v20, %v530_v60 }
 0x1fe   : >> { %v468_v51 = vpop.permute.xlu1 %467 }
 0x1ff   : >> { %v470_v54 = vmul.f32 %v468_v51, %v464_v52 }
 0x201   : >> { %472 = vrot.lane.b32.xlu2 %v470_v54, %s743_s24 }
 0x206   : >> { %v534_v59 = vpop.permute.xlu1 %533 }
 0x207   : >> { %v536_v61 = vmul.f32 %v534_v59, %v530_v60 }
 0x209   : >> { %538 = vrot.lane.b32.xlu2 %v536_v61, %s743_s24 }
 0x25b   : >> { %v473_v62 = vpop.permute.xlu2 %472 }
 0x25c   : >> { %v475_v63 = vadd.f32 %v473_v62, %v419_v28 }
 0x25e   : >> { %705 = vtanh.f32 %v475_v63 }
 0x263   : >> { %v539_v0 = vpop.permute.xlu2 %538 }
 0x264   : >> { %v706_v1 = vpop.eup %705  ;;  %v541_v2 = vadd.f32 %v539_v0, %v486_v31 }
 0x265   : >> { %479 = vrot.lane.b32.xlu0 %v706_v1, %s741_s19 }
 0x266   : >> { %707 = vtanh.f32 %v541_v2 }
 0x26c   : >> { %v708_v3 = vpop.eup %707 }
 0x26d   : >> { %545 = vrot.lane.b32.xlu1 %v708_v3, %s741_s19 }
 0x2d7   : >> { %v480_v5 = vpop.permute.xlu0 %479 }
 0x2d8   : >> { %v482_v11 = vmul.f32 %v480_v5, %v477_v4 }
 0x2da   : >> { %v484_v21 = vadd.f32 %v483_v10, %v482_v11  }
 0x2dc   : >> { %552 = vrot.lane.b32.xlu2 %v484_v21, %s741_s19 }
 0x2df   : >> { %v546_v12 = vpop.permute.xlu1 %545 }
 0x2e0   : >> { %v548_v14 = vmul.f32 %v546_v12, %v543_v13 }
 0x2e2   : >> { %v550_v20 = vadd.f32 %v549_v15, %v548_v14  }
 0x334   : > { %413 = sbr.rel (!%p411_p4) target bundleno = 152 (0x98), region = 97 }
 0x336   : >> { %v553_v16 = vpop.permute.xlu2 %552 }
 0x337   : >> { %557 = vst.msk [vmem:[%s555_s26] sm:$0x1] %vm556_vm11, %v553_v16 }
 0x338   : >> { %560 = vst.msk [vmem:[%s558_s27] sm:$0x1] %vm559_vm12, %v550_v20 }
 0x33f   : > { %v561_v17 = vld [vmem:[#allocation4] sm:$0xff]  ;;  %v562_v18 = vld [vmem:[#allocation4 + $0x8] sm:$0xff] }
 0x340   : > { %563 = vst.msk [vmem:[%s820_s25] sm:$0xff] %vm341_vm0, %v561_v17 }
 0x341   : > { %564 = vst.msk [vmem:[%s820_s25 + $0x8] sm:$0xff] %vm341_vm0, %v562_v18 }
 0x342 PF: > { %s19_s30 = sadd.s32 1, %s727_s30  }
 0x343   : > { %p16_p5 = scmp.ge.s32.totalorder %s19_s30, 4  }
 0x345   :  { %18 = sbr.rel (!%p16_p5) target bundleno = 1 (0x1), region = 108 }

// kernel: forward.16
= control target key start
LH: loop header
LB: loop body
LE: loop exit
PB: predicated region body
PF: predicated region fallthrough
CT: control target
= control target key end

     0   :  { %s563_s21 = smov 0   ;;  %s620_s0 = inlined_call_operand.vmem [shape: f32[2,16,16], index: 0, kind: input, shape index: {}]   ;;  %s621_s1 = inlined_call_operand.vmem [shape: f32[1,16,16], index: 1, kind: input, shape index: {}]   ;;  %s622_s2 = inlined_call_operand.vmem [shape: f32[16,1], index: 2, kind: input, shape index: {}]   ;;  %s623_s3 = inlined_call_operand.vmem [shape: f32[16,1], index: 3, kind: input, shape index: {}]   ;;  %s624_s4 = inlined_call_operand.vmem [shape: f32[16,1], index: 4, kind: input, shape index: {}]   ;;  %s625_s5 = inlined_call_operand.vmem [shape: f32[2,16,16], index: 5, kind: input, shape index: {}]   ;;  %s626_s6 = inlined_call_operand.vmem [shape: f32[2,16,16], index: 6, kind: output, shape index: {}]  }
   0x1 LB: > { %s473_s22 = sadd.s32 4294967295, %s524_s21   ;;  %p477_p0 = scmp.ge.s32.totalorder %s524_s21, 1  ;;  %s524_s21 = sphi %s563_s21, %s16_s21  }
   0x2   : > { %p222_p1 = scmp.lt.s32.totalorder %s524_s21, 3 }
   0x4   : > { %p223_p2 = pnand %p477_p0, %p222_p1 }
   0x5   : > { %p257_p3 = scmp.lt.s32.totalorder (!%p223_p2), %s473_s22, 1 }
   0x6   : > { %226 = sbr.rel (%p223_p2) target bundleno = 555 (0x22b), region = 44 }
   0xb   : > { %v276_v0 = vld [vmem:[%s622_s2] sm:$0xff]  ;;  %v526_v1 = vmov 0   ;;  %s628_s22 = smov (!%p257_p3, %s473_s22), 1  ;;  %v277_v4 = vld [vmem:[%s622_s2 + $0x8] sm:$0xff]  ;;  %vm288_vm0 = vcmask 130048   ;;  %v527_v24 = vmov 256.0  }
   0xc   : > { %507 = vset.pattern.permute.xlu0 %v526_v1  ;;  %509 = vset.pattern.permute.xlu1 %v526_v1  ;;  %s574_s25 = sshll.u32 %s628_s22, 4  ;;  %v274_v5 = vld [vmem:[%s621_s1] sm:$0xff]  ;;  %v275_v6 = vld [vmem:[%s621_s1 + $0x8] sm:$0xff]  ;;  %510 = vrcp.f32 %v527_v24 }
   0xd   : > { %280 = vperm.xlu0 %507, %v276_v0   ;;  %508 = vset.pattern.permute.xlu2 %v526_v1  ;;  %s261_s28 = scalar_lea.vmem %s620_s0, %s574_s25  ;;  %v384_v7 = vld [vmem:[%s624_s4] sm:$0xff]  ;;  %v371_v41 = vld [vmem:[%s623_s3 + $0x8] sm:$0xff]  ;;  %s266_s24 = scalar_lea.vmem %s625_s5, %s574_s25 }
   0xe   : > { %v273_v2 = vld [vmem:[%s261_s28 + $0x8] sm:$0xff]  ;;  %v272_v3 = vld [vmem:[%s261_s28] sm:$0xff]  ;;  %s271_s28 = scalar_lea.vmem %s626_s6, %s574_s25 }
   0xf   : > { %309 = vmatpush.msra.mxu0 %v273_v2  ;;  %491 = vmatpush.msra.mxu1 %v273_v2  ;;  %v370_v35 = vld [vmem:[%s623_s3] sm:$0xff]  ;;  %v385_v42 = vld [vmem:[%s624_s4 + $0x8] sm:$0xff] }
  0x10   : > { %374 = vperm.xlu2 %508, %v370_v35  }
  0x11   : > { %310 = vmatpush.msra.mxu0 %v272_v3  ;;  %492 = vmatpush.msra.mxu1 %v272_v3 }
  0x12   : > { %484 = vmatmul.msk.f32.vlgmr.msra.gmra.mxu0 %vm288_vm0, %v274_v5  ;;  %485 = vmatmul.msk.f32.vlgmr.msra.gmra.mxu1 %vm288_vm0, %v275_v6  ;;  %v511_v25 = vpop.eup %510  ;;  %v400_v6 = vld [vmem:[%s266_s24] sm:$0xff] }
  0x13   : > { %v332_v26 = vmul.f32 256.0, %v511_v25  ;;  %vm336_vm1 = vweird.f32 %v511_v25 }
  0x15   : > { %285 = vperm.xlu0 %507, %v277_v4   ;;  %v333_v27 = vsub.f32 1.0, %v332_v26 }
  0x17   : > { %v334_v28 = vmul.f32 %v511_v25, %v333_v27 }
  0x18   : > { %379 = vperm.xlu2 %508, %v371_v41  }
  0x19   : > { %v335_v29 = vadd.f32 %v511_v25, %v334_v28 }
  0x1b   : > { %v337_v30 = vsel %vm336_vm1, %v511_v25, %v335_v29 }
  0x1d   : > { %388 = vperm.xlu0 %507, %v384_v7   ;;  %v401_v7 = vld [vmem:[%s266_s24 + $0x8] sm:$0xff] }
  0x6a   : > { %v375_v56 = vpop.permute.xlu2 %374 }
  0x72   : > { %v380_v63 = vpop.permute.xlu2 %379 }
  0x7f   : > { %v281_v8 = vpop.permute.xlu0 %280 }
  0x87   : > { %v286_v10 = vpop.permute.xlu0 %285 }
  0x8f   : > { %v312_v9 = vpop.f32.mrf.mxu0  ;;  %v315_v12 = vpop.f32.mrf.mxu1 }
  0x90   : > { %v313_v11 = vadd.f32 %v312_v9, %v281_v8  ;;  %v316_v13 = vadd.f32 %v315_v12, %v286_v10  ;;  %v389_v3 = vpop.permute.xlu0 %388 }
  0x92   : > { %v318_v14 = vsel %vm288_vm0, %v313_v11, 0.0  ;;  %v319_v15 = vsel %vm288_vm0, %v316_v13, 0.0 }
  0x93   : > { %v320_v16 = vadd.f32 %v319_v15, %v318_v14 }
  0x95   : > { %321 = vadd.xlane.f32.xlu1 %v320_v16 }
 0x108   : > { %v322_v17 = vpop.xlane.xlu1 %321 }
 0x109   : > { %v323_v18 = vrot.slane %v322_v17, 4 }
 0x10b   : > { %v324_v19 = vadd.f32 %v323_v18, %v322_v17 }
 0x10d   : > { %v325_v20 = vrot.slane %v324_v19, 2 }
 0x10f   : > { %v326_v21 = vadd.f32 %v325_v20, %v324_v19 }
 0x111   : > { %v327_v22 = vrot.slane %v326_v21, 1 }
 0x113   : > { %v328_v23 = vadd.f32 %v327_v22, %v326_v21 }
 0x115   : > { %493 = vpush %v328_v23 }
 0x146   : > { %s494_s13 = spop %493 }
 0x147   : > { %v330_v31 = vstv %s494_s13 }
 0x148   : > { %v338_v32 = vmul.f32 %v337_v30, %v330_v31 }
 0x14a   : > { %v339_v33 = vsub.f32 %v313_v11, %v338_v32  ;;  %v340_v34 = vsub.f32 %v316_v13, %v338_v32 }
 0x14c   : > { %v341_v36 = vmul.f32 %v339_v33, %v339_v33  ;;  %v342_v37 = vmul.f32 %v340_v34, %v340_v34 }
 0x14e   : > { %v343_v38 = vsel %vm288_vm0, %v341_v36, 0.0  ;;  %v344_v39 = vsel %vm288_vm0, %v342_v37, 0.0 }
 0x14f   : > { %v345_v40 = vadd.f32 %v344_v39, %v343_v38 }
 0x151   : > { %346 = vadd.xlane.f32.xlu1 %v345_v40 }
 0x16a   : > { %393 = vperm.xlu1 %509, %v385_v42  }
 0x1c4   : > { %v347_v43 = vpop.xlane.xlu1 %346 }
 0x1c5   : > { %v348_v44 = vrot.slane %v347_v43, 4 }
 0x1c7   : > { %v349_v45 = vadd.f32 %v348_v44, %v347_v43 }
 0x1c9   : > { %v350_v46 = vrot.slane %v349_v45, 2 }
 0x1cb   : > { %v351_v47 = vadd.f32 %v350_v46, %v349_v45 }
 0x1cd   : > { %v352_v48 = vrot.slane %v351_v47, 1 }
 0x1cf   : > { %v353_v49 = vadd.f32 %v352_v48, %v351_v47 }
 0x1d1   : > { %495 = vpush %v353_v49 }
 0x1dc   : > { %v394_v0 = vpop.permute.xlu1 %393 }
 0x202   : > { %s496_s20 = spop %495 }
 0x203   : > { %v355_v50 = vstv %s496_s20 }
 0x204   : > { %v356_v51 = vmul.f32 %v355_v50, %v337_v30 }
 0x206   : > { %v357_v52 = vadd.f32 1e-05, %v356_v51 }
 0x208   : > { %512 = vrsqrt.f32 %v357_v52  ;;  %vm364_vm3 = vweird.f32 %v357_v52 }
 0x20e   : > { %v513_v53 = vpop.eup %512 }
 0x20f   : > { %v359_v54 = vmul.f32 %v513_v53, %v357_v52  ;;  %vm365_vm2 = vweird.f32 %v513_v53 }
 0x210   : > { %vm366_vm4 = vmor %vm364_vm3, %vm365_vm2 }
 0x211   : > { %v360_v55 = vmul.f32 %v513_v53, %v359_v54 }
 0x213   : > { %v361_v57 = vmul.f32 0.5, %v360_v55 }
 0x215   : > { %v362_v58 = vsub.f32 1.5, %v361_v57 }
 0x217   : > { %v363_v59 = vmul.f32 %v513_v53, %v362_v58 }
 0x219   : > { %v367_v60 = vsel %vm366_vm4, %v513_v53, %v363_v59 }
 0x21a   : > { %v368_v61 = vmul.f32 %v367_v60, %v339_v33  ;;  %v369_v62 = vmul.f32 %v367_v60, %v340_v34 }
 0x21c   : > { %v382_v1 = vmul.f32 %v375_v56, %v368_v61  ;;  %v383_v2 = vmul.f32 %v380_v63, %v369_v62 }
 0x21e   : > { %v396_v4 = vadd.f32 %v389_v3, %v382_v1  ;;  %v397_v5 = vadd.f32 %v394_v0, %v383_v2 }
 0x220   : > { %514 = vtanh.f32 %v396_v4 }
 0x221   : > { %516 = vtanh.f32 %v397_v5 }
 0x226   : > { %v515_v8 = vpop.eup %514 }
 0x227   : > { %v517_v9 = vpop.eup %516  ;;  %v402_v10 = vadd.f32 %v515_v8, %v400_v6 }
 0x228   : > { %v403_v11 = vadd.f32 %v517_v9, %v401_v7 }
 0x229   : > { %404 = vst.msk [vmem:[%s271_s28] sm:$0xff] %vm288_vm0, %v402_v10 }
 0x22a   : > { %405 = vst.msk [vmem:[%s271_s28 + $0x8] sm:$0xff] %vm288_vm0, %v403_v11 }
 0x22b PF: > { %s16_s21 = sadd.s32 1, %s524_s21  }
 0x22c   : > { %p13_p4 = scmp.ge.s32.totalorder %s16_s21, 4  }
 0x22e   :  { %15 = sbr.rel (!%p13_p4) target bundleno = 1 (0x1), region = 77 }

// kernel: forward.17
= control target key start
LH: loop header
LB: loop body
LE: loop exit
PB: predicated region body
PF: predicated region fallthrough
CT: control target
= control target key end

     0   :  { %s570_s18 = smov 0   ;;  %s619_s0 = inlined_call_operand.vmem [shape: f32[2,16,35], index: 0, kind: input, shape index: {}]   ;;  %s620_s1 = inlined_call_operand.vmem [shape: f32[4,8,16], index: 1, kind: input, shape index: {}]   ;;  %s621_s2 = inlined_call_operand.vmem [shape: f32[8,1], index: 2, kind: input, shape index: {}]   ;;  %s622_s3 = inlined_call_operand.vmem [shape: f32[8,1], index: 3, kind: input, shape index: {}]   ;;  %s623_s4 = inlined_call_operand.vmem [shape: f32[8,1], index: 4, kind: input, shape index: {}]   ;;  %s624_s5 = inlined_call_operand.vmem [shape: f32[2,8,32], index: 5, kind: output, shape index: {}]  }
   0x1 LB: > { %s469_s19 = sadd.s32 4294967295, %s533_s18   ;;  %p473_p0 = scmp.ge.s32.totalorder %s533_s18, 1  ;;  %s533_s18 = sphi %s570_s18, %s15_s18  }
   0x2   : > { %p187_p1 = scmp.lt.s32.totalorder %s533_s18, 3 }
   0x4   : > { %p188_p2 = pnand %p473_p0, %p187_p1 }
   0x5   : > { %p214_p3 = scmp.lt.s32.totalorder (!%p188_p2), %s469_s19, 1  ;;  %s535_s24 = smov (!%p188_p2), 126  }
   0x6   : > { %191 = sbr.rel (%p188_p2) target bundleno = 683 (0x2ab), region = 40  ;;  %s536_s25 = smov (!%p188_p2), 127  }
   0x7   : > { %s537_s26 = smov (!%p188_p2), 125  }
   0xb   : > { %s626_s19 = smov (!%p214_p3, %s469_s19), 1  ;;  %vm236_vm0 = vcmask 130048   ;;  %v225_v3 = vld [vmem:[%s620_s1] sm:$0xff]  ;;  %v538_v5 = vmov 0   ;;  %v480_v13 = vld [vmem:[%s620_s1 + $0x10] sm:$0xff]  ;;  %v477_v14 = vld [vmem:[%s620_s1 + $0x8] sm:$0xff] }
   0xc   : > { %s486_s20 = sshll.u32 %s626_s19, 4  ;;  %v347_v4 = vld [vmem:[%s621_s2] sm:$0xff]  ;;  %519 = vset.pattern.permute.xlu1 %v538_v5  ;;  %520 = vset.pattern.permute.xlu0 %v538_v5  ;;  %v482_v18 = vld [vmem:[%s620_s1 + $0x18] sm:$0xff]  ;;  %vm354_vm1 = vcmask 261120   ;;  %v539_v36 = vmov 256.0  }
   0xd   : > { %s218_s23 = scalar_lea.vmem %s619_s0, %s486_s20  ;;  %v407_v6 = vld [vmem:[%s623_s4] sm:$0xff]  ;;  %521 = vrcp.f32 %v539_v36  ;;  %s476_s20 = sshll.u32 %s626_s19, 3 }
   0xe   : > { %v223_v0 = vld [vmem:[%s218_s23] sm:$0xff]  ;;  %v224_v1 = vld [vmem:[%s218_s23 + $0x8] sm:$0xff]  ;;  %s222_s23 = scalar_lea.vmem %s624_s5, %s476_s20 }
   0xf   : > { %v504_v2 = vpack.i.bf16 %v223_v0, %v224_v1  ;;  %277 = vmatpush.msra.mxu1 %v224_v1  ;;  %v400_v37 = vld [vmem:[%s622_s3] sm:$0xff] }
  0x11   : > { %505 = vrot.lane.b32.xlu0 %v504_v2, %s535_s24  ;;  %515 = vrot.lane.b32.xlu1 %v504_v2, %s536_s25 }
  0x12   : > { %278 = vmatpush.msra.mxu1 %v223_v0 }
  0x13   : > { %479 = vmatmul.msk.f32.vlgmr.msra.gmra.mxu1 %vm236_vm0, %v225_v3  ;;  %v522_v38 = vpop.eup %521 }
  0x14   : > { %v367_v39 = vmul.f32 256.0, %v522_v38  ;;  %vm371_vm2 = vweird.f32 %v522_v38 }
  0x16   : > { %v368_v40 = vsub.f32 1.0, %v367_v39 }
  0x18   : > { %v369_v41 = vmul.f32 %v522_v38, %v368_v40 }
  0x19   : > { %510 = vrot.lane.b32.xlu0 %v504_v2, %s537_s26  ;;  %350 = vperm.xlu1 %519, %v347_v4  }
  0x1a   : > { %v370_v42 = vadd.f32 %v522_v38, %v369_v41 }
  0x1c   : > { %v372_v43 = vsel %vm371_vm2, %v522_v38, %v370_v42 }
  0x21   : > { %410 = vperm.xlu1 %519, %v407_v6   ;;  %403 = vperm.xlu0 %520, %v400_v37  }
  0x83   : > { %v506_v7 = vpop.permute.xlu0 %505  ;;  %v516_v8 = vpop.permute.xlu1 %515 }
  0x84   : > { %v507_v9 = vunpack.i.l.bf16 %v506_v7  ;;  %v517_v10 = vunpack.i.l.bf16 %v516_v8  ;;  %v518_v11 = vunpack.i.h.bf16 %v516_v8  ;;  %v508_v12 = vunpack.i.h.bf16 %v506_v7 }
  0x86   : > { %308 = vmatpush.msra.mxu2 %v507_v9  ;;  %254 = vmatpush.msra.mxu0 %v517_v10 }
  0x88   : > { %309 = vmatpush.msra.mxu2 %v508_v12  ;;  %255 = vmatpush.msra.mxu0 %v518_v11 }
  0x89   : > { %481 = vmatmul.msk.f32.vlgmr.msra.gmra.mxu2 %vm236_vm0, %v480_v13  ;;  %478 = vmatmul.msk.f32.vlgmr.msra.gmra.mxu0 %vm236_vm0, %v477_v14 }
  0x8b   : > { %v511_v15 = vpop.permute.xlu0 %510  ;;  %v351_v26 = vpop.permute.xlu1 %350 }
  0x8c   : > { %v512_v16 = vunpack.i.l.bf16 %v511_v15  ;;  %v513_v17 = vunpack.i.h.bf16 %v511_v15 }
  0x8e   : > { %340 = vmatpush.msra.mxu3 %v512_v16 }
  0x90   : > { %341 = vmatpush.msra.mxu3 %v513_v17  ;;  %v280_v20 = vpop.f32.mrf.mxu1 }
  0x91   : > { %483 = vmatmul.msk.f32.vlgmr.msra.gmra.mxu3 %vm236_vm0, %v482_v18 }
  0x93   : > { %v404_v1 = vpop.permute.xlu0 %403  ;;  %v411_v5 = vpop.permute.xlu1 %410 }
 0x106   : > { %v257_v19 = vpop.f32.mrf.mxu0 }
 0x107   : > { %v281_v21 = vadd.f32 %v280_v20, %v257_v19 }
 0x10c   : > { %v311_v22 = vpop.f32.mrf.mxu2 }
 0x10d   : > { %v314_v23 = vadd.f32 %v311_v22, %v281_v21 }
 0x114   : > { %v343_v24 = vpop.f32.mrf.mxu3 }
 0x115   : > { %v346_v25 = vadd.f32 %v343_v24, %v314_v23 }
 0x117   : > { %v353_v27 = vadd.f32 %v351_v26, %v346_v25 }
 0x119   : > { %v355_v28 = vsel %vm354_vm1, %v353_v27, 0.0 }
 0x11a   : > { %356 = vadd.xlane.f32.xlu2 %v355_v28 }
 0x18d   : > { %v357_v29 = vpop.xlane.xlu2 %356 }
 0x18e   : > { %v358_v30 = vrot.slane %v357_v29, 4 }
 0x190   : > { %v359_v31 = vadd.f32 %v358_v30, %v357_v29 }
 0x192   : > { %v360_v32 = vrot.slane %v359_v31, 2 }
 0x194   : > { %v361_v33 = vadd.f32 %v360_v32, %v359_v31 }
 0x196   : > { %v362_v34 = vrot.slane %v361_v33, 1 }
 0x198   : > { %v363_v35 = vadd.f32 %v362_v34, %v361_v33 }
 0x19a   : > { %487 = vpush %v363_v35 }
 0x1cb   : > { %s488_s16 = spop %487 }
 0x1cc   : > { %v365_v44 = vstv %s488_s16 }
 0x1cd   : > { %v373_v45 = vmul.f32 %v372_v43, %v365_v44 }
 0x1cf   : > { %v374_v46 = vsub.f32 %v353_v27, %v373_v45 }
 0x1d1   : > { %v375_v47 = vmul.f32 %v374_v46, %v374_v46 }
 0x1d3   : > { %v376_v48 = vsel %vm354_vm1, %v375_v47, 0.0 }
 0x1d4   : > { %377 = vadd.xlane.f32.xlu2 %v376_v48 }
 0x247   : > { %v378_v49 = vpop.xlane.xlu2 %377 }
 0x248   : > { %v379_v50 = vrot.slane %v378_v49, 4 }
 0x24a   : > { %v380_v51 = vadd.f32 %v379_v50, %v378_v49 }
 0x24c   : > { %v381_v52 = vrot.slane %v380_v51, 2 }
 0x24e   : > { %v382_v53 = vadd.f32 %v381_v52, %v380_v51 }
 0x250   : > { %v383_v54 = vrot.slane %v382_v53, 1 }
 0x252   : > { %v384_v55 = vadd.f32 %v383_v54, %v382_v53 }
 0x254   : > { %489 = vpush %v384_v55 }
 0x285   : > { %s490_s17 = spop %489 }
 0x286   : > { %v386_v56 = vstv %s490_s17 }
 0x287   : > { %v387_v57 = vmul.f32 %v386_v56, %v372_v43 }
 0x289   : > { %v388_v58 = vadd.f32 1e-05, %v387_v57 }
 0x28b   : > { %523 = vrsqrt.f32 %v388_v58  ;;  %vm395_vm4 = vweird.f32 %v388_v58 }
 0x291   : > { %v524_v59 = vpop.eup %523 }
 0x292   : > { %v390_v60 = vmul.f32 %v524_v59, %v388_v58  ;;  %vm396_vm3 = vweird.f32 %v524_v59 }
 0x293   : > { %vm397_vm5 = vmor %vm395_vm4, %vm396_vm3 }
 0x294   : > { %v391_v61 = vmul.f32 %v524_v59, %v390_v60 }
 0x296   : > { %v392_v62 = vmul.f32 0.5, %v391_v61 }
 0x298   : > { %v393_v63 = vsub.f32 1.5, %v392_v62 }
 0x29a   : > { %v394_v0 = vmul.f32 %v524_v59, %v393_v63 }
 0x29c   : > { %v398_v2 = vsel %vm397_vm5, %v524_v59, %v394_v0 }
 0x29d   : > { %v399_v3 = vmul.f32 %v398_v2, %v374_v46 }
 0x29f   : > { %v406_v4 = vmul.f32 %v404_v1, %v399_v3 }
 0x2a1   : > { %v413_v6 = vadd.f32 %v411_v5, %v406_v4 }
 0x2a3   : > { %525 = vtanh.f32 %v413_v6 }
 0x2a9   : > { %v526_v7 = vpop.eup %525 }
 0x2aa   : > { %415 = vst.msk [vmem:[%s222_s23] sm:$0xff] %vm354_vm1, %v526_v7 }
 0x2ab PF: > { %s15_s18 = sadd.s32 1, %s533_s18  }
 0x2ac   : > { %p12_p4 = scmp.ge.s32.totalorder %s15_s18, 4  }
 0x2ae   :  { %14 = sbr.rel (!%p12_p4) target bundleno = 1 (0x1), region = 73 }

// kernel: forward.18
= control target key start
LH: loop header
LB: loop body
LE: loop exit
PB: predicated region body
PF: predicated region fallthrough
CT: control target
= control target key end

     0   :  { %s539_s18 = smov 0   ;;  %s591_s0 = inlined_call_operand.vmem [shape: f32[2,8,67], index: 0, kind: input, shape index: {}]   ;;  %s592_s1 = inlined_call_operand.vmem [shape: f32[4,8,8], index: 1, kind: input, shape index: {}]   ;;  %s593_s2 = inlined_call_operand.vmem [shape: f32[8,1], index: 2, kind: input, shape index: {}]   ;;  %s594_s3 = inlined_call_operand.vmem [shape: f32[8,1], index: 3, kind: input, shape index: {}]   ;;  %s595_s4 = inlined_call_operand.vmem [shape: f32[8,1], index: 4, kind: input, shape index: {}]   ;;  %s596_s5 = inlined_call_operand.vmem [shape: f32[2,8,64], index: 5, kind: output, shape index: {}]  }
   0x1 LB: > { %s455_s19 = sadd.s32 4294967295, %s502_s18   ;;  %p459_p0 = scmp.ge.s32.totalorder %s502_s18, 1  ;;  %s502_s18 = sphi %s539_s18, %s15_s18  }
   0x2   : > { %p186_p1 = scmp.lt.s32.totalorder %s502_s18, 3 }
   0x4   : > { %p187_p2 = pnand %p459_p0, %p186_p1 }
   0x5   : > { %p212_p3 = scmp.lt.s32.totalorder (!%p187_p2), %s455_s19, 1  ;;  %s504_s24 = smov (!%p187_p2), 126  }
   0x6   : > { %190 = sbr.rel (%p187_p2) target bundleno = 677 (0x2a5), region = 40  ;;  %s505_s25 = smov (!%p187_p2), 127  }
   0x7   : > { %s506_s26 = smov (!%p187_p2), 125  }
   0xb   : > { %s598_s19 = smov (!%p212_p3, %s455_s19), 1  ;;  %vm228_vm0 = vcmask 64512   ;;  %v221_v1 = vld [vmem:[%s592_s1] sm:$0xff]  ;;  %v507_v3 = vmov 0   ;;  %v465_v5 = vld [vmem:[%s592_s1 + $0x10] sm:$0xff]  ;;  %v462_v6 = vld [vmem:[%s592_s1 + $0x8] sm:$0xff] }
   0xc   : > { %s460_s20 = sshll.u32 %s598_s19, 3  ;;  %v333_v2 = vld [vmem:[%s593_s2] sm:$0xff]  ;;  %488 = vset.pattern.permute.xlu1 %v507_v3  ;;  %489 = vset.pattern.permute.xlu0 %v507_v3  ;;  %v467_v9 = vld [vmem:[%s592_s1 + $0x18] sm:$0xff]  ;;  %vm340_vm1 = vcmask 523264   ;;  %v508_v28 = vmov 512.0  }
   0xd   : > { %s215_s23 = scalar_lea.vmem %s591_s0, %s460_s20  ;;  %v393_v4 = vld [vmem:[%s595_s4] sm:$0xff]  ;;  %490 = vrcp.f32 %v508_v28 }
   0xe   : > { %v220_v0 = vld [vmem:[%s215_s23] sm:$0xff]  ;;  %s219_s23 = scalar_lea.vmem %s596_s5, %s460_s20 }
   0xf   : > { %277 = vrot.lane.b32.xlu0 %v220_v0, %s504_s24  ;;  %225 = vrot.lane.b32.xlu1 %v220_v0, %s505_s25  ;;  %v386_v29 = vld [vmem:[%s594_s3] sm:$0xff] }
  0x10   : > { %270 = vmatpush.msra.mxu1 %v220_v0 }
  0x11   : > { %464 = vmatmul.msk.f32.vlgmr.msra.gmra.mxu1 %vm228_vm0, %v221_v1 }
  0x13   : > { %v491_v30 = vpop.eup %490 }
  0x14   : > { %v353_v31 = vmul.f32 512.0, %v491_v30  ;;  %vm357_vm2 = vweird.f32 %v491_v30 }
  0x16   : > { %v354_v32 = vsub.f32 1.0, %v353_v31 }
  0x17   : > { %306 = vrot.lane.b32.xlu0 %v220_v0, %s506_s26  ;;  %336 = vperm.xlu1 %488, %v333_v2  }
  0x18   : > { %v355_v33 = vmul.f32 %v491_v30, %v354_v32 }
  0x1a   : > { %v356_v34 = vadd.f32 %v491_v30, %v355_v33 }
  0x1c   : > { %v358_v35 = vsel %vm357_vm2, %v491_v30, %v356_v34 }
  0x1f   : > { %396 = vperm.xlu1 %488, %v393_v4   ;;  %389 = vperm.xlu0 %489, %v386_v29  }
  0x81   : > { %v278_v7 = vpop.permute.xlu0 %277  ;;  %v226_v8 = vpop.permute.xlu1 %225 }
  0x82   : > { %298 = vmatpush.msra.mxu2 %v278_v7  ;;  %247 = vmatpush.msra.mxu0 %v226_v8 }
  0x83   : > { %466 = vmatmul.msk.f32.vlgmr.msra.gmra.mxu2 %vm228_vm0, %v465_v5  ;;  %463 = vmatmul.msk.f32.vlgmr.msra.gmra.mxu0 %vm228_vm0, %v462_v6 }
  0x89   : > { %v307_v10 = vpop.permute.xlu0 %306  ;;  %v337_v18 = vpop.permute.xlu1 %336 }
  0x8a   : > { %327 = vmatpush.msra.mxu3 %v307_v10 }
  0x8b   : > { %468 = vmatmul.msk.f32.vlgmr.msra.gmra.mxu3 %vm228_vm0, %v467_v9 }
  0x8e   : > { %v272_v12 = vpop.f32.mrf.mxu1 }
  0x91   : > { %v390_v57 = vpop.permute.xlu0 %389  ;;  %v397_v61 = vpop.permute.xlu1 %396 }
 0x100   : > { %v249_v11 = vpop.f32.mrf.mxu0 }
 0x101   : > { %v273_v13 = vadd.f32 %v272_v12, %v249_v11 }
 0x106   : > { %v300_v14 = vpop.f32.mrf.mxu2 }
 0x107   : > { %v303_v15 = vadd.f32 %v300_v14, %v273_v13 }
 0x10e   : > { %v329_v16 = vpop.f32.mrf.mxu3 }
 0x10f   : > { %v332_v17 = vadd.f32 %v329_v16, %v303_v15 }
 0x111   : > { %v339_v19 = vadd.f32 %v337_v18, %v332_v17 }
 0x113   : > { %v341_v20 = vsel %vm340_vm1, %v339_v19, 0.0 }
 0x114   : > { %342 = vadd.xlane.f32.xlu2 %v341_v20 }
 0x187   : > { %v343_v21 = vpop.xlane.xlu2 %342 }
 0x188   : > { %v344_v22 = vrot.slane %v343_v21, 4 }
 0x18a   : > { %v345_v23 = vadd.f32 %v344_v22, %v343_v21 }
 0x18c   : > { %v346_v24 = vrot.slane %v345_v23, 2 }
 0x18e   : > { %v347_v25 = vadd.f32 %v346_v24, %v345_v23 }
 0x190   : > { %v348_v26 = vrot.slane %v347_v25, 1 }
 0x192   : > { %v349_v27 = vadd.f32 %v348_v26, %v347_v25 }
 0x194   : > { %471 = vpush %v349_v27 }
 0x1c5   : > { %s472_s16 = spop %471 }
 0x1c6   : > { %v351_v36 = vstv %s472_s16 }
 0x1c7   : > { %v359_v37 = vmul.f32 %v358_v35, %v351_v36 }
 0x1c9   : > { %v360_v38 = vsub.f32 %v339_v19, %v359_v37 }
 0x1cb   : > { %v361_v39 = vmul.f32 %v360_v38, %v360_v38 }
 0x1cd   : > { %v362_v40 = vsel %vm340_vm1, %v361_v39, 0.0 }
 0x1ce   : > { %363 = vadd.xlane.f32.xlu2 %v362_v40 }
 0x241   : > { %v364_v41 = vpop.xlane.xlu2 %363 }
 0x242   : > { %v365_v42 = vrot.slane %v364_v41, 4 }
 0x244   : > { %v366_v43 = vadd.f32 %v365_v42, %v364_v41 }
 0x246   : > { %v367_v44 = vrot.slane %v366_v43, 2 }
 0x248   : > { %v368_v45 = vadd.f32 %v367_v44, %v366_v43 }
 0x24a   : > { %v369_v46 = vrot.slane %v368_v45, 1 }
 0x24c   : > { %v370_v47 = vadd.f32 %v369_v46, %v368_v45 }
 0x24e   : > { %473 = vpush %v370_v47 }
 0x27f   : > { %s474_s17 = spop %473 }
 0x280   : > { %v372_v48 = vstv %s474_s17 }
 0x281   : > { %v373_v49 = vmul.f32 %v372_v48, %v358_v35 }
 0x283   : > { %v374_v50 = vadd.f32 1e-05, %v373_v49 }
 0x285   : > { %492 = vrsqrt.f32 %v374_v50  ;;  %vm381_vm4 = vweird.f32 %v374_v50 }
 0x28b   : > { %v493_v51 = vpop.eup %492 }
 0x28c   : > { %v376_v52 = vmul.f32 %v493_v51, %v374_v50  ;;  %vm382_vm3 = vweird.f32 %v493_v51 }
 0x28d   : > { %vm383_vm5 = vmor %vm381_vm4, %vm382_vm3 }
 0x28e   : > { %v377_v53 = vmul.f32 %v493_v51, %v376_v52 }
 0x290   : > { %v378_v54 = vmul.f32 0.5, %v377_v53 }
 0x292   : > { %v379_v55 = vsub.f32 1.5, %v378_v54 }
 0x294   : > { %v380_v56 = vmul.f32 %v493_v51, %v379_v55 }
 0x296   : > { %v384_v58 = vsel %vm383_vm5, %v493_v51, %v380_v56 }
 0x297   : > { %v385_v59 = vmul.f32 %v384_v58, %v360_v38 }
 0x299   : > { %v392_v60 = vmul.f32 %v390_v57, %v385_v59 }
 0x29b   : > { %v399_v62 = vadd.f32 %v397_v61, %v392_v60 }
 0x29d   : > { %494 = vtanh.f32 %v399_v62 }
 0x2a3   : > { %v495_v63 = vpop.eup %494 }
 0x2a4   : > { %401 = vst.msk [vmem:[%s219_s23] sm:$0xff] %vm340_vm1, %v495_v63 }
 0x2a5 PF: > { %s15_s18 = sadd.s32 1, %s502_s18  }
 0x2a6   : > { %p12_p4 = scmp.ge.s32.totalorder %s15_s18, 4  }
 0x2a8   :  { %14 = sbr.rel (!%p12_p4) target bundleno = 1 (0x1), region = 73 }

// kernel: forward.19
= control target key start
LH: loop header
LB: loop body
LE: loop exit
PB: predicated region body
PF: predicated region fallthrough
CT: control target
= control target key end

     0   :  { %s1042_s19 = smov 0   ;;  %s1199_s0 = inlined_call_operand.vmem [shape: f32[2,64,8], index: 0, kind: input, shape index: {}]   ;;  %s1200_s1 = inlined_call_operand.vmem [shape: f32[8,24], index: 1, kind: input, shape index: {}]   ;;  %s1201_s2 = inlined_call_operand.vmem [shape: f32[8,24], index: 2, kind: input, shape index: {}]   ;;  %s1202_s3 = inlined_call_operand.vmem [shape: f32[1,24], index: 3, kind: input, shape index: {}]   ;;  %s1203_s4 = inlined_call_operand.vmem [shape: f32[1,24], index: 4, kind: input, shape index: {}]   ;;  %s1204_s5 = inlined_call_operand.vmem [shape: f32[8,24], index: 5, kind: input, shape index: {}]   ;;  %s1205_s6 = inlined_call_operand.vmem [shape: f32[8,24], index: 6, kind: input, shape index: {}]   ;;  %s1206_s7 = inlined_call_operand.vmem [shape: f32[1,24], index: 7, kind: input, shape index: {}]   ;;  %s1207_s8 = inlined_call_operand.vmem [shape: f32[1,24], index: 8, kind: input, shape index: {}]   ;;  %s1208_s9 = inlined_call_operand.vmem [shape: f32[16,1], index: 9, kind: input, shape index: {}]   ;;  %s1209_s10 = inlined_call_operand.<no memory space> [shape: f32[1,1], index: 10, kind: input, shape index: {}]   ;;  %s1210_s11 = inlined_call_operand.vmem [shape: f32[2,64,1], index: 11, kind: output, shape index: {}]  }
   0x1   :  { %v16_v0 = vstv %s1209_s10 }
   0x2   :  { %17 = vst [vmem:[#allocation5] sm:$0x1] %v16_v0 }
   0x3 LB: > { %s845_s20 = sadd.s32 4294967295, %s962_s19   ;;  %p849_p0 = scmp.ge.s32.totalorder %s962_s19, 1  ;;  %s962_s19 = sphi %s1042_s19, %s23_s19  }
   0x4   : > { %p339_p1 = scmp.lt.s32.totalorder %s962_s19, 3 }
   0x6   : > { %p340_p2 = pnand %p849_p0, %p339_p1 }
   0x7   : > { %p379_p3 = scmp.lt.s32.totalorder (!%p340_p2), %s845_s20, 1 }
   0x8   : > { %343 = sbr.rel (%p340_p2) target bundleno = 1001 (0x3e9), region = 64 }
   0xd   : > { %v397_v1 = vld [vmem:[%s1200_s1] sm:$0xff]  ;;  %s1212_s20 = smov (!%p379_p3, %s845_s20), 1  ;;  %vm402_vm0 = vcmask 64512   ;;  %vm468_vm1 = vcmask 195584   ;;  %v1122_v49 = vmov 0.0   ;;  %v1124_v50 = vmov 0.0  }
   0xe   : > { %v477_v2 = vld [vmem:[%s1204_s5] sm:$0xff]  ;;  %886 = vmatpush.msra.mxu2 %v397_v1  ;;  %442 = vmatpush.msra.mxu0 %v397_v1  ;;  %s884_s24 = sshll.u32 %s1212_s20, 6 }
   0xf   : > { %887 = vmatpush.msra.mxu3 %v477_v2  ;;  %497 = vmatpush.msra.mxu1 %v477_v2  ;;  %s383_s27 = scalar_lea.vmem %s1199_s0, %s884_s24  ;;  %s1062_s30 = scalar_lea.vmem %s1210_s11, %s884_s24  ;;  %v929_v11 = vld [vmem:[%s1202_s3] ss:$0 sm:$0xff] }
  0x10   : > { %v393_v3 = vld [vmem:[%s383_s27 + $0x20] sm:$0xff]  ;;  %v394_v5 = vld [vmem:[%s383_s27 + $0x28] sm:$0xff]  ;;  %v395_v7 = vld [vmem:[%s383_s27 + $0x30] sm:$0xff]  ;;  %s1126_s24 = smov 0  }
  0x11   : > { %v389_v4 = vld [vmem:[%s383_s27] sm:$0xff]  ;;  %858 = vmatmul.msk.f32.vlgmr.msra.gmra.mxu2 %vm402_vm0, %v393_v3  ;;  %866 = vmatmul.msk.f32.vlgmr.msra.gmra.mxu3 %vm402_vm0, %v393_v3  ;;  %v390_v6 = vld [vmem:[%s383_s27 + $0x8] sm:$0xff]  ;;  %v391_v8 = vld [vmem:[%s383_s27 + $0x10] sm:$0xff] }
  0x12   : > { %854 = vmatmul.msk.f32.vlgmr.msra.gmra.mxu0 %vm402_vm0, %v389_v4  ;;  %862 = vmatmul.msk.f32.vlgmr.msra.gmra.mxu1 %vm402_vm0, %v389_v4  ;;  %v396_v9 = vld [vmem:[%s383_s27 + $0x38] sm:$0xff]  ;;  %v930_v12 = vld [vmem:[%s1206_s7] ss:$0 sm:$0xff] }
  0x13   : > { %v392_v10 = vld [vmem:[%s383_s27 + $0x18] sm:$0xff]  ;;  %v1089_v17 = vld [vmem:[%s1201_s2] sm:$0xff] }
  0x14   : > { %v1094_v18 = vld [vmem:[%s1203_s4] sm:$0x1] }
  0x15   : > { %v1099_v19 = vld [vmem:[%s1205_s6] sm:$0xff] }
  0x16   : > { %v1104_v20 = vld [vmem:[%s1207_s8] sm:$0x1] }
  0x19   : > { %859 = vmatmul.msk.f32.gmra.mxu2 %vm402_vm0, %v394_v5  ;;  %867 = vmatmul.msk.f32.gmra.mxu3 %vm402_vm0, %v394_v5 }
  0x1a   : > { %855 = vmatmul.msk.f32.gmra.mxu0 %vm402_vm0, %v390_v6  ;;  %863 = vmatmul.msk.f32.gmra.mxu1 %vm402_vm0, %v390_v6 }
  0x21   : > { %860 = vmatmul.msk.f32.gmra.mxu2 %vm402_vm0, %v395_v7  ;;  %868 = vmatmul.msk.f32.gmra.mxu3 %vm402_vm0, %v395_v7 }
  0x22   : > { %856 = vmatmul.msk.f32.gmra.mxu0 %vm402_vm0, %v391_v8  ;;  %864 = vmatmul.msk.f32.gmra.mxu1 %vm402_vm0, %v391_v8 }
  0x29   : > { %861 = vmatmul.msk.f32.gmra.mxu2 %vm402_vm0, %v396_v9  ;;  %869 = vmatmul.msk.f32.gmra.mxu3 %vm402_vm0, %v396_v9 }
  0x2a   : > { %857 = vmatmul.msk.f32.gmra.mxu0 %vm402_vm0, %v392_v10  ;;  %865 = vmatmul.msk.f32.gmra.mxu1 %vm402_vm0, %v392_v10 }
  0x8f   : > { %v444_v13 = vpop.f32.mrf.mxu0  ;;  %v499_v14 = vpop.f32.mrf.mxu1 }
  0x90   : > { %v445_v15 = vadd.f32 %v929_v11, %v444_v13  ;;  %v500_v16 = vadd.f32 %v930_v12, %v499_v14 }
  0x92   : > { %469 = vst.msk [vmem:[#allocation2] sm:$0xff] %vm468_vm1, %v445_v15 }
  0x93   : > { %523 = vst.msk [vmem:[#allocation3] sm:$0xff] %vm468_vm1, %v500_v16 }
  0x94   : > { %v456_v21 = vpop.f32.mrf.mxu2  ;;  %v511_v22 = vpop.f32.mrf.mxu3 }
  0x95   : > { %v457_v23 = vadd.f32 %v929_v11, %v456_v21  ;;  %v512_v24 = vadd.f32 %v930_v12, %v511_v22 }
  0x97   : > { %473 = vst.msk [vmem:[#allocation2 + $0x20] sm:$0xff] %vm468_vm1, %v457_v23  ;;  %v447_v25 = vpop.f32.mrf.mxu0  ;;  %v502_v26 = vpop.f32.mrf.mxu1 }
  0x98   : > { %527 = vst.msk [vmem:[#allocation3 + $0x20] sm:$0xff] %vm468_vm1, %v512_v24  ;;  %v448_v27 = vadd.f32 %v929_v11, %v447_v25  ;;  %v503_v28 = vadd.f32 %v930_v12, %v502_v26 }
  0x9a   : > { %470 = vst.msk [vmem:[#allocation2 + $0x8] sm:$0xff] %vm468_vm1, %v448_v27 }
  0x9b   : > { %524 = vst.msk [vmem:[#allocation3 + $0x8] sm:$0xff] %vm468_vm1, %v503_v28 }
  0x9c   : > { %v459_v29 = vpop.f32.mrf.mxu2  ;;  %v514_v30 = vpop.f32.mrf.mxu3 }
  0x9d   : > { %v460_v31 = vadd.f32 %v929_v11, %v459_v29  ;;  %v515_v32 = vadd.f32 %v930_v12, %v514_v30 }
  0x9f   : > { %474 = vst.msk [vmem:[#allocation2 + $0x28] sm:$0xff] %vm468_vm1, %v460_v31  ;;  %v450_v33 = vpop.f32.mrf.mxu0  ;;  %v505_v34 = vpop.f32.mrf.mxu1 }
  0xa0   : > { %528 = vst.msk [vmem:[#allocation3 + $0x28] sm:$0xff] %vm468_vm1, %v515_v32  ;;  %v451_v35 = vadd.f32 %v929_v11, %v450_v33  ;;  %v506_v36 = vadd.f32 %v930_v12, %v505_v34 }
  0xa2   : > { %471 = vst.msk [vmem:[#allocation2 + $0x10] sm:$0xff] %vm468_vm1, %v451_v35 }
  0xa3   : > { %525 = vst.msk [vmem:[#allocation3 + $0x10] sm:$0xff] %vm468_vm1, %v506_v36 }
  0xa4   : > { %v462_v37 = vpop.f32.mrf.mxu2  ;;  %v517_v38 = vpop.f32.mrf.mxu3 }
  0xa5   : > { %v463_v39 = vadd.f32 %v929_v11, %v462_v37  ;;  %v518_v40 = vadd.f32 %v930_v12, %v517_v38 }
  0xa7   : > { %475 = vst.msk [vmem:[#allocation2 + $0x30] sm:$0xff] %vm468_vm1, %v463_v39  ;;  %v453_v41 = vpop.f32.mrf.mxu0  ;;  %v508_v42 = vpop.f32.mrf.mxu1 }
  0xa8   : > { %529 = vst.msk [vmem:[#allocation3 + $0x30] sm:$0xff] %vm468_vm1, %v518_v40  ;;  %v454_v43 = vadd.f32 %v929_v11, %v453_v41  ;;  %v509_v44 = vadd.f32 %v930_v12, %v508_v42 }
  0xaa   : > { %472 = vst.msk [vmem:[#allocation2 + $0x18] sm:$0xff] %vm468_vm1, %v454_v43 }
  0xab   : > { %526 = vst.msk [vmem:[#allocation3 + $0x18] sm:$0xff] %vm468_vm1, %v509_v44 }
  0xac   : > { %v465_v45 = vpop.f32.mrf.mxu2  ;;  %v520_v46 = vpop.f32.mrf.mxu3 }
  0xad   : > { %v466_v47 = vadd.f32 %v929_v11, %v465_v45  ;;  %v521_v48 = vadd.f32 %v930_v12, %v520_v46 }
  0xaf   : > { %476 = vst.msk [vmem:[#allocation2 + $0x38] sm:$0xff] %vm468_vm1, %v466_v47 }
  0xb0   : > { %530 = vst.msk [vmem:[#allocation3 + $0x38] sm:$0xff] %vm468_vm1, %v521_v48 }
  0xb1 LB: >> { %566 = vmatpush.msra.mxu0 %v1089_v17  ;;  %632 = vmatpush.msra.mxu1 %v1099_v19  ;;  %s976_s25 = smov 120   ;;  %s977_s26 = smov 112   ;;  %vm681_vm10 = vcmask 57344   ;;  %vm684_vm11 = vcmask 122944   ;;  %s974_s24 = sphi %s1126_s24, %s540_s24   ;;  %v970_v50 = vphi %v1124_v50, %v609_v50   ;;  %v966_v49 = vphi %v1122_v49, %v675_v49  }
  0xb2   : >> { %547 = vrot.lane.b32.xlu0 %v970_v50, %s976_s25  ;;  %s544_s27 = scalar_lea.vmem [#allocation2], %s974_s24  ;;  %s543_s28 = ssub.s32 63, %s974_s24 }
  0xb3   : >> { %s610_s29 = scalar_lea.vmem [#allocation3], %s543_s28  ;;  %s978_s12 = smov 16  }
  0xb4   : >> { %s680_s13 = scalar_lea.vmem [#allocation4], %s974_s24  ;;  %s683_s14 = scalar_lea.vmem [#allocation4], %s543_s28 }
  0xb5   : >> { %s540_s24 = sadd.s32 1, %s974_s24  }
  0xb6   : >> { %v545_v57 = vld [vmem:[%s544_s27] sm:$0x1]  ;;  %p537_p4 = scmp.ge.s32.totalorder %s540_s24, 64  }
  0xb7   : >> { %v611_v60 = vld [vmem:[%s610_s29] sm:$0x1]  ;;  %v695_v46 = vld [vmem:[%s1208_s9 + $0x8] sm:$0xff] (%p537_p4)  ;;  %vm700_vm12 = vcmask (%p537_p4), 130048   ;;  %vm766_vm13 = vcmask (%p537_p4), 7168  }
  0xb8   : > { %v694_v47 = vld [vmem:[%s1208_s9] sm:$0xff] (%p537_p4)  ;;  %889 = vmatpush.msra.mxu2 (%p537_p4), %v695_v46  ;;  %890 = vmatpush.msra.mxu3 (%p537_p4), %v695_v46 }
  0xba   : >> { %613 = vrot.lane.b32.xlu0 %v966_v49, %s976_s25  ;;  %892 = vmatpush.msra.mxu2 (%p537_p4), %v694_v47 }
  0xbb   : > { %893 = vmatpush.msra.mxu3 (%p537_p4), %v694_v47 }
 0x124   : >> { %v548_v51 = vpop.permute.xlu0 %547 }
 0x125   : >> { %870 = vmatmul.msk.f32.vlgmr.msra.gmra.mxu0 %vm402_vm0, %v548_v51 }
 0x126   : > { %739 = vmatpush.msra.mxu0 (%p537_p4), %v695_v46 }
 0x128   : > { %740 = vmatpush.msra.mxu0 (%p537_p4), %v694_v47 }
 0x12c   : >> { %v614_v52 = vpop.permute.xlu0 %613 }
 0x12d   : >> { %872 = vmatmul.msk.f32.vlgmr.msra.gmra.mxu1 %vm402_vm0, %v614_v52 }
 0x12e   : > { %888 = vmatpush.msra.mxu1 (%p537_p4), %v695_v46 }
 0x130   : > { %891 = vmatpush.msra.mxu1 (%p537_p4), %v694_v47 }
 0x1a2   : >> { %v568_v53 = vpop.f32.mrf.mxu0 }
 0x1a3   : >> { %v569_v54 = vadd.f32 %v568_v53, %v1094_v18 }
 0x1a5   : >> { %592 = vrot.lane.b32.xlu1 %v569_v54, %s977_s26  ;;  %v571_v58 = vadd.f32 %v569_v54, %v545_v57 }
 0x1a7   : >> { %v871_v59 = vmul.f32 -1.442695, %v571_v58 }
 0x1a9   : >> { %931 = vpow2.f32 %v871_v59 }
 0x1aa   : >> { %v634_v55 = vpop.f32.mrf.mxu1 }
 0x1ab   : >> { %v635_v56 = vadd.f32 %v634_v55, %v1104_v20 }
 0x1ad   : >> { %658 = vrot.lane.b32.xlu1 %v635_v56, %s977_s26  ;;  %v637_v61 = vadd.f32 %v635_v56, %v611_v60 }
 0x1af   : >> { %v873_v62 = vmul.f32 -1.442695, %v637_v61  ;;  %v932_v63 = vpop.eup %931 }
 0x1b0   : >> { %v575_v0 = vadd.f32 1.0, %v932_v63 }
 0x1b1   : >> { %933 = vpow2.f32 %v873_v62 }
 0x1b2   : >> { %935 = vrcp.f32 %v575_v0  ;;  %v587_v11 = vand.u32 2147483648, %v575_v0  ;;  %vm581_vm3 = vweird.f32 %v575_v0  ;;  %v585_v12 = vand.u32 2147483647, %v575_v0 }
 0x1b4   : >> { %v588_v15 = vor.u32 1.1754944e-38, %v587_v11  ;;  %vm586_vm5 = vcmp.eq.f32.partialorder %v585_v12, 8.507059e+37 }
 0x1b7   : >> { %v934_v1 = vpop.eup %933 }
 0x1b8   : >> { %v641_v2 = vadd.f32 1.0, %v934_v1  ;;  %v936_v3 = vpop.eup %935 }
 0x1b9   : >> { %v577_v4 = vmul.f32 %v936_v3, %v575_v0  ;;  %vm582_vm2 = vweird.f32 %v936_v3 }
 0x1ba   : >> { %937 = vrcp.f32 %v641_v2  ;;  %vm583_vm4 = vmor %vm581_vm3, %vm582_vm2  ;;  %vm647_vm6 = vweird.f32 %v641_v2  ;;  %v653_v22 = vand.u32 2147483648, %v641_v2  ;;  %v651_v25 = vand.u32 2147483647, %v641_v2 }
 0x1bb   : >> { %v578_v5 = vsub.f32 1.0, %v577_v4 }
 0x1bc   : >> { %v654_v26 = vor.u32 1.1754944e-38, %v653_v22  ;;  %vm652_vm9 = vcmp.eq.f32.partialorder %v651_v25, 8.507059e+37 }
 0x1bd   : >> { %v579_v7 = vmul.f32 %v936_v3, %v578_v5 }
 0x1bf   : >> { %v580_v9 = vadd.f32 %v936_v3, %v579_v7 }
 0x1c0   : >> { %v938_v6 = vpop.eup %937 }
 0x1c1   : >> { %v643_v8 = vmul.f32 %v938_v6, %v641_v2  ;;  %v584_v13 = vsel %vm583_vm4, %v936_v3, %v580_v9  ;;  %vm648_vm7 = vweird.f32 %v938_v6 }
 0x1c2   : >> { %v589_v21 = vsel %vm586_vm5, %v588_v15, %v584_v13  ;;  %vm649_vm8 = vmor %vm647_vm6, %vm648_vm7 }
 0x1c3   : >> { %v644_v10 = vsub.f32 1.0, %v643_v8  ;;  %v602_v37 = vsub.f32 1.0, %v589_v21  ;;  %v608_v39 = vmul.f32 %v970_v50, %v589_v21 }
 0x1c5   : >> { %v645_v14 = vmul.f32 %v938_v6, %v644_v10 }
 0x1c7   : >> { %v646_v24 = vadd.f32 %v938_v6, %v645_v14 }
 0x1c9   : >> { %v650_v27 = vsel %vm649_vm8, %v938_v6, %v646_v24 }
 0x1ca   : >> { %v655_v29 = vsel %vm652_vm9, %v654_v26, %v650_v27 }
 0x1cb   : >> { %v668_v42 = vsub.f32 1.0, %v655_v29  ;;  %v674_v44 = vmul.f32 %v966_v49, %v655_v29 }
 0x217   : >> { %v593_v16 = vpop.permute.xlu1 %592 }
 0x218   : >> { %v595_v23 = vmul.f32 %v593_v16, %v589_v21 }
 0x21a   : >> { %597 = vrot.lane.b32.xlu2 %v595_v23, %s978_s12 }
 0x21f   : >> { %v659_v28 = vpop.permute.xlu1 %658 }
 0x220   : >> { %v661_v30 = vmul.f32 %v659_v28, %v655_v29 }
 0x222   : >> { %663 = vrot.lane.b32.xlu2 %v661_v30, %s978_s12 }
 0x274   : >> { %v598_v31 = vpop.permute.xlu2 %597 }
 0x275   : >> { %v600_v32 = vadd.f32 %v598_v31, %v545_v57 }
 0x277   : >> { %939 = vtanh.f32 %v600_v32 }
 0x27c   : >> { %v664_v33 = vpop.permute.xlu2 %663 }
 0x27d   : >> { %v940_v34 = vpop.eup %939  ;;  %v666_v35 = vadd.f32 %v664_v33, %v611_v60 }
 0x27e   : >> { %604 = vrot.lane.b32.xlu0 %v940_v34, %s976_s25 }
 0x27f   : >> { %941 = vtanh.f32 %v666_v35 }
 0x285   : >> { %v942_v36 = vpop.eup %941 }
 0x286   : >> { %670 = vrot.lane.b32.xlu1 %v942_v36, %s976_s25 }
 0x2f0   : >> { %v605_v38 = vpop.permute.xlu0 %604 }
 0x2f1   : >> { %v607_v40 = vmul.f32 %v605_v38, %v602_v37 }
 0x2f3   : >> { %v609_v50 = vadd.f32 %v608_v39, %v607_v40  }
 0x2f5   : >> { %677 = vrot.lane.b32.xlu2 %v609_v50, %s976_s25 }
 0x2f8   : >> { %v671_v41 = vpop.permute.xlu1 %670 }
 0x2f9   : >> { %v673_v43 = vmul.f32 %v671_v41, %v668_v42 }
 0x2fb   : >> { %v675_v49 = vadd.f32 %v674_v44, %v673_v43  }
 0x34d   : > { %539 = sbr.rel (!%p537_p4) target bundleno = 177 (0xb1), region = 105 }
 0x34f   : >> { %v678_v45 = vpop.permute.xlu2 %677 }
 0x350   : >> { %682 = vst.msk [vmem:[%s680_s13] sm:$0x1] %vm681_vm10, %v678_v45 }
 0x351   : >> { %685 = vst.msk [vmem:[%s683_s14] sm:$0x1] %vm684_vm11, %v675_v49  ;;  %v943_v49 = vld [vmem:[#allocation5] ss:$0 sm:$0xff] (%p537_p4) }
 0x358   : > { %v690_v48 = vld [vmem:[#allocation4 + $0x20] sm:$0xff]  ;;  %v692_v51 = vld [vmem:[#allocation4 + $0x30] sm:$0xff]  ;;  %v691_v17 = vld [vmem:[#allocation4 + $0x28] sm:$0xff] }
 0x359   : > { %v686_v50 = vld [vmem:[#allocation4] sm:$0xff]  ;;  %v688_v52 = vld [vmem:[#allocation4 + $0x10] sm:$0xff]  ;;  %878 = vmatmul.msk.f32.vlgmr.msra.gmra.mxu2 %vm700_vm12, %v690_v48  ;;  %880 = vmatmul.msk.f32.vlgmr.msra.gmra.mxu3 %vm700_vm12, %v692_v51  ;;  %v693_v18 = vld [vmem:[#allocation4 + $0x38] sm:$0xff] }
 0x35a   : > { %874 = vmatmul.msk.f32.vlgmr.msra.gmra.mxu0 %vm700_vm12, %v686_v50  ;;  %876 = vmatmul.msk.f32.vlgmr.msra.gmra.mxu1 %vm700_vm12, %v688_v52  ;;  %v687_v19 = vld [vmem:[#allocation4 + $0x8] sm:$0xff]  ;;  %v689_v20 = vld [vmem:[#allocation4 + $0x18] sm:$0xff] }
 0x361   : > { %879 = vmatmul.msk.f32.gmra.mxu2 %vm700_vm12, %v691_v17  ;;  %881 = vmatmul.msk.f32.gmra.mxu3 %vm700_vm12, %v693_v18 }
 0x362   : > { %875 = vmatmul.msk.f32.gmra.mxu0 %vm700_vm12, %v687_v19  ;;  %877 = vmatmul.msk.f32.gmra.mxu1 %vm700_vm12, %v689_v20 }
 0x3d7   : > { %v742_v53 = vpop.f32.mrf.mxu0  ;;  %v748_v54 = vpop.f32.mrf.mxu1 }
 0x3d8   : > { %v743_v55 = vadd.f32 %v943_v49, %v742_v53  ;;  %v749_v56 = vadd.f32 %v943_v49, %v748_v54 }
 0x3da   : > { %767 = vst.msk [vmem:[%s1062_s30] sm:$0xff] %vm766_vm13, %v743_v55 }
 0x3db   : > { %769 = vst.msk [vmem:[%s1062_s30 + $0x10] sm:$0xff] %vm766_vm13, %v749_v56 }
 0x3dc   : > { %v754_v57 = vpop.f32.mrf.mxu2  ;;  %v760_v58 = vpop.f32.mrf.mxu3 }
 0x3dd   : > { %v755_v59 = vadd.f32 %v943_v49, %v754_v57  ;;  %v761_v60 = vadd.f32 %v943_v49, %v760_v58 }
 0x3df   : > { %771 = vst.msk [vmem:[%s1062_s30 + $0x20] sm:$0xff] %vm766_vm13, %v755_v59  ;;  %v745_v61 = vpop.f32.mrf.mxu0  ;;  %v751_v62 = vpop.f32.mrf.mxu1 }
 0x3e0   : > { %773 = vst.msk [vmem:[%s1062_s30 + $0x30] sm:$0xff] %vm766_vm13, %v761_v60  ;;  %v746_v63 = vadd.f32 %v943_v49, %v745_v61  ;;  %v752_v0 = vadd.f32 %v943_v49, %v751_v62 }
 0x3e2   : > { %768 = vst.msk [vmem:[%s1062_s30 + $0x8] sm:$0xff] %vm766_vm13, %v746_v63 }
 0x3e3   : > { %770 = vst.msk [vmem:[%s1062_s30 + $0x18] sm:$0xff] %vm766_vm13, %v752_v0 }
 0x3e4   : > { %v757_v1 = vpop.f32.mrf.mxu2  ;;  %v763_v2 = vpop.f32.mrf.mxu3 }
 0x3e5   : > { %v758_v3 = vadd.f32 %v943_v49, %v757_v1  ;;  %v764_v4 = vadd.f32 %v943_v49, %v763_v2 }
 0x3e7   : > { %772 = vst.msk [vmem:[%s1062_s30 + $0x28] sm:$0xff] %vm766_vm13, %v758_v3 }
 0x3e8   : > { %774 = vst.msk [vmem:[%s1062_s30 + $0x38] sm:$0xff] %vm766_vm13, %v764_v4 }
 0x3e9 PF: > { %s23_s19 = sadd.s32 1, %s962_s19  }
 0x3ea   : > { %p20_p5 = scmp.ge.s32.totalorder %s23_s19, 4  }
 0x3ec   :  { %22 = sbr.rel (!%p20_p5) target bundleno = 3 (0x3), region = 116 }

</bundles_post_ra>
